<compile_context>
chip_gen: v7x
topology: tpu7x:2x2x1
jax: 0.10.0
libtpu: 0.0.40
codegen_flags: <defaults>
</compile_context>

<pallas_src>
import functools

import jax
import jax.numpy as jnp
from jax.experimental import pallas as pl
from jax.experimental.pallas import tpu as pltpu

LRELU_SLOPE = 0.2
BN_EPS = 1e-5


def _round_up(x, mult):
    return ((x + mult - 1) // mult) * mult


def _pick_tile(m, target=512):
    """Largest divisor of m that is <= target (prefer multiples of 16 for bf16)."""
    if m <= target:
        return m
    for align in (16, 8, 1):
        cands = [t for t in range(align, target + 1, align) if m % t == 0]
        if cands:
            return cands[-1]
    return m


# ---------------------------------------------------------------------------
# Pallas kernels
# ---------------------------------------------------------------------------
def _conv_mm_kernel(*refs, epilogue_slope, fuse_prologue, collect_stats):
    """Fused conv-as-matmul kernel.

    refs = (patches, w, b[, scale_k, shift_k], y_out[, stats_out])
      prologue  : previous layer's BN affine + LeakyReLU on the patch tile
      matmul    : bf16 x bf16 -> f32 accumulation on the MXU
      epilogue  : + bias, optional LeakyReLU, optional BN batch-stats
                  accumulation into a resident (2, Cout) output.
    """
    x_ref, w_ref, b_ref = refs[0], refs[1], refs[2]
    i = 3
    if fuse_prologue:
        scale_ref, shift_ref = refs[3], refs[4]
        i = 5
    o_ref = refs[i]
    stats_ref = refs[i + 1] if collect_stats else None

    x = x_ref[...].astype(jnp.float32)
    if fuse_prologue:
        z = x * scale_ref[...] + shift_ref[...]
        x = jnp.where(z >= 0, z, LRELU_SLOPE * z)

    acc = jnp.dot(x.astype(jnp.bfloat16), w_ref[...],
                  preferred_element_type=jnp.float32)
    acc = acc + b_ref[...]

    if collect_stats:
        @pl.when(pl.program_id(0) == 0)
        def _():
            stats_ref[...] = jnp.zeros_like(stats_ref)

        stats_ref[0:1, :] += jnp.sum(acc, axis=0, keepdims=True)
        stats_ref[1:2, :] += jnp.sum(acc * acc, axis=0, keepdims=True)

    if epilogue_slope is not None:
        acc = jnp.where(acc >= 0, acc, epilogue_slope * acc)
    o_ref[...] = acc.astype(o_ref.dtype)


def conv_matmul(patches, w, b, *, scale_k=None, shift_k=None,
                collect_stats=False, epilogue_slope=None,
                tile_m=512, out_dtype=jnp.bfloat16):
    """(M, K) @ (K, Cout) with fused prologue/epilogue. Returns y [, (2,Cout) stats]."""
    M, K = patches.shape
    Kw, Cout = w.shape
    assert K == Kw, (K, Kw)
    tm = _pick_tile(M, tile_m)
    grid = (M // tm,)
    fuse_prologue = scale_k is not None

    kernel = functools.partial(_conv_mm_kernel,
                               epilogue_slope=epilogue_slope,
                               fuse_prologue=fuse_prologue,
                               collect_stats=collect_stats)

    in_specs = [
        pl.BlockSpec((tm, K), lambda i: (i, 0)),
        pl.BlockSpec((K, Cout), lambda i: (0, 0)),
        pl.BlockSpec((1, Cout), lambda i: (0, 0)),
    ]
    inputs = [patches, w, b.reshape(1, Cout).astype(jnp.float32)]
    if fuse_prologue:
        in_specs += [pl.BlockSpec((1, K), lambda i: (0, 0)),
                     pl.BlockSpec((1, K), lambda i: (0, 0))]
        inputs += [scale_k.reshape(1, K).astype(jnp.float32),
                   shift_k.reshape(1, K).astype(jnp.float32)]

    out_shape = [jax.ShapeDtypeStruct((M, Cout), out_dtype)]
    out_specs = [pl.BlockSpec((tm, Cout), lambda i: (i, 0))]
    if collect_stats:
        out_shape.append(jax.ShapeDtypeStruct((2, Cout), jnp.float32))
        out_specs.append(pl.BlockSpec((2, Cout), lambda i: (0, 0)))

    # With stats the grid axis carries a resident accumulator -> "arbitrary";
    # otherwise it is embarrassingly parallel over M tiles (v7x megacore).
    semantics = ("arbitrary",) if collect_stats else ("parallel",)

    result = pl.pallas_call(
        kernel,
        out_shape=tuple(out_shape),
        grid_spec=pltpu.PrefetchScalarGridSpec(
            num_scalar_prefetch=0,
            grid=grid,
            in_specs=in_specs,
            out_specs=tuple(out_specs),
        ),
        compiler_params=pltpu.CompilerParams(dimension_semantics=semantics),
    )(*inputs)

    if collect_stats:
        return result[0], result[1]
    return result[0]


def _final_head_kernel(y_ref, w_ref, scale_ref, shift_ref, b_ref, o_ref):
    """BN4 affine + LeakyReLU + 4x4 valid conv (Cout=1) as a VPU reduction."""
    x = y_ref[...].astype(jnp.float32)                   # (B, K)
    z = x * scale_ref[...] + shift_ref[...]
    z = jnp.where(z >= 0, z, LRELU_SLOPE * z)
    o_ref[...] = jnp.sum(z * w_ref[...], axis=1, keepdims=True) + b_ref[...]


def final_head(y4, w_vec, scale_k, shift_k, b):
    B, K = y4.shape
    return pl.pallas_call(
        _final_head_kernel,
        out_shape=jax.ShapeDtypeStruct((B, 1), jnp.float32),
        grid_spec=pltpu.PrefetchScalarGridSpec(
            num_scalar_prefetch=0,
            grid=(1,),
            in_specs=[
                pl.BlockSpec((B, K), lambda i: (0, 0)),
                pl.BlockSpec((1, K), lambda i: (0, 0)),
                pl.BlockSpec((1, K), lambda i: (0, 0)),
                pl.BlockSpec((1, K), lambda i: (0, 0)),
                pl.BlockSpec((1, 1), lambda i: (0, 0)),
            ],
            out_specs=pl.BlockSpec((B, 1), lambda i: (0, 0)),
        ),
    )(y4,
      w_vec.reshape(1, K).astype(jnp.float32),
      scale_k.reshape(1, K).astype(jnp.float32),
      shift_k.reshape(1, K).astype(jnp.float32),
      b.reshape(1, 1).astype(jnp.float32))


# ---------------------------------------------------------------------------
# Glue: im2col patch extraction (layout plumbing, stays in XLA)
# ---------------------------------------------------------------------------
def im2col(x_nhwc, k, stride, pad, *, pad_value=None, k_align=128,
           out_dtype=jnp.bfloat16):
    """(kh, kw, cin)-ordered conv patches as a lane-dense bf16 matrix.

    `pad_value` (per channel) lets the fused next-layer BN prologue map the
    spatial padding back to exactly zero.  K is zero-padded to a multiple of
    `k_align` for lane-dense LHS loads.
    """
    N, H, W, C = x_nhwc.shape
    if pad > 0:
        if pad_value is None:
            xp = jnp.pad(x_nhwc, ((0, 0), (pad, pad), (pad, pad), (0, 0)))
        else:
            pv = pad_value.astype(x_nhwc.dtype)
            xp = jnp.broadcast_to(pv, (N, H + 2 * pad, W + 2 * pad, C))
            xp = xp.at[:, pad:pad + H, pad:pad + W, :].set(x_nhwc)
    else:
        xp = x_nhwc
    OH = (H + 2 * pad - k) // stride + 1
    OW = (W + 2 * pad - k) // stride + 1
    cols = []
    for i in range(k):
        for j in range(k):
            cols.append(xp[:, i:i + stride * OH:stride, j:j + stride * OW:stride, :])
    patches = jnp.stack(cols, axis=3).reshape(N * OH * OW, k * k * C)
    patches = patches.astype(out_dtype)
    K = k * k * C
    K_pad = _round_up(K, k_align)
    if K_pad != K:
        patches = jnp.pad(patches, ((0, 0), (0, K_pad - K)))
    return patches, OH, OW, K_pad


# ---------------------------------------------------------------------------
# Discriminator forward
# ---------------------------------------------------------------------------
def discriminator_forward(x_nchw, params):
    x = jnp.transpose(x_nchw, (0, 2, 3, 1)).astype(jnp.bfloat16)   # NCHW -> NHWC
    N = x.shape[0]

    pending = None   # (scale, shift) of the previous BN layer, applied lazily
    for layer in params["convs"]:
        k, stride, pad = layer["k"], layer["stride"], layer["pad"]
        cin, cout = layer["cin"], layer["cout"]
        K = k * k * cin

        if pending is None:
            pad_val = None
            scale_k = shift_k = None
        else:
            scale, shift = pending
            pad_val = -shift / scale            # affine(pad_val) == 0 -> lrelu -> 0
            scale_k = jnp.tile(scale, k * k)
            shift_k = jnp.tile(shift, k * k)

        patches, OH, OW, K_pad = im2col(x, k, stride, pad, pad_value=pad_val)

        w = layer["w"]                           # (K, cout) f32, (kh,kw,cin)-major
        if K_pad != K:
            w = jnp.pad(w, ((0, K_pad - K), (0, 0)))
            if scale_k is not None:
                scale_k = jnp.pad(scale_k, (0, K_pad - K), constant_values=1.0)
                shift_k = jnp.pad(shift_k, (0, K_pad - K))
        w = w.astype(jnp.bfloat16)

        if layer["bn"]:
            y, stats = conv_matmul(patches, w, layer["b"],
                                   scale_k=scale_k, shift_k=shift_k,
                                   collect_stats=True, epilogue_slope=None)
            M = patches.shape[0]
            mean = stats[0] / M
            var = jnp.maximum(stats[1] / M - mean * mean, 0.0)   # biased, clamped
            new_scale = layer["gamma"] * jax.lax.rsqrt(var + BN_EPS)
            new_shift = layer["beta"] - mean * new_scale
            pending = (new_scale, new_shift)
        else:
            y = conv_matmul(patches, w, layer["b"],
                            scale_k=scale_k, shift_k=shift_k,
                            collect_stats=False, epilogue_slope=LRELU_SLOPE)
            pending = None

        x = y.reshape(N, OH, OW, cout)

    # Final Conv2d(8*dim, 1, 4) on the 4x4 map, fused with BN4 affine + LReLU.
    fin = params["final"]
    scale, shift = pending
    kk = fin["k"] * fin["k"]
    K5 = kk * x.shape[-1]
    y4 = x.reshape(N, K5)                        # (h, w, c)-major == weight layout
    out = final_head(y4, fin["w"], jnp.tile(scale, kk), jnp.tile(shift, kk), fin["b"])
    return out.reshape(-1)                       # matches y.view(-1)


def init_params(key, channels=3, dim=8):
    """Synthetic init mirroring weights_init: conv W~N(0,0.02), BN gamma~N(1,0.02),
    beta=0, conv bias ~ U(+-1/sqrt(fan_in)).  Conv weights stored as
    (KH*KW*Cin, Cout) in (kh, kw, cin) row-major order.
    NOTE: real PyTorch weights (Cout, Cin, KH, KW) must be permuted to
    (KH, KW, Cin, Cout) and flattened before loading into this layout."""
    cfg = [
        # (cin, cout, k, stride, pad, bn)
        (channels, dim,     5, 2, 2, False),
        (dim,      dim * 2, 5, 2, 2, True),
        (dim * 2,  dim * 4, 5, 2, 2, True),
        (dim * 4,  dim * 8, 5, 2, 2, True),
    ]
    convs = []
    for (cin, cout, k, stride, pad, bn) in cfg:
        key, kw_, kb_, kg_ = jax.random.split(key, 4)
        fan_in = cin * k * k
        w = 0.02 * jax.random.normal(kw_, (k * k * cin, cout), dtype=jnp.float32)
        bound = 1.0 / (fan_in ** 0.5)
        b = jax.random.uniform(kb_, (cout,), jnp.float32, -bound, bound)
        layer = dict(w=w, b=b, k=k, stride=stride, pad=pad, bn=bn,
                     cin=cin, cout=cout)
        if bn:
            layer["gamma"] = 1.0 + 0.02 * jax.random.normal(kg_, (cout,), jnp.float32)
            layer["beta"] = jnp.zeros((cout,), jnp.float32)
        convs.append(layer)

    # Final Conv2d(8*dim, 1, 4, 1, 0)
    cin, k = dim * 8, 4
    key, kw_, kb_ = jax.random.split(key, 3)
    fan_in = cin * k * k
    w = 0.02 * jax.random.normal(kw_, (k * k * cin,), dtype=jnp.float32)
    bound = 1.0 / (fan_in ** 0.5)
    b = jax.random.uniform(kb_, (1,), jnp.float32, -bound, bound)
    final = dict(w=w, b=b, k=k)

    return dict(convs=convs, final=final)


if __name__ == "__main__":
    # Spatial size must be 64 so the final 4x4 valid conv sees a 4x4 map
    # (64 -> 32 -> 16 -> 8 -> 4 -> 1), exactly like the PyTorch module.
    batch, channels, spatial, dim = 2, 3, 64, 8
    key = jax.random.PRNGKey(0)
    key, kx = jax.random.split(key)
    x = jax.random.normal(kx, (batch, channels, spatial, spatial), dtype=jnp.float32)

    params = init_params(key, channels=channels, dim=dim)
    fwd = jax.jit(lambda inp: discriminator_forward(inp, params))
    y = jax.block_until_ready(fwd(x))
    assert y.shape == (batch,), y.shape
    assert bool(jnp.all(jnp.isfinite(y))), "non-finite output"
    print("KERNEL_OK")
</pallas_src>

<mosaic_0001>
module attributes {stable_mosaic.version = 11 : i64} {
  func.func @_conv_mm_kernel(%arg0: i32, %arg1: memref<512x128xbf16, #tpu.memory_space<vmem>>, %arg2: memref<128x8xbf16, #tpu.memory_space<vmem>>, %arg3: memref<1x8xf32, #tpu.memory_space<vmem>>, %arg4: memref<512x8xbf16, #tpu.memory_space<vmem>>) attributes {dimension_semantics = [#tpu.dimension_semantics<parallel>], iteration_bounds = array<i64: 4>, scalar_prefetch = 0 : i64, scratch_operands = 0 : i64, tpu.core_type = #tpu.core_type<tc>, window_params = [{transform_indices = @transform_0, window_bounds = array<i64: 512, 128>}, {pipeline_mode = #tpu.pipeline_mode<synchronous>, transform_indices = @transform_1, window_bounds = array<i64: 128, 8>}, {pipeline_mode = #tpu.pipeline_mode<synchronous>, transform_indices = @transform_2, window_bounds = array<i64: 1, 8>}, {transform_indices = @transform_3, window_bounds = array<i64: 512, 8>}]} {
    %c0 = arith.constant 0 : index
    %c0_0 = arith.constant 0 : index
    %0 = vector.load %arg1[%c0, %c0_0] : memref<512x128xbf16, #tpu.memory_space<vmem>>, vector<512x128xbf16>
    %1 = arith.extf %0 : vector<512x128xbf16> to vector<512x128xf32>
    %2 = arith.truncf %1 : vector<512x128xf32> to vector<512x128xbf16>
    %c0_1 = arith.constant 0 : index
    %c0_2 = arith.constant 0 : index
    %3 = vector.load %arg2[%c0_1, %c0_2] : memref<128x8xbf16, #tpu.memory_space<vmem>>, vector<128x8xbf16>
    %cst = arith.constant dense<0.000000e+00> : vector<512x8xf32>
    %4 = tpu.matmul %2, %3, %cst {dimension_numbers = #tpu.dot_dimension_numbers<[1], [0], [0], [1], [0, 0, 1, 1], [], []>} : vector<512x128xbf16>, vector<128x8xbf16>, vector<512x8xf32> -> vector<512x8xf32>
    %c0_3 = arith.constant 0 : index
    %c0_4 = arith.constant 0 : index
    %5 = vector.load %arg3[%c0_3, %c0_4] : memref<1x8xf32, #tpu.memory_space<vmem>>, vector<1x8xf32>
    %6 = vector.broadcast %5 : vector<1x8xf32> to vector<512x8xf32>
    %7 = arith.addf %4, %6 : vector<512x8xf32>
    %cst_5 = arith.constant 0.000000e+00 : f32
    %8 = vector.broadcast %cst_5 : f32 to vector<512x8xf32>
    %9 = arith.cmpf oge, %7, %8 : vector<512x8xf32>
    %cst_6 = arith.constant 2.000000e-01 : f32
    %10 = vector.broadcast %cst_6 : f32 to vector<512x8xf32>
    %11 = arith.mulf %10, %7 : vector<512x8xf32>
    %12 = arith.select %9, %7, %11 : vector<512x8xi1>, vector<512x8xf32>
    %13 = arith.truncf %12 : vector<512x8xf32> to vector<512x8xbf16>
    %c0_7 = arith.constant 0 : index
    %c0_8 = arith.constant 0 : index
    %14 = vector.load %arg4[%c0_7, %c0_8] : memref<512x8xbf16, #tpu.memory_space<vmem>>, vector<512x8xbf16>
    tpu.vector_store %arg4[%c0_7, %c0_8], %13 {strides = array<i32>} : memref<512x8xbf16, #tpu.memory_space<vmem>>, vector<512x8xbf16>,
    return
  }
  func.func @transform_0(%arg0: i32) -> (i32, i32) {
    %c0_i32 = arith.constant 0 : i32
    %c0_i32_0 = arith.constant 0 : i32
    return %arg0, %c0_i32 : i32, i32
  }
  func.func @transform_1(%arg0: i32) -> (i32, i32) {
    %c0_i32 = arith.constant 0 : i32
    %c0_i32_0 = arith.constant 0 : i32
    %c0_i32_1 = arith.constant 0 : i32
    return %c0_i32, %c0_i32_0 : i32, i32
  }
  func.func @transform_2(%arg0: i32) -> (i32, i32) {
    %c0_i32 = arith.constant 0 : i32
    %c0_i32_0 = arith.constant 0 : i32
    %c0_i32_1 = arith.constant 0 : i32
    return %c0_i32, %c0_i32_0 : i32, i32
  }
  func.func @transform_3(%arg0: i32) -> (i32, i32) {
    %c0_i32 = arith.constant 0 : i32
    %c0_i32_0 = arith.constant 0 : i32
    return %arg0, %c0_i32 : i32, i32
  }
}

module attributes {stable_mosaic.version = 11 : i64} {
  func.func @_conv_mm_kernel(%arg0: i32, %arg1: memref<512x256xbf16, #tpu.memory_space<vmem>>, %arg2: memref<256x16xbf16, #tpu.memory_space<vmem>>, %arg3: memref<1x16xf32, #tpu.memory_space<vmem>>, %arg4: memref<512x16xbf16, #tpu.memory_space<vmem>>, %arg5: memref<2x16xf32, #tpu.memory_space<vmem>>) attributes {dimension_semantics = [#tpu.dimension_semantics<arbitrary>], iteration_bounds = array<i64: 1>, scalar_prefetch = 0 : i64, scratch_operands = 0 : i64, tpu.core_type = #tpu.core_type<tc>, window_params = [{transform_indices = @transform_0, window_bounds = array<i64: 512, 256>}, {pipeline_mode = #tpu.pipeline_mode<synchronous>, transform_indices = @transform_1, window_bounds = array<i64: 256, 16>}, {pipeline_mode = #tpu.pipeline_mode<synchronous>, transform_indices = @transform_2, window_bounds = array<i64: 1, 16>}, {transform_indices = @transform_3, window_bounds = array<i64: 512, 16>}, {pipeline_mode = #tpu.pipeline_mode<synchronous>, transform_indices = @transform_4, window_bounds = array<i64: 2, 16>}]} {
    %c0 = arith.constant 0 : index
    %c0_0 = arith.constant 0 : index
    %0 = vector.load %arg1[%c0, %c0_0] : memref<512x256xbf16, #tpu.memory_space<vmem>>, vector<512x256xbf16>
    %1 = arith.extf %0 : vector<512x256xbf16> to vector<512x256xf32>
    %2 = arith.truncf %1 : vector<512x256xf32> to vector<512x256xbf16>
    %c0_1 = arith.constant 0 : index
    %c0_2 = arith.constant 0 : index
    %3 = vector.load %arg2[%c0_1, %c0_2] : memref<256x16xbf16, #tpu.memory_space<vmem>>, vector<256x16xbf16>
    %cst = arith.constant dense<0.000000e+00> : vector<512x16xf32>
    %4 = tpu.matmul %2, %3, %cst {dimension_numbers = #tpu.dot_dimension_numbers<[1], [0], [0], [1], [0, 0, 1, 1], [], []>} : vector<512x256xbf16>, vector<256x16xbf16>, vector<512x16xf32> -> vector<512x16xf32>
    %c0_3 = arith.constant 0 : index
    %c0_4 = arith.constant 0 : index
    %5 = vector.load %arg3[%c0_3, %c0_4] : memref<1x16xf32, #tpu.memory_space<vmem>>, vector<1x16xf32>
    %6 = vector.broadcast %5 : vector<1x16xf32> to vector<512x16xf32>
    %7 = arith.addf %4, %6 : vector<512x16xf32>
    %c0_i32 = arith.constant 0 : i32
    %8 = arith.cmpi eq, %arg0, %c0_i32 : i32
    %9 = arith.extui %8 : i1 to i32
    %c0_i32_5 = arith.constant 0 : i32
    %10 = arith.cmpi ne, %9, %c0_i32_5 : i32
    scf.if %10 {
      %cst_17 = arith.constant 0.000000e+00 : f32
      %24 = vector.broadcast %cst_17 : f32 to vector<2x16xf32>
      %c0_18 = arith.constant 0 : index
      %c0_19 = arith.constant 0 : index
      %25 = vector.load %arg5[%c0_18, %c0_19] : memref<2x16xf32, #tpu.memory_space<vmem>>, vector<2x16xf32>
      tpu.vector_store %arg5[%c0_18, %c0_19], %24 {strides = array<i32>} : memref<2x16xf32, #tpu.memory_space<vmem>>, vector<2x16xf32>,
    } else {
    }
    %c0_6 = arith.constant 0 : index
    %c0_7 = arith.constant 0 : index
    %11 = vector.load %arg5[%c0_6, %c0_7] : memref<2x16xf32, #tpu.memory_space<vmem>>, vector<1x16xf32>
    %cst_8 = arith.constant dense<0.000000e+00> : vector<16xf32>
    %12 = vector.multi_reduction <add>, %7, %cst_8 [0] : vector<512x16xf32> to vector<16xf32>
    %13 = vector.shape_cast %12 : vector<16xf32> to vector<1x16xf32>
    %14 = arith.addf %11, %13 : vector<1x16xf32>
    %c0_9 = arith.constant 0 : index
    %c0_10 = arith.constant 0 : index
    %15 = vector.load %arg5[%c0_9, %c0_10] : memref<2x16xf32, #tpu.memory_space<vmem>>, vector<1x16xf32>
    tpu.vector_store %arg5[%c0_9, %c0_10], %14 {strides = array<i32>} : memref<2x16xf32, #tpu.memory_space<vmem>>, vector<1x16xf32>,
    %c1 = arith.constant 1 : index
    %c0_11 = arith.constant 0 : index
    %16 = vector.load %arg5[%c1, %c0_11] : memref<2x16xf32, #tpu.memory_space<vmem>>, vector<1x16xf32>
    %17 = arith.mulf %7, %7 : vector<512x16xf32>
    %cst_12 = arith.constant dense<0.000000e+00> : vector<16xf32>
    %18 = vector.multi_reduction <add>, %17, %cst_12 [0] : vector<512x16xf32> to vector<16xf32>
    %19 = vector.shape_cast %18 : vector<16xf32> to vector<1x16xf32>
    %20 = arith.addf %16, %19 : vector<1x16xf32>
    %c1_13 = arith.constant 1 : index
    %c0_14 = arith.constant 0 : index
    %21 = vector.load %arg5[%c1_13, %c0_14] : memref<2x16xf32, #tpu.memory_space<vmem>>, vector<1x16xf32>
    tpu.vector_store %arg5[%c1_13, %c0_14], %20 {strides = array<i32>} : memref<2x16xf32, #tpu.memory_space<vmem>>, vector<1x16xf32>,
    %22 = arith.truncf %7 : vector<512x16xf32> to vector<512x16xbf16>
    %c0_15 = arith.constant 0 : index
    %c0_16 = arith.constant 0 : index
    %23 = vector.load %arg4[%c0_15, %c0_16] : memref<512x16xbf16, #tpu.memory_space<vmem>>, vector<512x16xbf16>
    tpu.vector_store %arg4[%c0_15, %c0_16], %22 {strides = array<i32>} : memref<512x16xbf16, #tpu.memory_space<vmem>>, vector<512x16xbf16>,
    return
  }
  func.func @transform_0(%arg0: i32) -> (i32, i32) {
    %c0_i32 = arith.constant 0 : i32
    %c0_i32_0 = arith.constant 0 : i32
    return %arg0, %c0_i32 : i32, i32
  }
  func.func @transform_1(%arg0: i32) -> (i32, i32) {
    %c0_i32 = arith.constant 0 : i32
    %c0_i32_0 = arith.constant 0 : i32
    %c0_i32_1 = arith.constant 0 : i32
    return %c0_i32, %c0_i32_0 : i32, i32
  }
  func.func @transform_2(%arg0: i32) -> (i32, i32) {
    %c0_i32 = arith.constant 0 : i32
    %c0_i32_0 = arith.constant 0 : i32
    %c0_i32_1 = arith.constant 0 : i32
    return %c0_i32, %c0_i32_0 : i32, i32
  }
  func.func @transform_3(%arg0: i32) -> (i32, i32) {
    %c0_i32 = arith.constant 0 : i32
    %c0_i32_0 = arith.constant 0 : i32
    return %arg0, %c0_i32 : i32, i32
  }
  func.func @transform_4(%arg0: i32) -> (i32, i32) {
    %c0_i32 = arith.constant 0 : i32
    %c0_i32_0 = arith.constant 0 : i32
    %c0_i32_1 = arith.constant 0 : i32
    return %c0_i32, %c0_i32_0 : i32, i32
  }
}

module attributes {stable_mosaic.version = 11 : i64} {
  func.func @_conv_mm_kernel(%arg0: i32, %arg1: memref<128x512xbf16, #tpu.memory_space<vmem>>, %arg2: memref<512x32xbf16, #tpu.memory_space<vmem>>, %arg3: memref<1x32xf32, #tpu.memory_space<vmem>>, %arg4: memref<1x512xf32, #tpu.memory_space<vmem>>, %arg5: memref<1x512xf32, #tpu.memory_space<vmem>>, %arg6: memref<128x32xbf16, #tpu.memory_space<vmem>>, %arg7: memref<2x32xf32, #tpu.memory_space<vmem>>) attributes {dimension_semantics = [#tpu.dimension_semantics<arbitrary>], iteration_bounds = array<i64: 1>, scalar_prefetch = 0 : i64, scratch_operands = 0 : i64, tpu.core_type = #tpu.core_type<tc>, window_params = [{transform_indices = @transform_0, window_bounds = array<i64: 128, 512>}, {pipeline_mode = #tpu.pipeline_mode<synchronous>, transform_indices = @transform_1, window_bounds = array<i64: 512, 32>}, {pipeline_mode = #tpu.pipeline_mode<synchronous>, transform_indices = @transform_2, window_bounds = array<i64: 1, 32>}, {pipeline_mode = #tpu.pipeline_mode<synchronous>, transform_indices = @transform_3, window_bounds = array<i64: 1, 512>}, {pipeline_mode = #tpu.pipeline_mode<synchronous>, transform_indices = @transform_4, window_bounds = array<i64: 1, 512>}, {transform_indices = @transform_5, window_bounds = array<i64: 128, 32>}, {pipeline_mode = #tpu.pipeline_mode<synchronous>, transform_indices = @transform_6, window_bounds = array<i64: 2, 32>}]} {
    %c0 = arith.constant 0 : index
    %c0_0 = arith.constant 0 : index
    %0 = vector.load %arg1[%c0, %c0_0] : memref<128x512xbf16, #tpu.memory_space<vmem>>, vector<128x512xbf16>
    %1 = arith.extf %0 : vector<128x512xbf16> to vector<128x512xf32>
    %c0_1 = arith.constant 0 : index
    %c0_2 = arith.constant 0 : index
    %2 = vector.load %arg4[%c0_1, %c0_2] : memref<1x512xf32, #tpu.memory_space<vmem>>, vector<1x512xf32>
    %3 = vector.broadcast %2 : vector<1x512xf32> to vector<128x512xf32>
    %4 = arith.mulf %1, %3 : vector<128x512xf32>
    %c0_3 = arith.constant 0 : index
    %c0_4 = arith.constant 0 : index
    %5 = vector.load %arg5[%c0_3, %c0_4] : memref<1x512xf32, #tpu.memory_space<vmem>>, vector<1x512xf32>
    %6 = vector.broadcast %5 : vector<1x512xf32> to vector<128x512xf32>
    %7 = arith.addf %4, %6 : vector<128x512xf32>
    %cst = arith.constant 0.000000e+00 : f32
    %8 = vector.broadcast %cst : f32 to vector<128x512xf32>
    %9 = arith.cmpf oge, %7, %8 : vector<128x512xf32>
    %cst_5 = arith.constant 2.000000e-01 : f32
    %10 = vector.broadcast %cst_5 : f32 to vector<128x512xf32>
    %11 = arith.mulf %10, %7 : vector<128x512xf32>
    %12 = arith.select %9, %7, %11 : vector<128x512xi1>, vector<128x512xf32>
    %13 = arith.truncf %12 : vector<128x512xf32> to vector<128x512xbf16>
    %c0_6 = arith.constant 0 : index
    %c0_7 = arith.constant 0 : index
    %14 = vector.load %arg2[%c0_6, %c0_7] : memref<512x32xbf16, #tpu.memory_space<vmem>>, vector<512x32xbf16>
    %cst_8 = arith.constant dense<0.000000e+00> : vector<128x32xf32>
    %15 = tpu.matmul %13, %14, %cst_8 {dimension_numbers = #tpu.dot_dimension_numbers<[1], [0], [0], [1], [0, 0, 1, 1], [], []>} : vector<128x512xbf16>, vector<512x32xbf16>, vector<128x32xf32> -> vector<128x32xf32>
    %c0_9 = arith.constant 0 : index
    %c0_10 = arith.constant 0 : index
    %16 = vector.load %arg3[%c0_9, %c0_10] : memref<1x32xf32, #tpu.memory_space<vmem>>, vector<1x32xf32>
    %17 = vector.broadcast %16 : vector<1x32xf32> to vector<128x32xf32>
    %18 = arith.addf %15, %17 : vector<128x32xf32>
    %c0_i32 = arith.constant 0 : i32
    %19 = arith.cmpi eq, %arg0, %c0_i32 : i32
    %20 = arith.extui %19 : i1 to i32
    %c0_i32_11 = arith.constant 0 : i32
    %21 = arith.cmpi ne, %20, %c0_i32_11 : i32
    scf.if %21 {
      %cst_23 = arith.constant 0.000000e+00 : f32
      %35 = vector.broadcast %cst_23 : f32 to vector<2x32xf32>
      %c0_24 = arith.constant 0 : index
      %c0_25 = arith.constant 0 : index
      %36 = vector.load %arg7[%c0_24, %c0_25] : memref<2x32xf32, #tpu.memory_space<vmem>>, vector<2x32xf32>
      tpu.vector_store %arg7[%c0_24, %c0_25], %35 {strides = array<i32>} : memref<2x32xf32, #tpu.memory_space<vmem>>, vector<2x32xf32>,
    } else {
    }
    %c0_12 = arith.constant 0 : index
    %c0_13 = arith.constant 0 : index
    %22 = vector.load %arg7[%c0_12, %c0_13] : memref<2x32xf32, #tpu.memory_space<vmem>>, vector<1x32xf32>
    %cst_14 = arith.constant dense<0.000000e+00> : vector<32xf32>
    %23 = vector.multi_reduction <add>, %18, %cst_14 [0] : vector<128x32xf32> to vector<32xf32>
    %24 = vector.shape_cast %23 : vector<32xf32> to vector<1x32xf32>
    %25 = arith.addf %22, %24 : vector<1x32xf32>
    %c0_15 = arith.constant 0 : index
    %c0_16 = arith.constant 0 : index
    %26 = vector.load %arg7[%c0_15, %c0_16] : memref<2x32xf32, #tpu.memory_space<vmem>>, vector<1x32xf32>
    tpu.vector_store %arg7[%c0_15, %c0_16], %25 {strides = array<i32>} : memref<2x32xf32, #tpu.memory_space<vmem>>, vector<1x32xf32>,
    %c1 = arith.constant 1 : index
    %c0_17 = arith.constant 0 : index
    %27 = vector.load %arg7[%c1, %c0_17] : memref<2x32xf32, #tpu.memory_space<vmem>>, vector<1x32xf32>
    %28 = arith.mulf %18, %18 : vector<128x32xf32>
    %cst_18 = arith.constant dense<0.000000e+00> : vector<32xf32>
    %29 = vector.multi_reduction <add>, %28, %cst_18 [0] : vector<128x32xf32> to vector<32xf32>
    %30 = vector.shape_cast %29 : vector<32xf32> to vector<1x32xf32>
    %31 = arith.addf %27, %30 : vector<1x32xf32>
    %c1_19 = arith.constant 1 : index
    %c0_20 = arith.constant 0 : index
    %32 = vector.load %arg7[%c1_19, %c0_20] : memref<2x32xf32, #tpu.memory_space<vmem>>, vector<1x32xf32>
    tpu.vector_store %arg7[%c1_19, %c0_20], %31 {strides = array<i32>} : memref<2x32xf32, #tpu.memory_space<vmem>>, vector<1x32xf32>,
    %33 = arith.truncf %18 : vector<128x32xf32> to vector<128x32xbf16>
    %c0_21 = arith.constant 0 : index
    %c0_22 = arith.constant 0 : index
    %34 = vector.load %arg6[%c0_21, %c0_22] : memref<128x32xbf16, #tpu.memory_space<vmem>>, vector<128x32xbf16>
    tpu.vector_store %arg6[%c0_21, %c0_22], %33 {strides = array<i32>} : memref<128x32xbf16, #tpu.memory_space<vmem>>, vector<128x32xbf16>,
    return
  }
  func.func @transform_0(%arg0: i32) -> (i32, i32) {
    %c0_i32 = arith.constant 0 : i32
    %c0_i32_0 = arith.constant 0 : i32
    return %arg0, %c0_i32 : i32, i32
  }
  func.func @transform_1(%arg0: i32) -> (i32, i32) {
    %c0_i32 = arith.constant 0 : i32
    %c0_i32_0 = arith.constant 0 : i32
    %c0_i32_1 = arith.constant 0 : i32
    return %c0_i32, %c0_i32_0 : i32, i32
  }
  func.func @transform_2(%arg0: i32) -> (i32, i32) {
    %c0_i32 = arith.constant 0 : i32
    %c0_i32_0 = arith.constant 0 : i32
    %c0_i32_1 = arith.constant 0 : i32
    return %c0_i32, %c0_i32_0 : i32, i32
  }
  func.func @transform_3(%arg0: i32) -> (i32, i32) {
    %c0_i32 = arith.constant 0 : i32
    %c0_i32_0 = arith.constant 0 : i32
    %c0_i32_1 = arith.constant 0 : i32
    return %c0_i32, %c0_i32_0 : i32, i32
  }
  func.func @transform_4(%arg0: i32) -> (i32, i32) {
    %c0_i32 = arith.constant 0 : i32
    %c0_i32_0 = arith.constant 0 : i32
    %c0_i32_1 = arith.constant 0 : i32
    return %c0_i32, %c0_i32_0 : i32, i32
  }
  func.func @transform_5(%arg0: i32) -> (i32, i32) {
    %c0_i32 = arith.constant 0 : i32
    %c0_i32_0 = arith.constant 0 : i32
    return %arg0, %c0_i32 : i32, i32
  }
  func.func @transform_6(%arg0: i32) -> (i32, i32) {
    %c0_i32 = arith.constant 0 : i32
    %c0_i32_0 = arith.constant 0 : i32
    %c0_i32_1 = arith.constant 0 : i32
    return %c0_i32, %c0_i32_0 : i32, i32
  }
}

module attributes {stable_mosaic.version = 11 : i64} {
  func.func @_conv_mm_kernel(%arg0: i32, %arg1: memref<32x896xbf16, #tpu.memory_space<vmem>>, %arg2: memref<896x64xbf16, #tpu.memory_space<vmem>>, %arg3: memref<1x64xf32, #tpu.memory_space<vmem>>, %arg4: memref<1x896xf32, #tpu.memory_space<vmem>>, %arg5: memref<1x896xf32, #tpu.memory_space<vmem>>, %arg6: memref<32x64xbf16, #tpu.memory_space<vmem>>, %arg7: memref<2x64xf32, #tpu.memory_space<vmem>>) attributes {dimension_semantics = [#tpu.dimension_semantics<arbitrary>], iteration_bounds = array<i64: 1>, scalar_prefetch = 0 : i64, scratch_operands = 0 : i64, tpu.core_type = #tpu.core_type<tc>, window_params = [{transform_indices = @transform_0, window_bounds = array<i64: 32, 896>}, {pipeline_mode = #tpu.pipeline_mode<synchronous>, transform_indices = @transform_1, window_bounds = array<i64: 896, 64>}, {pipeline_mode = #tpu.pipeline_mode<synchronous>, transform_indices = @transform_2, window_bounds = array<i64: 1, 64>}, {pipeline_mode = #tpu.pipeline_mode<synchronous>, transform_indices = @transform_3, window_bounds = array<i64: 1, 896>}, {pipeline_mode = #tpu.pipeline_mode<synchronous>, transform_indices = @transform_4, window_bounds = array<i64: 1, 896>}, {transform_indices = @transform_5, window_bounds = array<i64: 32, 64>}, {pipeline_mode = #tpu.pipeline_mode<synchronous>, transform_indices = @transform_6, window_bounds = array<i64: 2, 64>}]} {
    %c0 = arith.constant 0 : index
    %c0_0 = arith.constant 0 : index
    %0 = vector.load %arg1[%c0, %c0_0] : memref<32x896xbf16, #tpu.memory_space<vmem>>, vector<32x896xbf16>
    %1 = arith.extf %0 : vector<32x896xbf16> to vector<32x896xf32>
    %c0_1 = arith.constant 0 : index
    %c0_2 = arith.constant 0 : index
    %2 = vector.load %arg4[%c0_1, %c0_2] : memref<1x896xf32, #tpu.memory_space<vmem>>, vector<1x896xf32>
    %3 = vector.broadcast %2 : vector<1x896xf32> to vector<32x896xf32>
    %4 = arith.mulf %1, %3 : vector<32x896xf32>
    %c0_3 = arith.constant 0 : index
    %c0_4 = arith.constant 0 : index
    %5 = vector.load %arg5[%c0_3, %c0_4] : memref<1x896xf32, #tpu.memory_space<vmem>>, vector<1x896xf32>
    %6 = vector.broadcast %5 : vector<1x896xf32> to vector<32x896xf32>
    %7 = arith.addf %4, %6 : vector<32x896xf32>
    %cst = arith.constant 0.000000e+00 : f32
    %8 = vector.broadcast %cst : f32 to vector<32x896xf32>
    %9 = arith.cmpf oge, %7, %8 : vector<32x896xf32>
    %cst_5 = arith.constant 2.000000e-01 : f32
    %10 = vector.broadcast %cst_5 : f32 to vector<32x896xf32>
    %11 = arith.mulf %10, %7 : vector<32x896xf32>
    %12 = arith.select %9, %7, %11 : vector<32x896xi1>, vector<32x896xf32>
    %13 = arith.truncf %12 : vector<32x896xf32> to vector<32x896xbf16>
    %c0_6 = arith.constant 0 : index
    %c0_7 = arith.constant 0 : index
    %14 = vector.load %arg2[%c0_6, %c0_7] : memref<896x64xbf16, #tpu.memory_space<vmem>>, vector<896x64xbf16>
    %cst_8 = arith.constant dense<0.000000e+00> : vector<32x64xf32>
    %15 = tpu.matmul %13, %14, %cst_8 {dimension_numbers = #tpu.dot_dimension_numbers<[1], [0], [0], [1], [0, 0, 1, 1], [], []>} : vector<32x896xbf16>, vector<896x64xbf16>, vector<32x64xf32> -> vector<32x64xf32>
    %c0_9 = arith.constant 0 : index
    %c0_10 = arith.constant 0 : index
    %16 = vector.load %arg3[%c0_9, %c0_10] : memref<1x64xf32, #tpu.memory_space<vmem>>, vector<1x64xf32>
    %17 = vector.broadcast %16 : vector<1x64xf32> to vector<32x64xf32>
    %18 = arith.addf %15, %17 : vector<32x64xf32>
    %c0_i32 = arith.constant 0 : i32
    %19 = arith.cmpi eq, %arg0, %c0_i32 : i32
    %20 = arith.extui %19 : i1 to i32
    %c0_i32_11 = arith.constant 0 : i32
    %21 = arith.cmpi ne, %20, %c0_i32_11 : i32
    scf.if %21 {
      %cst_23 = arith.constant 0.000000e+00 : f32
      %35 = vector.broadcast %cst_23 : f32 to vector<2x64xf32>
      %c0_24 = arith.constant 0 : index
      %c0_25 = arith.constant 0 : index
      %36 = vector.load %arg7[%c0_24, %c0_25] : memref<2x64xf32, #tpu.memory_space<vmem>>, vector<2x64xf32>
      tpu.vector_store %arg7[%c0_24, %c0_25], %35 {strides = array<i32>} : memref<2x64xf32, #tpu.memory_space<vmem>>, vector<2x64xf32>,
    } else {
    }
    %c0_12 = arith.constant 0 : index
    %c0_13 = arith.constant 0 : index
    %22 = vector.load %arg7[%c0_12, %c0_13] : memref<2x64xf32, #tpu.memory_space<vmem>>, vector<1x64xf32>
    %cst_14 = arith.constant dense<0.000000e+00> : vector<64xf32>
    %23 = vector.multi_reduction <add>, %18, %cst_14 [0] : vector<32x64xf32> to vector<64xf32>
    %24 = vector.shape_cast %23 : vector<64xf32> to vector<1x64xf32>
    %25 = arith.addf %22, %24 : vector<1x64xf32>
    %c0_15 = arith.constant 0 : index
    %c0_16 = arith.constant 0 : index
    %26 = vector.load %arg7[%c0_15, %c0_16] : memref<2x64xf32, #tpu.memory_space<vmem>>, vector<1x64xf32>
    tpu.vector_store %arg7[%c0_15, %c0_16], %25 {strides = array<i32>} : memref<2x64xf32, #tpu.memory_space<vmem>>, vector<1x64xf32>,
    %c1 = arith.constant 1 : index
    %c0_17 = arith.constant 0 : index
    %27 = vector.load %arg7[%c1, %c0_17] : memref<2x64xf32, #tpu.memory_space<vmem>>, vector<1x64xf32>
    %28 = arith.mulf %18, %18 : vector<32x64xf32>
    %cst_18 = arith.constant dense<0.000000e+00> : vector<64xf32>
    %29 = vector.multi_reduction <add>, %28, %cst_18 [0] : vector<32x64xf32> to vector<64xf32>
    %30 = vector.shape_cast %29 : vector<64xf32> to vector<1x64xf32>
    %31 = arith.addf %27, %30 : vector<1x64xf32>
    %c1_19 = arith.constant 1 : index
    %c0_20 = arith.constant 0 : index
    %32 = vector.load %arg7[%c1_19, %c0_20] : memref<2x64xf32, #tpu.memory_space<vmem>>, vector<1x64xf32>
    tpu.vector_store %arg7[%c1_19, %c0_20], %31 {strides = array<i32>} : memref<2x64xf32, #tpu.memory_space<vmem>>, vector<1x64xf32>,
    %33 = arith.truncf %18 : vector<32x64xf32> to vector<32x64xbf16>
    %c0_21 = arith.constant 0 : index
    %c0_22 = arith.constant 0 : index
    %34 = vector.load %arg6[%c0_21, %c0_22] : memref<32x64xbf16, #tpu.memory_space<vmem>>, vector<32x64xbf16>
    tpu.vector_store %arg6[%c0_21, %c0_22], %33 {strides = array<i32>} : memref<32x64xbf16, #tpu.memory_space<vmem>>, vector<32x64xbf16>,
    return
  }
  func.func @transform_0(%arg0: i32) -> (i32, i32) {
    %c0_i32 = arith.constant 0 : i32
    %c0_i32_0 = arith.constant 0 : i32
    return %arg0, %c0_i32 : i32, i32
  }
  func.func @transform_1(%arg0: i32) -> (i32, i32) {
    %c0_i32 = arith.constant 0 : i32
    %c0_i32_0 = arith.constant 0 : i32
    %c0_i32_1 = arith.constant 0 : i32
    return %c0_i32, %c0_i32_0 : i32, i32
  }
  func.func @transform_2(%arg0: i32) -> (i32, i32) {
    %c0_i32 = arith.constant 0 : i32
    %c0_i32_0 = arith.constant 0 : i32
    %c0_i32_1 = arith.constant 0 : i32
    return %c0_i32, %c0_i32_0 : i32, i32
  }
  func.func @transform_3(%arg0: i32) -> (i32, i32) {
    %c0_i32 = arith.constant 0 : i32
    %c0_i32_0 = arith.constant 0 : i32
    %c0_i32_1 = arith.constant 0 : i32
    return %c0_i32, %c0_i32_0 : i32, i32
  }
  func.func @transform_4(%arg0: i32) -> (i32, i32) {
    %c0_i32 = arith.constant 0 : i32
    %c0_i32_0 = arith.constant 0 : i32
    %c0_i32_1 = arith.constant 0 : i32
    return %c0_i32, %c0_i32_0 : i32, i32
  }
  func.func @transform_5(%arg0: i32) -> (i32, i32) {
    %c0_i32 = arith.constant 0 : i32
    %c0_i32_0 = arith.constant 0 : i32
    return %arg0, %c0_i32 : i32, i32
  }
  func.func @transform_6(%arg0: i32) -> (i32, i32) {
    %c0_i32 = arith.constant 0 : i32
    %c0_i32_0 = arith.constant 0 : i32
    %c0_i32_1 = arith.constant 0 : i32
    return %c0_i32, %c0_i32_0 : i32, i32
  }
}

module attributes {stable_mosaic.version = 11 : i64} {
  func.func @_final_head_kernel(%arg0: i32, %arg1: memref<2x1024xbf16, #tpu.memory_space<vmem>>, %arg2: memref<1x1024xf32, #tpu.memory_space<vmem>>, %arg3: memref<1x1024xf32, #tpu.memory_space<vmem>>, %arg4: memref<1x1024xf32, #tpu.memory_space<vmem>>, %arg5: memref<1x1xf32, #tpu.memory_space<vmem>>, %arg6: memref<2x1xf32, #tpu.memory_space<vmem>>) attributes {dimension_semantics = [#tpu.dimension_semantics<arbitrary>], iteration_bounds = array<i64: 1>, scalar_prefetch = 0 : i64, scratch_operands = 0 : i64, tpu.core_type = #tpu.core_type<tc>, window_params = [{pipeline_mode = #tpu.pipeline_mode<synchronous>, transform_indices = @transform_0, window_bounds = array<i64: 2, 1024>}, {pipeline_mode = #tpu.pipeline_mode<synchronous>, transform_indices = @transform_1, window_bounds = array<i64: 1, 1024>}, {pipeline_mode = #tpu.pipeline_mode<synchronous>, transform_indices = @transform_2, window_bounds = array<i64: 1, 1024>}, {pipeline_mode = #tpu.pipeline_mode<synchronous>, transform_indices = @transform_3, window_bounds = array<i64: 1, 1024>}, {pipeline_mode = #tpu.pipeline_mode<synchronous>, transform_indices = @transform_4, window_bounds = array<i64: 1, 1>}, {pipeline_mode = #tpu.pipeline_mode<synchronous>, transform_indices = @transform_5, window_bounds = array<i64: 2, 1>}]} {
    %c0 = arith.constant 0 : index
    %c0_0 = arith.constant 0 : index
    %0 = vector.load %arg1[%c0, %c0_0] : memref<2x1024xbf16, #tpu.memory_space<vmem>>, vector<2x1024xbf16>
    %1 = arith.extf %0 : vector<2x1024xbf16> to vector<2x1024xf32>
    %c0_1 = arith.constant 0 : index
    %c0_2 = arith.constant 0 : index
    %2 = vector.load %arg3[%c0_1, %c0_2] : memref<1x1024xf32, #tpu.memory_space<vmem>>, vector<1x1024xf32>
    %3 = vector.broadcast %2 : vector<1x1024xf32> to vector<2x1024xf32>
    %4 = arith.mulf %1, %3 : vector<2x1024xf32>
    %c0_3 = arith.constant 0 : index
    %c0_4 = arith.constant 0 : index
    %5 = vector.load %arg4[%c0_3, %c0_4] : memref<1x1024xf32, #tpu.memory_space<vmem>>, vector<1x1024xf32>
    %6 = vector.broadcast %5 : vector<1x1024xf32> to vector<2x1024xf32>
    %7 = arith.addf %4, %6 : vector<2x1024xf32>
    %cst = arith.constant 0.000000e+00 : f32
    %8 = vector.broadcast %cst : f32 to vector<2x1024xf32>
    %9 = arith.cmpf oge, %7, %8 : vector<2x1024xf32>
    %cst_5 = arith.constant 2.000000e-01 : f32
    %10 = vector.broadcast %cst_5 : f32 to vector<2x1024xf32>
    %11 = arith.mulf %10, %7 : vector<2x1024xf32>
    %12 = arith.select %9, %7, %11 : vector<2x1024xi1>, vector<2x1024xf32>
    %c0_6 = arith.constant 0 : index
    %c0_7 = arith.constant 0 : index
    %13 = vector.load %arg2[%c0_6, %c0_7] : memref<1x1024xf32, #tpu.memory_space<vmem>>, vector<1x1024xf32>
    %14 = vector.broadcast %13 : vector<1x1024xf32> to vector<2x1024xf32>
    %15 = arith.mulf %12, %14 : vector<2x1024xf32>
    %cst_8 = arith.constant dense<0.000000e+00> : vector<2xf32>
    %16 = vector.multi_reduction <add>, %15, %cst_8 [1] : vector<2x1024xf32> to vector<2xf32>
    %17 = vector.shape_cast %16 : vector<2xf32> to vector<2x1xf32>
    %c0_9 = arith.constant 0 : index
    %c0_10 = arith.constant 0 : index
    %18 = vector.load %arg5[%c0_9, %c0_10] : memref<1x1xf32, #tpu.memory_space<vmem>>, vector<1x1xf32>
    %19 = vector.broadcast %18 : vector<1x1xf32> to vector<2x1xf32>
    %20 = arith.addf %17, %19 : vector<2x1xf32>
    %c0_11 = arith.constant 0 : index
    %c0_12 = arith.constant 0 : index
    %21 = vector.load %arg6[%c0_11, %c0_12] : memref<2x1xf32, #tpu.memory_space<vmem>>, vector<2x1xf32>
    tpu.vector_store %arg6[%c0_11, %c0_12], %20 {strides = array<i32>} : memref<2x1xf32, #tpu.memory_space<vmem>>, vector<2x1xf32>,
    return
  }
  func.func @transform_0(%arg0: i32) -> (i32, i32) {
    %c0_i32 = arith.constant 0 : i32
    %c0_i32_0 = arith.constant 0 : i32
    %c0_i32_1 = arith.constant 0 : i32
    return %c0_i32, %c0_i32_0 : i32, i32
  }
  func.func @transform_1(%arg0: i32) -> (i32, i32) {
    %c0_i32 = arith.constant 0 : i32
    %c0_i32_0 = arith.constant 0 : i32
    %c0_i32_1 = arith.constant 0 : i32
    return %c0_i32, %c0_i32_0 : i32, i32
  }
  func.func @transform_2(%arg0: i32) -> (i32, i32) {
    %c0_i32 = arith.constant 0 : i32
    %c0_i32_0 = arith.constant 0 : i32
    %c0_i32_1 = arith.constant 0 : i32
    return %c0_i32, %c0_i32_0 : i32, i32
  }
  func.func @transform_3(%arg0: i32) -> (i32, i32) {
    %c0_i32 = arith.constant 0 : i32
    %c0_i32_0 = arith.constant 0 : i32
    %c0_i32_1 = arith.constant 0 : i32
    return %c0_i32, %c0_i32_0 : i32, i32
  }
  func.func @transform_4(%arg0: i32) -> (i32, i32) {
    %c0_i32 = arith.constant 0 : i32
    %c0_i32_0 = arith.constant 0 : i32
    %c0_i32_1 = arith.constant 0 : i32
    return %c0_i32, %c0_i32_0 : i32, i32
  }
  func.func @transform_5(%arg0: i32) -> (i32, i32) {
    %c0_i32 = arith.constant 0 : i32
    %c0_i32_0 = arith.constant 0 : i32
    %c0_i32_1 = arith.constant 0 : i32
    return %c0_i32, %c0_i32_0 : i32, i32
  }
}

</mosaic_0001>

<bundles_post_ra>
// kernel: _lambda_.5
= control target key start
LH: loop header
LB: loop body
LE: loop exit
PB: predicated region body
PF: predicated region fallthrough
CT: control target
= control target key end

     0   :  { %s1752_s12 = smov 0   ;;  %s2112_s0 = inlined_call_operand.vmem [shape: bf16[2048,128], index: 0, kind: input, shape index: {}]   ;;  %s2113_s1 = inlined_call_operand.vmem [shape: bf16[128,8], index: 1, kind: input, shape index: {}]   ;;  %s2114_s2 = inlined_call_operand.vmem [shape: f32[1,8], index: 2, kind: input, shape index: {}]   ;;  %s2115_s3 = inlined_call_operand.vmem [shape: bf16[2048,8], index: 3, kind: output, shape index: {}]  }
   0x1 LB: > { %s1360_s13 = sadd.s32 4294967295, %s1730_s12   ;;  %p1364_p0 = scmp.ge.s32.totalorder %s1730_s12, 1  ;;  %s1730_s12 = sphi %s1752_s12, %s13_s12  }
   0x2   : > { %p138_p1 = scmp.lt.s32.totalorder %s1730_s12, 5 }
   0x4   : > { %p139_p2 = pnand %p1364_p0, %p138_p1 }
   0x5   : > { %v1684_v0 = vld [vmem:[%s2113_s1] sm:$0xff] (!%p139_p2)   ;;  %s1365_s16 = sshll.u32 (!%p139_p2), %s1360_s13, 6  ;;  %v1685_v1 = vld [vmem:[%s2113_s1 + $0x8] sm:$0xff] (!%p139_p2)   ;;  %v1686_v2 = vld [vmem:[%s2113_s1 + $0x10] sm:$0xff] (!%p139_p2)   ;;  %vm1239_vm0 = vcmask (!%p139_p2), 60416  }
   0x6   : > { %142 = sbr.rel (%p139_p2) target bundleno = 335 (0x14f), region = 32  ;;  %p163_p3 = scmp.lt.s32.totalorder (!%p139_p2), %s1365_s16, 255  ;;  %1580 = vmatprep.subr.bf16.mxu0 (!%p139_p2), %v1684_v0  ;;  %1660 = vmatprep.subr.bf16.mxu1 (!%p139_p2), %v1684_v0  ;;  %v1687_v3 = vld [vmem:[%s2113_s1 + $0x18] sm:$0xff] (!%p139_p2)   ;;  %v1688_v6 = vld [vmem:[%s2113_s1 + $0x20] sm:$0xff] (!%p139_p2)   ;;  %v1689_v7 = vld [vmem:[%s2113_s1 + $0x28] sm:$0xff] (!%p139_p2)  }
   0x7   : > { %1581 = vmatpush3.bf16.msra.mxu0 (!%p139_p2), %v1684_v0  ;;  %1668 = vmatpush3.bf16.msra.mxu1 (!%p139_p2), %v1684_v0  ;;  %v1690_v8 = vld [vmem:[%s2113_s1 + $0x30] sm:$0xff] (!%p139_p2)   ;;  %v1691_v9 = vld [vmem:[%s2113_s1 + $0x38] sm:$0xff] (!%p139_p2)   ;;  %v1829_v40 = vld [vmem:[%s2114_s2] ss:$0 sm:$0xff] (!%p139_p2) }
   0x8   : > { %1582 = vmatprep.subr.bf16.mxu0 (!%p139_p2), %v1685_v1  ;;  %1661 = vmatprep.subr.bf16.mxu1 (!%p139_p2), %v1685_v1 }
   0xb   : > { %1583 = vmatpush3.bf16.msra.mxu0 (!%p139_p2), %v1685_v1  ;;  %1669 = vmatpush3.bf16.msra.mxu1 (!%p139_p2), %v1685_v1 }
   0xc   : > { %1584 = vmatprep.subr.bf16.mxu0 (!%p139_p2), %v1686_v2  ;;  %1662 = vmatprep.subr.bf16.mxu1 (!%p139_p2), %v1686_v2 }
   0xd   : > { %s2117_s16 = smov (!%p163_p3, %s1365_s16), 255 }
   0xe   : > { %s1366_s21 = sshll.u32 %s2117_s16, 2 }
   0xf   : > { %s1777_s24 = scalar_lea.vmem %s2112_s0, %s1366_s21  ;;  %1585 = vmatpush3.bf16.msra.mxu0 %v1686_v2  ;;  %1670 = vmatpush3.bf16.msra.mxu1 %v1686_v2  ;;  %s1840_s13 = scalar_lea.vmem %s2115_s3, %s1366_s21 }
  0x10   : > { %v1692_v4 = vld [vmem:[%s1777_s24] sm:$0xff]   ;;  %1586 = vmatprep.subr.bf16.mxu0 %v1687_v3  ;;  %1663 = vmatprep.subr.bf16.mxu1 %v1687_v3  ;;  %v1694_v10 = vld [vmem:[%s1777_s24 + $0x8] sm:$0xff]   ;;  %v1696_v12 = vld [vmem:[%s1777_s24 + $0x10] sm:$0xff]  }
  0x11   : > { %v1693_v5 = vld [vmem:[%s1777_s24 + $0x80] sm:$0xff]   ;;  %1596 = vmatprep.mubr.bf16.mxu0 %v1692_v4  ;;  %v1695_v11 = vld [vmem:[%s1777_s24 + $0x88] sm:$0xff]   ;;  %v1697_v13 = vld [vmem:[%s1777_s24 + $0x90] sm:$0xff]  }
  0x12   : > { %1628 = vmatprep.mubr.bf16.mxu1 %v1693_v5  ;;  %v1698_v14 = vld [vmem:[%s1777_s24 + $0x18] sm:$0xff]   ;;  %v1700_v16 = vld [vmem:[%s1777_s24 + $0x20] sm:$0xff]   ;;  %v1702_v18 = vld [vmem:[%s1777_s24 + $0x28] sm:$0xff]  }
  0x13   : > { %1587 = vmatpush3.bf16.msra.mxu0 %v1687_v3  ;;  %1671 = vmatpush3.bf16.msra.mxu1 %v1687_v3  ;;  %v1699_v15 = vld [vmem:[%s1777_s24 + $0x98] sm:$0xff]   ;;  %v1701_v17 = vld [vmem:[%s1777_s24 + $0xa0] sm:$0xff]   ;;  %v1703_v19 = vld [vmem:[%s1777_s24 + $0xa8] sm:$0xff]  }
  0x14   : > { %1588 = vmatprep.subr.bf16.mxu0 %v1688_v6  ;;  %1664 = vmatprep.subr.bf16.mxu1 %v1688_v6  ;;  %v1704_v20 = vld [vmem:[%s1777_s24 + $0x30] sm:$0xff]   ;;  %v1706_v22 = vld [vmem:[%s1777_s24 + $0x38] sm:$0xff]   ;;  %v1708_v24 = vld [vmem:[%s1777_s24 + $0x40] sm:$0xff]  }
  0x15   : > { %v1705_v21 = vld [vmem:[%s1777_s24 + $0xb0] sm:$0xff]   ;;  %v1707_v23 = vld [vmem:[%s1777_s24 + $0xb8] sm:$0xff]   ;;  %v1709_v25 = vld [vmem:[%s1777_s24 + $0xc0] sm:$0xff]  }
  0x16   : > { %v1710_v26 = vld [vmem:[%s1777_s24 + $0x48] sm:$0xff]   ;;  %v1712_v28 = vld [vmem:[%s1777_s24 + $0x50] sm:$0xff]   ;;  %v1714_v30 = vld [vmem:[%s1777_s24 + $0x58] sm:$0xff]  }
  0x17   : > { %1589 = vmatpush3.bf16.msra.mxu0 %v1688_v6  ;;  %1672 = vmatpush3.bf16.msra.mxu1 %v1688_v6  ;;  %v1711_v27 = vld [vmem:[%s1777_s24 + $0xc8] sm:$0xff]   ;;  %v1713_v29 = vld [vmem:[%s1777_s24 + $0xd0] sm:$0xff]   ;;  %v1715_v31 = vld [vmem:[%s1777_s24 + $0xd8] sm:$0xff]  }
  0x18   : > { %1590 = vmatprep.subr.bf16.mxu0 %v1689_v7  ;;  %1665 = vmatprep.subr.bf16.mxu1 %v1689_v7  ;;  %v1716_v32 = vld [vmem:[%s1777_s24 + $0x60] sm:$0xff]   ;;  %v1718_v34 = vld [vmem:[%s1777_s24 + $0x68] sm:$0xff]   ;;  %v1720_v36 = vld [vmem:[%s1777_s24 + $0x70] sm:$0xff]  }
  0x19   : > { %v1717_v33 = vld [vmem:[%s1777_s24 + $0xe0] sm:$0xff]   ;;  %v1719_v35 = vld [vmem:[%s1777_s24 + $0xe8] sm:$0xff]   ;;  %v1721_v37 = vld [vmem:[%s1777_s24 + $0xf0] sm:$0xff]  }
  0x1a   : > { %v1722_v38 = vld [vmem:[%s1777_s24 + $0x78] sm:$0xff]  }
  0x1b   : > { %1591 = vmatpush3.bf16.msra.mxu0 %v1689_v7  ;;  %1673 = vmatpush3.bf16.msra.mxu1 %v1689_v7  ;;  %v1723_v39 = vld [vmem:[%s1777_s24 + $0xf8] sm:$0xff]  }
  0x1c   : > { %1592 = vmatprep.subr.bf16.mxu0 %v1690_v8  ;;  %1666 = vmatprep.subr.bf16.mxu1 %v1690_v8 }
  0x1f   : > { %1593 = vmatpush3.bf16.msra.mxu0 %v1690_v8  ;;  %1674 = vmatpush3.bf16.msra.mxu1 %v1690_v8 }
  0x20   : > { %1594 = vmatprep.subr.bf16.mxu0 %v1691_v9  ;;  %1667 = vmatprep.subr.bf16.mxu1 %v1691_v9 }
  0x23   : > { %1595 = vmatpush3.bf16.msra.mxu0 %v1691_v9  ;;  %1675 = vmatpush3.bf16.msra.mxu1 %v1691_v9 }
  0x26   : > { %1597 = vmatmul.mubr.bf16.vlgmr.msra.gmra.mrb[0].mxu0 %v1694_v10  ;;  %1629 = vmatmul.mubr.bf16.vlgmr.msra.gmra.mrb[0].mxu1 %v1695_v11 }
  0x27   : > { %1600 = vmatprep.mubr.bf16.mxu0 %v1696_v12  ;;  %1632 = vmatprep.mubr.bf16.mxu1 %v1697_v13 }
  0x2e   : > { %1601 = vmatmul.mubr.bf16.gmra.mrb[4].mxu0 %v1698_v14  ;;  %1633 = vmatmul.mubr.bf16.gmra.mrb[4].mxu1 %v1699_v15 }
  0x2f   : > { %1604 = vmatprep.mubr.bf16.mxu0 %v1700_v16  ;;  %1636 = vmatprep.mubr.bf16.mxu1 %v1701_v17 }
  0x36   : > { %1605 = vmatmul.mubr.bf16.gmra.mrb[8].mxu0 %v1702_v18  ;;  %1637 = vmatmul.mubr.bf16.gmra.mrb[8].mxu1 %v1703_v19 }
  0x37   : > { %1608 = vmatprep.mubr.bf16.mxu0 %v1704_v20  ;;  %1640 = vmatprep.mubr.bf16.mxu1 %v1705_v21 }
  0x3e   : > { %1609 = vmatmul.mubr.bf16.gmra.mrb[12].mxu0 %v1706_v22  ;;  %1641 = vmatmul.mubr.bf16.gmra.mrb[12].mxu1 %v1707_v23 }
  0x3f   : > { %1612 = vmatprep.mubr.bf16.mxu0 %v1708_v24  ;;  %1644 = vmatprep.mubr.bf16.mxu1 %v1709_v25 }
  0x46   : > { %1613 = vmatmul.mubr.bf16.gmra.mrb[16].mxu0 %v1710_v26  ;;  %1645 = vmatmul.mubr.bf16.gmra.mrb[16].mxu1 %v1711_v27 }
  0x47   : > { %1616 = vmatprep.mubr.bf16.mxu0 %v1712_v28  ;;  %1648 = vmatprep.mubr.bf16.mxu1 %v1713_v29 }
  0x4e   : > { %1617 = vmatmul.mubr.bf16.gmra.mrb[20].mxu0 %v1714_v30  ;;  %1649 = vmatmul.mubr.bf16.gmra.mrb[20].mxu1 %v1715_v31 }
  0x4f   : > { %1620 = vmatprep.mubr.bf16.mxu0 %v1716_v32  ;;  %1652 = vmatprep.mubr.bf16.mxu1 %v1717_v33 }
  0x56   : > { %1621 = vmatmul.mubr.bf16.gmra.mrb[24].mxu0 %v1718_v34  ;;  %1653 = vmatmul.mubr.bf16.gmra.mrb[24].mxu1 %v1719_v35 }
  0x57   : > { %1624 = vmatprep.mubr.bf16.mxu0 %v1720_v36  ;;  %1656 = vmatprep.mubr.bf16.mxu1 %v1721_v37 }
  0x5e   : > { %1625 = vmatmul.mubr.bf16.gmra.mrb[28].mxu0 %v1722_v38  ;;  %1657 = vmatmul.mubr.bf16.gmra.mrb[28].mxu1 %v1723_v39 }
  0xf9   : > { %v1598_v41 = vpop.f32.mrb[0].mxu0  ;;  %v1630_v42 = vpop.f32.mrb[0].mxu1 }
  0xfa   : > { %v545_v43 = vadd.f32 %v1598_v41, %v1829_v40  ;;  %v673_v44 = vadd.f32 %v1630_v42, %v1829_v40  ;;  %v536_v45 = vpop.f32.mrb[1].mxu0  ;;  %v664_v46 = vpop.f32.mrb[1].mxu1 }
  0xfb   : > { %v537_v47 = vadd.f32 %v1829_v40, %v536_v45  ;;  %v665_v48 = vadd.f32 %v1829_v40, %v664_v46  ;;  %v1599_v49 = vpop.f32.mrb[2].mxu0  ;;  %v1631_v50 = vpop.f32.mrb[2].mxu1 }
  0xfc   : > { %vm793_vm1 = vcmp.ge.f32.partialorder %v545_v43, 0.0  ;;  %v857_v51 = vmul.f32 0.2, %v545_v43  ;;  %vm825_vm2 = vcmp.ge.f32.partialorder %v673_v44, 0.0  ;;  %v889_v52 = vmul.f32 0.2, %v673_v44 }
  0xfd   : > { %vm791_vm3 = vcmp.ge.f32.partialorder %v537_v47, 0.0  ;;  %v855_v53 = vmul.f32 0.2, %v537_v47  ;;  %vm823_vm4 = vcmp.ge.f32.partialorder %v665_v48, 0.0  ;;  %v887_v54 = vmul.f32 0.2, %v665_v48 }
  0xfe   : > { %v921_v55 = vsel %vm793_vm1, %v545_v43, %v857_v51  ;;  %v953_v56 = vsel %vm825_vm2, %v673_v44, %v889_v52  ;;  %v548_v57 = vadd.f32 %v1599_v49, %v1829_v40  ;;  %v676_v58 = vadd.f32 %v1631_v50, %v1829_v40  ;;  %v539_v59 = vpop.f32.mrb[3].mxu0  ;;  %v667_v60 = vpop.f32.mrb[3].mxu1 }
  0xff   : > { %v1478_v61 = vpack.c.bf16 %v921_v55, %v921_v55  ;;  %v1510_v62 = vpack.c.bf16 %v953_v56, %v953_v56  ;;  %v919_v63 = vsel %vm791_vm3, %v537_v47, %v855_v53  ;;  %v951_v0 = vsel %vm823_vm4, %v665_v48, %v887_v54 }
 0x100   : > { %v1476_v1 = vpack.c.bf16 %v919_v63, %v919_v63  ;;  %v1508_v2 = vpack.c.bf16 %v951_v0, %v951_v0  ;;  %vm794_vm5 = vcmp.ge.f32.partialorder %v548_v57, 0.0  ;;  %v858_v3 = vmul.f32 0.2, %v548_v57 }
 0x101   : > { %1242 = vst.msk [vmem:[%s1840_s13 + $0x8] sm:$0xf] %vm1239_vm0, %v1478_v61  ;;  %1274 = vst.msk [vmem:[%s1840_s13 + $0x88] sm:$0xf] %vm1239_vm0, %v1510_v62  ;;  %vm826_vm6 = vcmp.ge.f32.partialorder %v676_v58, 0.0  ;;  %v540_v5 = vadd.f32 %v1829_v40, %v539_v59  ;;  %v668_v6 = vadd.f32 %v1829_v40, %v667_v60  ;;  %v1602_v7 = vpop.f32.mrb[4].mxu0 }
 0x102   : > { %v890_v4 = vmul.f32 0.2, %v676_v58  ;;  %v1634_v8 = vpop.f32.mrb[4].mxu1  ;;  %1240 = vst.msk [vmem:[%s1840_s13] sm:$0xf] %vm1239_vm0, %v1476_v1  ;;  %v922_v9 = vsel %vm794_vm5, %v548_v57, %v858_v3  ;;  %v561_v10 = vadd.f32 %v1602_v7, %v1829_v40  ;;  %v552_v12 = vpop.f32.mrb[5].mxu0 }
 0x103   : > { %1272 = vst.msk [vmem:[%s1840_s13 + $0x80] sm:$0xf] %vm1239_vm0, %v1508_v2  ;;  %v689_v11 = vadd.f32 %v1634_v8, %v1829_v40  ;;  %v680_v13 = vpop.f32.mrb[5].mxu1  ;;  %v1479_v14 = vpack.c.bf16 %v922_v9, %v922_v9  ;;  %vm792_vm7 = vcmp.ge.f32.partialorder %v540_v5, 0.0  ;;  %v856_v16 = vmul.f32 0.2, %v540_v5 }
 0x104   : > { %v954_v15 = vsel %vm826_vm6, %v676_v58, %v890_v4  ;;  %v1603_v17 = vpop.f32.mrb[6].mxu0  ;;  %v1635_v18 = vpop.f32.mrb[6].mxu1  ;;  %vm824_vm8 = vcmp.ge.f32.partialorder %v668_v6, 0.0  ;;  %v888_v20 = vmul.f32 0.2, %v668_v6  ;;  %vm797_vm9 = vcmp.ge.f32.partialorder %v561_v10, 0.0 }
 0x105   : > { %v1511_v19 = vpack.c.bf16 %v954_v15, %v954_v15  ;;  %v555_v21 = vpop.f32.mrb[7].mxu0  ;;  %v683_v22 = vpop.f32.mrb[7].mxu1  ;;  %1243 = vst.msk [vmem:[%s1840_s13 + $0xc] sm:$0xf] %vm1239_vm0, %v1479_v14  ;;  %v920_v23 = vsel %vm792_vm7, %v540_v5, %v856_v16  ;;  %v861_v24 = vmul.f32 0.2, %v561_v10  ;;  %v553_v28 = vadd.f32 %v1829_v40, %v552_v12 }
 0x106   : > { %vm829_vm10 = vcmp.ge.f32.partialorder %v689_v11, 0.0  ;;  %v893_v25 = vmul.f32 0.2, %v689_v11  ;;  %v1477_v26 = vpack.c.bf16 %v920_v23, %v920_v23  ;;  %v952_v27 = vsel %vm824_vm8, %v668_v6, %v888_v20 }
 0x107   : > { %1275 = vst.msk [vmem:[%s1840_s13 + $0x8c] sm:$0xf] %vm1239_vm0, %v1511_v19  ;;  %v681_v29 = vadd.f32 %v1829_v40, %v680_v13  ;;  %v1509_v30 = vpack.c.bf16 %v952_v27, %v952_v27  ;;  %v925_v31 = vsel %vm797_vm9, %v561_v10, %v861_v24  ;;  %v564_v33 = vadd.f32 %v1603_v17, %v1829_v40 }
 0x108   : > { %v957_v32 = vsel %vm829_vm10, %v689_v11, %v893_v25  ;;  %1241 = vst.msk [vmem:[%s1840_s13 + $0x4] sm:$0xf] %vm1239_vm0, %v1477_v26  ;;  %v1482_v34 = vpack.c.bf16 %v925_v31, %v925_v31  ;;  %vm795_vm11 = vcmp.ge.f32.partialorder %v553_v28, 0.0  ;;  %v859_v36 = vmul.f32 0.2, %v553_v28 }
 0x109   : > { %v1514_v35 = vpack.c.bf16 %v957_v32, %v957_v32  ;;  %1273 = vst.msk [vmem:[%s1840_s13 + $0x84] sm:$0xf] %vm1239_vm0, %v1509_v30  ;;  %vm827_vm12 = vcmp.ge.f32.partialorder %v681_v29, 0.0  ;;  %v891_v37 = vmul.f32 0.2, %v681_v29  ;;  %vm798_vm13 = vcmp.ge.f32.partialorder %v564_v33, 0.0 }
 0x10a   : > { %v862_v38 = vmul.f32 0.2, %v564_v33  ;;  %1246 = vst.msk [vmem:[%s1840_s13 + $0x18] sm:$0xf] %vm1239_vm0, %v1482_v34  ;;  %v923_v39 = vsel %vm795_vm11, %v553_v28, %v859_v36  ;;  %v692_v41 = vadd.f32 %v1635_v18, %v1829_v40  ;;  %v556_v42 = vadd.f32 %v1829_v40, %v555_v21  ;;  %v1606_v44 = vpop.f32.mrb[8].mxu0  ;;  %v1638_v45 = vpop.f32.mrb[8].mxu1 }
 0x10b   : > { %1278 = vst.msk [vmem:[%s1840_s13 + $0x98] sm:$0xf] %vm1239_vm0, %v1514_v35  ;;  %v684_v43 = vadd.f32 %v1829_v40, %v683_v22  ;;  %v1480_v46 = vpack.c.bf16 %v923_v39, %v923_v39  ;;  %v955_v47 = vsel %vm827_vm12, %v681_v29, %v891_v37  ;;  %v577_v49 = vadd.f32 %v1606_v44, %v1829_v40  ;;  %v568_v50 = vpop.f32.mrb[9].mxu0  ;;  %v696_v51 = vpop.f32.mrb[9].mxu1 }
 0x10c   : > { %v926_v48 = vsel %vm798_vm13, %v564_v33, %v862_v38  ;;  %v1512_v52 = vpack.c.bf16 %v955_v47, %v955_v47  ;;  %vm830_vm14 = vcmp.ge.f32.partialorder %v692_v41, 0.0  ;;  %v894_v54 = vmul.f32 0.2, %v692_v41  ;;  %v1607_v55 = vpop.f32.mrb[10].mxu0  ;;  %v1639_v56 = vpop.f32.mrb[10].mxu1 }
 0x10d   : > { %v1483_v53 = vpack.c.bf16 %v926_v48, %v926_v48  ;;  %1244 = vst.msk [vmem:[%s1840_s13 + $0x10] sm:$0xf] %vm1239_vm0, %v1480_v46  ;;  %vm796_vm15 = vcmp.ge.f32.partialorder %v556_v42, 0.0  ;;  %v860_v57 = vmul.f32 0.2, %v556_v42  ;;  %vm828_vm1 = vcmp.ge.f32.partialorder %v684_v43, 0.0 }
 0x10e   : > { %v892_v58 = vmul.f32 0.2, %v684_v43  ;;  %1276 = vst.msk [vmem:[%s1840_s13 + $0x90] sm:$0xf] %vm1239_vm0, %v1512_v52  ;;  %v958_v59 = vsel %vm830_vm14, %v692_v41, %v894_v54  ;;  %vm801_vm2 = vcmp.ge.f32.partialorder %v577_v49, 0.0  ;;  %v705_v61 = vadd.f32 %v1638_v45, %v1829_v40  ;;  %v571_v62 = vpop.f32.mrb[11].mxu0 }
 0x10f   : > { %1247 = vst.msk [vmem:[%s1840_s13 + $0x1c] sm:$0xf] %vm1239_vm0, %v1483_v53  ;;  %v865_v60 = vmul.f32 0.2, %v577_v49  ;;  %v699_v63 = vpop.f32.mrb[11].mxu1  ;;  %v1515_v0 = vpack.c.bf16 %v958_v59, %v958_v59  ;;  %v924_v1 = vsel %vm796_vm15, %v556_v42, %v860_v57  ;;  %v569_v3 = vadd.f32 %v1829_v40, %v568_v50 }
 0x110   : > { %v956_v2 = vsel %vm828_vm1, %v684_v43, %v892_v58  ;;  %v1481_v4 = vpack.c.bf16 %v924_v1, %v924_v1  ;;  %vm833_vm3 = vcmp.ge.f32.partialorder %v705_v61, 0.0  ;;  %v897_v8 = vmul.f32 0.2, %v705_v61 }
 0x111   : > { %v1513_v5 = vpack.c.bf16 %v956_v2, %v956_v2  ;;  %v929_v6 = vsel %vm801_vm2, %v577_v49, %v865_v60  ;;  %1279 = vst.msk [vmem:[%s1840_s13 + $0x9c] sm:$0xf] %vm1239_vm0, %v1515_v0  ;;  %vm799_vm4 = vcmp.ge.f32.partialorder %v569_v3, 0.0  ;;  %v863_v9 = vmul.f32 0.2, %v569_v3  ;;  %v1610_v10 = vpop.f32.mrb[12].mxu0 }
 0x112   : > { %v1486_v7 = vpack.c.bf16 %v929_v6, %v929_v6  ;;  %1245 = vst.msk [vmem:[%s1840_s13 + $0x14] sm:$0xf] %vm1239_vm0, %v1481_v4  ;;  %v697_v11 = vadd.f32 %v1829_v40, %v696_v51  ;;  %v580_v12 = vadd.f32 %v1607_v55, %v1829_v40  ;;  %v708_v13 = vadd.f32 %v1639_v56, %v1829_v40  ;;  %v1642_v15 = vpop.f32.mrb[12].mxu1  ;;  %v584_v16 = vpop.f32.mrb[13].mxu0 }
 0x113   : > { %1277 = vst.msk [vmem:[%s1840_s13 + $0x94] sm:$0xf] %vm1239_vm0, %v1513_v5  ;;  %v572_v14 = vadd.f32 %v1829_v40, %v571_v62  ;;  %v961_v17 = vsel %vm833_vm3, %v705_v61, %v897_v8  ;;  %v927_v18 = vsel %vm799_vm4, %v569_v3, %v863_v9  ;;  %v700_v19 = vadd.f32 %v1829_v40, %v699_v63  ;;  %v712_v21 = vpop.f32.mrb[13].mxu1  ;;  %v1611_v22 = vpop.f32.mrb[14].mxu0 }
 0x114   : > { %1250 = vst.msk [vmem:[%s1840_s13 + $0x28] sm:$0xf] %vm1239_vm0, %v1486_v7  ;;  %v593_v20 = vadd.f32 %v1610_v10, %v1829_v40  ;;  %v1518_v23 = vpack.c.bf16 %v961_v17, %v961_v17  ;;  %v1484_v24 = vpack.c.bf16 %v927_v18, %v927_v18  ;;  %vm831_vm5 = vcmp.ge.f32.partialorder %v697_v11, 0.0  ;;  %v1643_v26 = vpop.f32.mrb[14].mxu1  ;;  %v587_v27 = vpop.f32.mrb[15].mxu0 }
 0x115   : > { %v895_v25 = vmul.f32 0.2, %v697_v11  ;;  %vm802_vm6 = vcmp.ge.f32.partialorder %v580_v12, 0.0  ;;  %v866_v28 = vmul.f32 0.2, %v580_v12  ;;  %vm834_vm7 = vcmp.ge.f32.partialorder %v708_v13, 0.0 }
 0x116   : > { %v898_v29 = vmul.f32 0.2, %v708_v13  ;;  %1282 = vst.msk [vmem:[%s1840_s13 + $0xa8] sm:$0xf] %vm1239_vm0, %v1518_v23  ;;  %1248 = vst.msk [vmem:[%s1840_s13 + $0x20] sm:$0xf] %vm1239_vm0, %v1484_v24  ;;  %v721_v44 = vadd.f32 %v1642_v15, %v1829_v40  ;;  %v585_v48 = vadd.f32 %v1829_v40, %v584_v16  ;;  %v713_v49 = vadd.f32 %v1829_v40, %v712_v21 }
 0x117   : > { %v959_v30 = vsel %vm831_vm5, %v697_v11, %v895_v25  ;;  %vm800_vm8 = vcmp.ge.f32.partialorder %v572_v14, 0.0  ;;  %v864_v31 = vmul.f32 0.2, %v572_v14  ;;  %vm832_vm9 = vcmp.ge.f32.partialorder %v700_v19, 0.0  ;;  %v715_v32 = vpop.f32.mrb[15].mxu1 }
 0x118   : > { %v1516_v33 = vpack.c.bf16 %v959_v30, %v959_v30  ;;  %v930_v34 = vsel %vm802_vm6, %v580_v12, %v866_v28  ;;  %v962_v35 = vsel %vm834_vm7, %v708_v13, %v898_v29  ;;  %v896_v36 = vmul.f32 0.2, %v700_v19 }
 0x119   : > { %v1487_v37 = vpack.c.bf16 %v930_v34, %v930_v34  ;;  %v1519_v38 = vpack.c.bf16 %v962_v35, %v962_v35  ;;  %v928_v39 = vsel %vm800_vm8, %v572_v14, %v864_v31  ;;  %vm805_vm10 = vcmp.ge.f32.partialorder %v593_v20, 0.0  ;;  %v1614_v45 = vpop.f32.mrb[16].mxu0  ;;  %v1646_v46 = vpop.f32.mrb[16].mxu1 }
 0x11a   : > { %1280 = vst.msk [vmem:[%s1840_s13 + $0xa0] sm:$0xf] %vm1239_vm0, %v1516_v33  ;;  %v1485_v41 = vpack.c.bf16 %v928_v39, %v928_v39  ;;  %v960_v42 = vsel %vm832_vm9, %v700_v19, %v896_v36  ;;  %v869_v43 = vmul.f32 0.2, %v593_v20  ;;  %v596_v50 = vadd.f32 %v1611_v22, %v1829_v40  ;;  %v600_v51 = vpop.f32.mrb[17].mxu0  ;;  %v728_v52 = vpop.f32.mrb[17].mxu1 }
 0x11b   : > { %1251 = vst.msk [vmem:[%s1840_s13 + $0x2c] sm:$0xf] %vm1239_vm0, %v1487_v37  ;;  %1283 = vst.msk [vmem:[%s1840_s13 + $0xac] sm:$0xf] %vm1239_vm0, %v1519_v38  ;;  %v1517_v47 = vpack.c.bf16 %v960_v42, %v960_v42  ;;  %vm837_vm11 = vcmp.ge.f32.partialorder %v721_v44, 0.0  ;;  %v724_v55 = vadd.f32 %v1643_v26, %v1829_v40  ;;  %v1916_v56 = vpop.f32.mrb[18].mxu0  ;;  %v588_v7 = vadd.f32 %v1829_v40, %v587_v27 }
 0x11c   : > { %1249 = vst.msk [vmem:[%s1840_s13 + $0x24] sm:$0xf] %vm1239_vm0, %v1485_v41  ;;  %v933_v53 = vsel %vm805_vm10, %v593_v20, %v869_v43  ;;  %v901_v54 = vmul.f32 0.2, %v721_v44  ;;  %v1918_v57 = vpop.f32.mrb[18].mxu1  ;;  %vm803_vm12 = vcmp.ge.f32.partialorder %v585_v48, 0.0  ;;  %v716_v11 = vadd.f32 %v1829_v40, %v715_v32 }
 0x11d   : > { %1281 = vst.msk [vmem:[%s1840_s13 + $0xa4] sm:$0xf] %vm1239_vm0, %v1517_v47  ;;  %v1490_v58 = vpack.c.bf16 %v933_v53, %v933_v53  ;;  %v867_v59 = vmul.f32 0.2, %v585_v48  ;;  %vm835_vm13 = vcmp.ge.f32.partialorder %v713_v49, 0.0  ;;  %v1922_v60 = vpop.f32.mrb[19].mxu0  ;;  %v609_v14 = vadd.f32 %v1614_v45, %v1829_v40 }
 0x11e   : > { %v1924_v61 = vpop.f32.mrb[19].mxu1  ;;  %v965_v62 = vsel %vm837_vm11, %v721_v44, %v901_v54  ;;  %v899_v63 = vmul.f32 0.2, %v713_v49  ;;  %vm806_vm14 = vcmp.ge.f32.partialorder %v596_v50, 0.0  ;;  %v870_v0 = vmul.f32 0.2, %v596_v50 }
 0x11f   : > { %1254 = vst.msk [vmem:[%s1840_s13 + $0x38] sm:$0xf] %vm1239_vm0, %v1490_v58  ;;  %v1522_v1 = vpack.c.bf16 %v965_v62, %v965_v62  ;;  %v931_v2 = vsel %vm803_vm12, %v585_v48, %v867_v59  ;;  %vm838_vm15 = vcmp.ge.f32.partialorder %v724_v55, 0.0  ;;  %v902_v3 = vmul.f32 0.2, %v724_v55 }
 0x120   : > { %v1488_v4 = vpack.c.bf16 %v931_v2, %v931_v2  ;;  %v963_v5 = vsel %vm835_vm13, %v713_v49, %v899_v63  ;;  %v934_v6 = vsel %vm806_vm14, %v596_v50, %v870_v0  ;;  %vm804_vm1 = vcmp.ge.f32.partialorder %v588_v7, 0.0 }
 0x121   : > { %1286 = vst.msk [vmem:[%s1840_s13 + $0xb8] sm:$0xf] %vm1239_vm0, %v1522_v1  ;;  %v1520_v8 = vpack.c.bf16 %v963_v5, %v963_v5  ;;  %v1491_v9 = vpack.c.bf16 %v934_v6, %v934_v6  ;;  %v966_v10 = vsel %vm838_vm15, %v724_v55, %v902_v3  ;;  %v868_v13 = vmul.f32 0.2, %v588_v7  ;;  %v1618_v15 = vpop.f32.mrb[20].mxu0  ;;  %v1650_v16 = vpop.f32.mrb[20].mxu1 }
 0x122   : > { %1252 = vst.msk [vmem:[%s1840_s13 + $0x30] sm:$0xf] %vm1239_vm0, %v1488_v4  ;;  %v1523_v12 = vpack.c.bf16 %v966_v10, %v966_v10  ;;  %vm836_vm2 = vcmp.ge.f32.partialorder %v716_v11, 0.0  ;;  %v900_v17 = vmul.f32 0.2, %v716_v11  ;;  %v737_v18 = vadd.f32 %v1646_v46, %v1829_v40  ;;  %v616_v20 = vpop.f32.mrb[21].mxu0 }
 0x123   : > { %1284 = vst.msk [vmem:[%s1840_s13 + $0xb0] sm:$0xf] %vm1239_vm0, %v1520_v8  ;;  %1255 = vst.msk [vmem:[%s1840_s13 + $0x3c] sm:$0xf] %vm1239_vm0, %v1491_v9  ;;  %v601_v19 = vadd.f32 %v1829_v40, %v600_v51  ;;  %v1941_v21 = vpop.f32.mrb[21].mxu1  ;;  %v932_v22 = vsel %vm804_vm1, %v588_v7, %v868_v13  ;;  %vm809_vm3 = vcmp.ge.f32.partialorder %v609_v14, 0.0  ;;  %v729_v24 = vadd.f32 %v1829_v40, %v728_v52 }
 0x124   : > { %1287 = vst.msk [vmem:[%s1840_s13 + $0xbc] sm:$0xf] %vm1239_vm0, %v1523_v12  ;;  %v873_v23 = vmul.f32 0.2, %v609_v14  ;;  %v1946_v25 = vpop.f32.mrb[22].mxu0  ;;  %v1948_v26 = vpop.f32.mrb[22].mxu1  ;;  %v1489_v27 = vpack.c.bf16 %v932_v22, %v932_v22  ;;  %v964_v28 = vsel %vm836_vm2, %v716_v11, %v900_v17  ;;  %v612_v41 = vadd.f32 %v1916_v56, %v1829_v40 }
 0x125   : > { %vm841_vm4 = vcmp.ge.f32.partialorder %v737_v18, 0.0  ;;  %v905_v29 = vmul.f32 0.2, %v737_v18  ;;  %v1950_v30 = vpop.f32.mrb[23].mxu0  ;;  %v1952_v31 = vpop.f32.mrb[23].mxu1  ;;  %v1521_v32 = vpack.c.bf16 %v964_v28, %v964_v28  ;;  %vm807_vm5 = vcmp.ge.f32.partialorder %v601_v19, 0.0 }
 0x126   : > { %v937_v33 = vsel %vm809_vm3, %v609_v14, %v873_v23  ;;  %v871_v34 = vmul.f32 0.2, %v601_v19  ;;  %1253 = vst.msk [vmem:[%s1840_s13 + $0x34] sm:$0xf] %vm1239_vm0, %v1489_v27  ;;  %vm839_vm6 = vcmp.ge.f32.partialorder %v729_v24, 0.0  ;;  %v740_v42 = vadd.f32 %v1918_v57, %v1829_v40 }
 0x127   : > { %v1494_v35 = vpack.c.bf16 %v937_v33, %v937_v33  ;;  %v969_v36 = vsel %vm841_vm4, %v737_v18, %v905_v29  ;;  %v903_v37 = vmul.f32 0.2, %v729_v24  ;;  %1285 = vst.msk [vmem:[%s1840_s13 + $0xb4] sm:$0xf] %vm1239_vm0, %v1521_v32  ;;  %v604_v45 = vadd.f32 %v1829_v40, %v1922_v60 }
 0x128   : > { %v1526_v38 = vpack.c.bf16 %v969_v36, %v969_v36  ;;  %v935_v39 = vsel %vm807_vm5, %v601_v19, %v871_v34  ;;  %v732_v46 = vadd.f32 %v1829_v40, %v1924_v61  ;;  %vm810_vm7 = vcmp.ge.f32.partialorder %v612_v41, 0.0 }
 0x129   : > { %1258 = vst.msk [vmem:[%s1840_s13 + $0x48] sm:$0xf] %vm1239_vm0, %v1494_v35  ;;  %v1492_v43 = vpack.c.bf16 %v935_v39, %v935_v39  ;;  %v967_v44 = vsel %vm839_vm6, %v729_v24, %v903_v37  ;;  %v874_v48 = vmul.f32 0.2, %v612_v41  ;;  %vm842_vm8 = vcmp.ge.f32.partialorder %v740_v42, 0.0  ;;  %v1970_v49 = vpop.f32.mrb[24].mxu0 }
 0x12a   : > { %1290 = vst.msk [vmem:[%s1840_s13 + $0xc8] sm:$0xf] %vm1239_vm0, %v1526_v38  ;;  %v1524_v47 = vpack.c.bf16 %v967_v44, %v967_v44  ;;  %v1972_v50 = vpop.f32.mrb[24].mxu1  ;;  %v906_v51 = vmul.f32 0.2, %v740_v42  ;;  %vm808_vm9 = vcmp.ge.f32.partialorder %v604_v45, 0.0  ;;  %v625_v55 = vadd.f32 %v1618_v15, %v1829_v40 }
 0x12b   : > { %1256 = vst.msk [vmem:[%s1840_s13 + $0x40] sm:$0xf] %vm1239_vm0, %v1492_v43  ;;  %v872_v52 = vmul.f32 0.2, %v604_v45  ;;  %vm840_vm10 = vcmp.ge.f32.partialorder %v732_v46, 0.0  ;;  %v938_v53 = vsel %vm810_vm7, %v612_v41, %v874_v48  ;;  %v753_v56 = vadd.f32 %v1650_v16, %v1829_v40  ;;  %v1980_v57 = vpop.f32.mrb[25].mxu0 }
 0x12c   : > { %1288 = vst.msk [vmem:[%s1840_s13 + $0xc0] sm:$0xf] %vm1239_vm0, %v1524_v47  ;;  %v904_v54 = vmul.f32 0.2, %v732_v46  ;;  %v1982_v58 = vpop.f32.mrb[25].mxu1  ;;  %v1495_v59 = vpack.c.bf16 %v938_v53, %v938_v53  ;;  %v970_v60 = vsel %vm842_vm8, %v740_v42, %v906_v51  ;;  %v617_v62 = vadd.f32 %v1829_v40, %v616_v20  ;;  %v1986_v63 = vpop.f32.mrb[26].mxu0 }
 0x12d   : > { %v936_v61 = vsel %vm808_vm9, %v604_v45, %v872_v52  ;;  %v1988_v0 = vpop.f32.mrb[26].mxu1  ;;  %v1527_v1 = vpack.c.bf16 %v970_v60, %v970_v60  ;;  %vm813_vm11 = vcmp.ge.f32.partialorder %v625_v55, 0.0  ;;  %v1991_v4 = vpop.f32.mrb[27].mxu0  ;;  %v877_v7 = vmul.f32 0.2, %v625_v55 }
 0x12e   : > { %v1493_v2 = vpack.c.bf16 %v936_v61, %v936_v61  ;;  %v968_v3 = vsel %vm840_vm10, %v732_v46, %v904_v54  ;;  %v1993_v5 = vpop.f32.mrb[27].mxu1  ;;  %1259 = vst.msk [vmem:[%s1840_s13 + $0x4c] sm:$0xf] %vm1239_vm0, %v1495_v59  ;;  %vm845_vm12 = vcmp.ge.f32.partialorder %v753_v56, 0.0  ;;  %v909_v8 = vmul.f32 0.2, %v753_v56 }
 0x12f   : > { %v1525_v6 = vpack.c.bf16 %v968_v3, %v968_v3  ;;  %1291 = vst.msk [vmem:[%s1840_s13 + $0xcc] sm:$0xf] %vm1239_vm0, %v1527_v1  ;;  %vm811_vm13 = vcmp.ge.f32.partialorder %v617_v62, 0.0  ;;  %v875_v9 = vmul.f32 0.2, %v617_v62  ;;  %v745_v10 = vadd.f32 %v1829_v40, %v1941_v21 }
 0x130   : > { %1257 = vst.msk [vmem:[%s1840_s13 + $0x44] sm:$0xf] %vm1239_vm0, %v1493_v2  ;;  %v628_v11 = vadd.f32 %v1946_v25, %v1829_v40  ;;  %v941_v12 = vsel %vm813_vm11, %v625_v55, %v877_v7  ;;  %v973_v13 = vsel %vm845_vm12, %v753_v56, %v909_v8  ;;  %v756_v14 = vadd.f32 %v1948_v26, %v1829_v40 }
 0x131   : > { %1289 = vst.msk [vmem:[%s1840_s13 + $0xc4] sm:$0xf] %vm1239_vm0, %v1525_v6  ;;  %v620_v15 = vadd.f32 %v1829_v40, %v1950_v30  ;;  %v1498_v16 = vpack.c.bf16 %v941_v12, %v941_v12  ;;  %v1530_v17 = vpack.c.bf16 %v973_v13, %v973_v13  ;;  %v939_v18 = vsel %vm811_vm13, %v617_v62, %v875_v9  ;;  %v2011_v19 = vpop.f32.mrb[28].mxu0  ;;  %v2013_v20 = vpop.f32.mrb[28].mxu1 }
 0x132   : > { %vm843_vm14 = vcmp.ge.f32.partialorder %v745_v10, 0.0  ;;  %v1496_v21 = vpack.c.bf16 %v939_v18, %v939_v18  ;;  %v907_v22 = vmul.f32 0.2, %v745_v10  ;;  %vm814_vm15 = vcmp.ge.f32.partialorder %v628_v11, 0.0  ;;  %v2015_v24 = vpop.f32.mrb[29].mxu0  ;;  %v2027_v32 = vpop.f32.mrb[29].mxu1 }
 0x133   : > { %v878_v23 = vmul.f32 0.2, %v628_v11  ;;  %1262 = vst.msk [vmem:[%s1840_s13 + $0x58] sm:$0xf] %vm1239_vm0, %v1498_v16  ;;  %1294 = vst.msk [vmem:[%s1840_s13 + $0xd8] sm:$0xf] %vm1239_vm0, %v1530_v17  ;;  %v748_v29 = vadd.f32 %v1829_v40, %v1952_v31  ;;  %v641_v30 = vadd.f32 %v1970_v49, %v1829_v40  ;;  %v769_v45 = vadd.f32 %v1972_v50, %v1829_v40 }
 0x134   : > { %vm846_vm1 = vcmp.ge.f32.partialorder %v756_v14, 0.0  ;;  %v910_v25 = vmul.f32 0.2, %v756_v14  ;;  %vm812_vm2 = vcmp.ge.f32.partialorder %v620_v15, 0.0  ;;  %v876_v26 = vmul.f32 0.2, %v620_v15 }
 0x135   : > { %1260 = vst.msk [vmem:[%s1840_s13 + $0x50] sm:$0xf] %vm1239_vm0, %v1496_v21  ;;  %v971_v27 = vsel %vm843_vm14, %v745_v10, %v907_v22  ;;  %v942_v28 = vsel %vm814_vm15, %v628_v11, %v878_v23  ;;  %v2029_v33 = vpop.f32.mrb[30].mxu0  ;;  %v2031_v38 = vpop.f32.mrb[30].mxu1  ;;  %vm844_vm3 = vcmp.ge.f32.partialorder %v748_v29, 0.0  ;;  %vm817_vm4 = vcmp.ge.f32.partialorder %v641_v30, 0.0 }
 0x136   : > { %v1528_v34 = vpack.c.bf16 %v971_v27, %v971_v27  ;;  %v1499_v35 = vpack.c.bf16 %v942_v28, %v942_v28  ;;  %v974_v36 = vsel %vm846_vm1, %v756_v14, %v910_v25  ;;  %v940_v37 = vsel %vm812_vm2, %v620_v15, %v876_v26  ;;  %v2033_v39 = vpop.f32.mrb[31].mxu0  ;;  %v2035_v43 = vpop.f32.mrb[31].mxu1 }
 0x137   : > { %v1531_v41 = vpack.c.bf16 %v974_v36, %v974_v36  ;;  %v1497_v31 = vpack.c.bf16 %v940_v37, %v940_v37  ;;  %v908_v42 = vmul.f32 0.2, %v748_v29  ;;  %v881_v44 = vmul.f32 0.2, %v641_v30 }
 0x138   : > { %1292 = vst.msk [vmem:[%s1840_s13 + $0xd0] sm:$0xf] %vm1239_vm0, %v1528_v34  ;;  %1263 = vst.msk [vmem:[%s1840_s13 + $0x5c] sm:$0xf] %vm1239_vm0, %v1499_v35  ;;  %v633_v46 = vadd.f32 %v1829_v40, %v1980_v57  ;;  %v761_v48 = vadd.f32 %v1829_v40, %v1982_v58  ;;  %v644_v49 = vadd.f32 %v1986_v63, %v1829_v40  ;;  %vm849_vm5 = vcmp.ge.f32.partialorder %v769_v45, 0.0 }
 0x139   : > { %1295 = vst.msk [vmem:[%s1840_s13 + $0xdc] sm:$0xf] %vm1239_vm0, %v1531_v41  ;;  %1261 = vst.msk [vmem:[%s1840_s13 + $0x54] sm:$0xf] %vm1239_vm0, %v1497_v31  ;;  %v972_v47 = vsel %vm844_vm3, %v748_v29, %v908_v42  ;;  %v772_v51 = vadd.f32 %v1988_v0, %v1829_v40  ;;  %v945_v52 = vsel %vm817_vm4, %v641_v30, %v881_v44  ;;  %v913_v53 = vmul.f32 0.2, %v769_v45 }
 0x13a   : > { %v1529_v50 = vpack.c.bf16 %v972_v47, %v972_v47  ;;  %v1502_v54 = vpack.c.bf16 %v945_v52, %v945_v52  ;;  %vm815_vm6 = vcmp.ge.f32.partialorder %v633_v46, 0.0  ;;  %v879_v55 = vmul.f32 0.2, %v633_v46 }
 0x13b   : > { %vm847_vm7 = vcmp.ge.f32.partialorder %v761_v48, 0.0  ;;  %v977_v56 = vsel %vm849_vm5, %v769_v45, %v913_v53  ;;  %v911_v57 = vmul.f32 0.2, %v761_v48  ;;  %vm818_vm8 = vcmp.ge.f32.partialorder %v644_v49, 0.0 }
 0x13c   : > { %1293 = vst.msk [vmem:[%s1840_s13 + $0xd4] sm:$0xf] %vm1239_vm0, %v1529_v50  ;;  %v882_v58 = vmul.f32 0.2, %v644_v49  ;;  %1266 = vst.msk [vmem:[%s1840_s13 + $0x68] sm:$0xf] %vm1239_vm0, %v1502_v54  ;;  %v1534_v59 = vpack.c.bf16 %v977_v56, %v977_v56  ;;  %v943_v60 = vsel %vm815_vm6, %v633_v46, %v879_v55  ;;  %v636_v1 = vadd.f32 %v1829_v40, %v1991_v4 }
 0x13d   : > { %vm850_vm9 = vcmp.ge.f32.partialorder %v772_v51, 0.0  ;;  %v914_v61 = vmul.f32 0.2, %v772_v51  ;;  %v1500_v62 = vpack.c.bf16 %v943_v60, %v943_v60  ;;  %v975_v63 = vsel %vm847_vm7, %v761_v48, %v911_v57 }
 0x13e   : > { %v946_v0 = vsel %vm818_vm8, %v644_v49, %v882_v58  ;;  %1298 = vst.msk [vmem:[%s1840_s13 + $0xe8] sm:$0xf] %vm1239_vm0, %v1534_v59  ;;  %v1532_v2 = vpack.c.bf16 %v975_v63, %v975_v63  ;;  %v764_v7 = vadd.f32 %v1829_v40, %v1993_v5  ;;  %vm816_vm10 = vcmp.ge.f32.partialorder %v636_v1, 0.0 }
 0x13f   : > { %v1503_v3 = vpack.c.bf16 %v946_v0, %v946_v0  ;;  %v978_v6 = vsel %vm850_vm9, %v772_v51, %v914_v61  ;;  %1264 = vst.msk [vmem:[%s1840_s13 + $0x60] sm:$0xf] %vm1239_vm0, %v1500_v62  ;;  %v880_v9 = vmul.f32 0.2, %v636_v1  ;;  %v657_v10 = vadd.f32 %v2011_v19, %v1829_v40 }
 0x140   : > { %v1535_v8 = vpack.c.bf16 %v978_v6, %v978_v6  ;;  %1296 = vst.msk [vmem:[%s1840_s13 + $0xe0] sm:$0xf] %vm1239_vm0, %v1532_v2  ;;  %vm848_vm11 = vcmp.ge.f32.partialorder %v764_v7, 0.0  ;;  %v912_v4 = vmul.f32 0.2, %v764_v7  ;;  %v785_v11 = vadd.f32 %v2013_v20, %v1829_v40 }
 0x141   : > { %1267 = vst.msk [vmem:[%s1840_s13 + $0x6c] sm:$0xf] %vm1239_vm0, %v1503_v3  ;;  %v649_v5 = vadd.f32 %v1829_v40, %v2015_v24  ;;  %v944_v12 = vsel %vm816_vm10, %v636_v1, %v880_v9  ;;  %vm821_vm12 = vcmp.ge.f32.partialorder %v657_v10, 0.0  ;;  %v885_v13 = vmul.f32 0.2, %v657_v10 }
 0x142   : > { %1299 = vst.msk [vmem:[%s1840_s13 + $0xec] sm:$0xf] %vm1239_vm0, %v1535_v8  ;;  %v777_v14 = vadd.f32 %v1829_v40, %v2027_v32  ;;  %v1501_v15 = vpack.c.bf16 %v944_v12, %v944_v12  ;;  %v976_v16 = vsel %vm848_vm11, %v764_v7, %v912_v4  ;;  %vm853_vm13 = vcmp.ge.f32.partialorder %v785_v11, 0.0 }
 0x143   : > { %v917_v17 = vmul.f32 0.2, %v785_v11  ;;  %v1533_v18 = vpack.c.bf16 %v976_v16, %v976_v16  ;;  %v949_v19 = vsel %vm821_vm12, %v657_v10, %v885_v13  ;;  %vm819_vm14 = vcmp.ge.f32.partialorder %v649_v5, 0.0 }
 0x144   : > { %v883_v20 = vmul.f32 0.2, %v649_v5  ;;  %1265 = vst.msk [vmem:[%s1840_s13 + $0x64] sm:$0xf] %vm1239_vm0, %v1501_v15  ;;  %v1506_v21 = vpack.c.bf16 %v949_v19, %v949_v19  ;;  %vm851_vm15 = vcmp.ge.f32.partialorder %v777_v14, 0.0  ;;  %v660_v26 = vadd.f32 %v2029_v33, %v1829_v40 }
 0x145   : > { %v981_v22 = vsel %vm853_vm13, %v785_v11, %v917_v17  ;;  %v915_v23 = vmul.f32 0.2, %v777_v14  ;;  %1297 = vst.msk [vmem:[%s1840_s13 + $0xe4] sm:$0xf] %vm1239_vm0, %v1533_v18  ;;  %v788_v27 = vadd.f32 %v2031_v38, %v1829_v40  ;;  %v652_v30 = vadd.f32 %v1829_v40, %v2033_v39 }
 0x146   : > { %v1538_v24 = vpack.c.bf16 %v981_v22, %v981_v22  ;;  %v947_v25 = vsel %vm819_vm14, %v649_v5, %v883_v20  ;;  %1270 = vst.msk [vmem:[%s1840_s13 + $0x78] sm:$0xf] %vm1239_vm0, %v1506_v21  ;;  %v780_v32 = vadd.f32 %v1829_v40, %v2035_v43  ;;  %vm822_vm1 = vcmp.ge.f32.partialorder %v660_v26, 0.0 }
 0x147   : > { %v1504_v28 = vpack.c.bf16 %v947_v25, %v947_v25  ;;  %v979_v29 = vsel %vm851_vm15, %v777_v14, %v915_v23  ;;  %v886_v35 = vmul.f32 0.2, %v660_v26  ;;  %vm854_vm2 = vcmp.ge.f32.partialorder %v788_v27, 0.0 }
 0x148   : > { %1302 = vst.msk [vmem:[%s1840_s13 + $0xf8] sm:$0xf] %vm1239_vm0, %v1538_v24  ;;  %v1536_v34 = vpack.c.bf16 %v979_v29, %v979_v29  ;;  %v918_v33 = vmul.f32 0.2, %v788_v27  ;;  %vm820_vm3 = vcmp.ge.f32.partialorder %v652_v30, 0.0  ;;  %vm852_vm4 = vcmp.ge.f32.partialorder %v780_v32, 0.0 }
 0x149   : > { %1268 = vst.msk [vmem:[%s1840_s13 + $0x70] sm:$0xf] %vm1239_vm0, %v1504_v28  ;;  %v884_v36 = vmul.f32 0.2, %v652_v30  ;;  %v950_v37 = vsel %vm822_vm1, %v660_v26, %v886_v35  ;;  %v916_v40 = vmul.f32 0.2, %v780_v32 }
 0x14a   : > { %1300 = vst.msk [vmem:[%s1840_s13 + $0xf0] sm:$0xf] %vm1239_vm0, %v1536_v34  ;;  %v1507_v38 = vpack.c.bf16 %v950_v37, %v950_v37  ;;  %v982_v39 = vsel %vm854_vm2, %v788_v27, %v918_v33 }
 0x14b   : > { %v948_v41 = vsel %vm820_vm3, %v652_v30, %v884_v36  ;;  %v1539_v31 = vpack.c.bf16 %v982_v39, %v982_v39  ;;  %v980_v43 = vsel %vm852_vm4, %v780_v32, %v916_v40 }
 0x14c   : > { %v1505_v42 = vpack.c.bf16 %v948_v41, %v948_v41  ;;  %1271 = vst.msk [vmem:[%s1840_s13 + $0x7c] sm:$0xf] %vm1239_vm0, %v1507_v38  ;;  %v1537_v44 = vpack.c.bf16 %v980_v43, %v980_v43 }
 0x14d   : > { %1303 = vst.msk [vmem:[%s1840_s13 + $0xfc] sm:$0xf] %vm1239_vm0, %v1539_v31 }
 0x14e   : > { %1269 = vst.msk [vmem:[%s1840_s13 + $0x74] sm:$0xf] %vm1239_vm0, %v1505_v42  ;;  %1301 = vst.msk [vmem:[%s1840_s13 + $0xf4] sm:$0xf] %vm1239_vm0, %v1537_v44 }
 0x14f PF: > { %s13_s12 = sadd.s32 1, %s1730_s12  }
 0x150   : > { %p10_p4 = scmp.ge.s32.totalorder %s13_s12, 6  }
 0x152   :  { %12 = sbr.rel (!%p10_p4) target bundleno = 1 (0x1), region = 62 }

// kernel: _lambda_.6
= control target key start
LH: loop header
LB: loop body
LE: loop exit
PB: predicated region body
PF: predicated region fallthrough
CT: control target
= control target key end

     0   :  { %v1853_v0 = vmov 0   ;;  %vm832_vm0 = vcmask 130048   ;;  %vm1425_vm1 = vcmask 125952   ;;  %vm829_vm2 = vcmask 123904   ;;  %s2844_s1 = inlined_call_operand.vmem [shape: bf16[256,16], index: 1, kind: input, shape index: {}]   ;;  %s2845_s0 = inlined_call_operand.vmem [shape: bf16[512,256], index: 0, kind: input, shape index: {}]   ;;  %s2846_s2 = inlined_call_operand.vmem [shape: f32[1,16], index: 2, kind: input, shape index: {}]   ;;  %s2847_s3 = inlined_call_operand.vmem [shape: bf16[512,16], index: 3, kind: output, shape index: {0}]   ;;  %s2848_s4 = inlined_call_operand.vmem [shape: f32[2,16], index: 4, kind: output, shape index: {1}]  }
   0x1   :  { %536 = vmatprep.subr.bf16.mxu0 %v1853_v0  ;;  %v1741_v1 = vld [vmem:[%s2844_s1] sm:$0xff]   ;;  %1707 = vmatprep.subr.bf16.mxu1 %v1853_v0  ;;  %v1742_v2 = vld [vmem:[%s2844_s1 + $0x8] sm:$0xff]   ;;  %v1743_v3 = vld [vmem:[%s2844_s1 + $0x10] sm:$0xff]   ;;  %vm967_vm3 = vcmask 122880  }
   0x2   :  { %537 = vmatpush1.bf16.msra.mxu0 %v1741_v1  ;;  %1723 = vmatpush1.bf16.msra.mxu1 %v1741_v1  ;;  %v1744_v4 = vld [vmem:[%s2844_s1 + $0x18] sm:$0xff]   ;;  %v1745_v5 = vld [vmem:[%s2844_s1 + $0x20] sm:$0xff]   ;;  %v1746_v7 = vld [vmem:[%s2844_s1 + $0x28] sm:$0xff]  }
   0x3   :  { %538 = vmatprep.subr.bf16.mxu0 %v1853_v0  ;;  %1708 = vmatprep.subr.bf16.mxu1 %v1853_v0  ;;  %v1759_v6 = vld [vmem:[%s2845_s0 + $0x4] ss:$8 sps:$4 sm:$0xff]   ;;  %v1747_v8 = vld [vmem:[%s2844_s1 + $0x30] sm:$0xff]   ;;  %v1748_v9 = vld [vmem:[%s2844_s1 + $0x38] sm:$0xff]  }
   0x4   :  { %568 = vmatprep.mubr.bf16.mxu0 %v1759_v6  ;;  %v1783_v10 = vld [vmem:[%s2845_s0 + $0x104] ss:$8 sps:$4 sm:$0xff]   ;;  %v1751_v13 = vld [vmem:[%s2844_s1 + $0x50] sm:$0xff]   ;;  %v1752_v14 = vld [vmem:[%s2844_s1 + $0x58] sm:$0xff]  }
   0x5   :  { %696 = vmatprep.mubr.bf16.mxu1 %v1783_v10  ;;  %v1749_v11 = vld [vmem:[%s2844_s1 + $0x40] sm:$0xff]   ;;  %v1750_v12 = vld [vmem:[%s2844_s1 + $0x48] sm:$0xff]   ;;  %v1755_v17 = vld [vmem:[%s2844_s1 + $0x70] sm:$0xff]  }
   0x6   :  { %539 = vmatpush1.bf16.msra.mxu0 %v1742_v2  ;;  %1724 = vmatpush1.bf16.msra.mxu1 %v1742_v2  ;;  %v1753_v15 = vld [vmem:[%s2844_s1 + $0x60] sm:$0xff]   ;;  %v1754_v16 = vld [vmem:[%s2844_s1 + $0x68] sm:$0xff]   ;;  %v1756_v18 = vld [vmem:[%s2844_s1 + $0x78] sm:$0xff]  }
   0x7   :  { %540 = vmatprep.subr.bf16.mxu0 %v1853_v0  ;;  %1709 = vmatprep.subr.bf16.mxu1 %v1853_v0  ;;  %v1757_v19 = vld [vmem:[%s2845_s0] ss:$8 sps:$4 sm:$0xff]   ;;  %v1760_v21 = vld [vmem:[%s2845_s0 + $0x14] ss:$8 sps:$4 sm:$0xff]   ;;  %v1762_v23 = vld [vmem:[%s2845_s0 + $0x10] ss:$8 sps:$4 sm:$0xff]  }
   0x8   :  { %v1781_v20 = vld [vmem:[%s2845_s0 + $0x100] ss:$8 sps:$4 sm:$0xff]   ;;  %v1787_v22 = vld [vmem:[%s2845_s0 + $0x114] ss:$8 sps:$4 sm:$0xff]   ;;  %v1789_v24 = vld [vmem:[%s2845_s0 + $0x110] ss:$8 sps:$4 sm:$0xff]  }
   0x9   :  { %v1763_v25 = vld [vmem:[%s2845_s0 + $0x24] ss:$8 sps:$4 sm:$0xff]   ;;  %v1765_v27 = vld [vmem:[%s2845_s0 + $0x20] ss:$8 sps:$4 sm:$0xff]   ;;  %v1766_v29 = vld [vmem:[%s2845_s0 + $0x34] ss:$8 sps:$4 sm:$0xff]  }
   0xa   :  { %541 = vmatpush1.bf16.msra.mxu0 %v1743_v3  ;;  %1725 = vmatpush1.bf16.msra.mxu1 %v1743_v3  ;;  %v1793_v26 = vld [vmem:[%s2845_s0 + $0x124] ss:$8 sps:$4 sm:$0xff]   ;;  %v1795_v28 = vld [vmem:[%s2845_s0 + $0x120] ss:$8 sps:$4 sm:$0xff]   ;;  %v1799_v30 = vld [vmem:[%s2845_s0 + $0x134] ss:$8 sps:$4 sm:$0xff]  }
   0xb   :  { %542 = vmatprep.subr.bf16.mxu0 %v1853_v0  ;;  %1710 = vmatprep.subr.bf16.mxu1 %v1853_v0  ;;  %v1768_v31 = vld [vmem:[%s2845_s0 + $0x30] ss:$8 sps:$4 sm:$0xff]   ;;  %v1769_v33 = vld [vmem:[%s2845_s0 + $0x44] ss:$8 sps:$4 sm:$0xff]   ;;  %v1771_v35 = vld [vmem:[%s2845_s0 + $0x40] ss:$8 sps:$4 sm:$0xff]  }
   0xc   :  { %v1801_v32 = vld [vmem:[%s2845_s0 + $0x130] ss:$8 sps:$4 sm:$0xff]   ;;  %v1805_v34 = vld [vmem:[%s2845_s0 + $0x144] ss:$8 sps:$4 sm:$0xff]   ;;  %v1807_v36 = vld [vmem:[%s2845_s0 + $0x140] ss:$8 sps:$4 sm:$0xff]  }
   0xd   :  { %v1772_v37 = vld [vmem:[%s2845_s0 + $0x54] ss:$8 sps:$4 sm:$0xff]   ;;  %v1774_v39 = vld [vmem:[%s2845_s0 + $0x50] ss:$8 sps:$4 sm:$0xff]   ;;  %v1775_v41 = vld [vmem:[%s2845_s0 + $0x64] ss:$8 sps:$4 sm:$0xff]  }
   0xe   :  { %543 = vmatpush1.bf16.msra.mxu0 %v1744_v4  ;;  %1726 = vmatpush1.bf16.msra.mxu1 %v1744_v4  ;;  %v1811_v38 = vld [vmem:[%s2845_s0 + $0x154] ss:$8 sps:$4 sm:$0xff]   ;;  %v1813_v40 = vld [vmem:[%s2845_s0 + $0x150] ss:$8 sps:$4 sm:$0xff]   ;;  %v1817_v42 = vld [vmem:[%s2845_s0 + $0x164] ss:$8 sps:$4 sm:$0xff]  }
   0xf   :  { %544 = vmatprep.subr.bf16.mxu0 %v1853_v0  ;;  %1711 = vmatprep.subr.bf16.mxu1 %v1853_v0  ;;  %v1777_v43 = vld [vmem:[%s2845_s0 + $0x60] ss:$8 sps:$4 sm:$0xff]   ;;  %v1778_v45 = vld [vmem:[%s2845_s0 + $0x74] ss:$8 sps:$4 sm:$0xff]   ;;  %v1780_v47 = vld [vmem:[%s2845_s0 + $0x70] ss:$8 sps:$4 sm:$0xff]  }
  0x10   :  { %v1819_v44 = vld [vmem:[%s2845_s0 + $0x160] ss:$8 sps:$4 sm:$0xff]   ;;  %v1823_v46 = vld [vmem:[%s2845_s0 + $0x174] ss:$8 sps:$4 sm:$0xff]   ;;  %v1825_v48 = vld [vmem:[%s2845_s0 + $0x170] ss:$8 sps:$4 sm:$0xff]  }
  0x11   :  { %v1784_v49 = vld [vmem:[%s2845_s0 + $0x84] ss:$8 sps:$4 sm:$0xff]   ;;  %v1786_v51 = vld [vmem:[%s2845_s0 + $0x80] ss:$8 sps:$4 sm:$0xff]   ;;  %v1790_v53 = vld [vmem:[%s2845_s0 + $0x94] ss:$8 sps:$4 sm:$0xff]  }
  0x12   :  { %545 = vmatpush1.bf16.msra.mxu0 %v1745_v5  ;;  %1727 = vmatpush1.bf16.msra.mxu1 %v1745_v5  ;;  %v1829_v50 = vld [vmem:[%s2845_s0 + $0x184] ss:$8 sps:$4 sm:$0xff]   ;;  %v1831_v52 = vld [vmem:[%s2845_s0 + $0x180] ss:$8 sps:$4 sm:$0xff]   ;;  %v1832_v54 = vld [vmem:[%s2845_s0 + $0x194] ss:$8 sps:$4 sm:$0xff]  }
  0x13   :  { %546 = vmatprep.subr.bf16.mxu0 %v1853_v0  ;;  %1712 = vmatprep.subr.bf16.mxu1 %v1853_v0  ;;  %v1792_v55 = vld [vmem:[%s2845_s0 + $0x90] ss:$8 sps:$4 sm:$0xff]   ;;  %v1796_v57 = vld [vmem:[%s2845_s0 + $0xa4] ss:$8 sps:$4 sm:$0xff]   ;;  %v1798_v59 = vld [vmem:[%s2845_s0 + $0xa0] ss:$8 sps:$4 sm:$0xff]  }
  0x14   :  { %v1834_v56 = vld [vmem:[%s2845_s0 + $0x190] ss:$8 sps:$4 sm:$0xff]   ;;  %v1835_v58 = vld [vmem:[%s2845_s0 + $0x1a4] ss:$8 sps:$4 sm:$0xff]   ;;  %v1837_v60 = vld [vmem:[%s2845_s0 + $0x1a0] ss:$8 sps:$4 sm:$0xff]  }
  0x15   :  { %v1802_v61 = vld [vmem:[%s2845_s0 + $0xb4] ss:$8 sps:$4 sm:$0xff]   ;;  %v1804_v63 = vld [vmem:[%s2845_s0 + $0xb0] ss:$8 sps:$4 sm:$0xff]   ;;  %v1808_v1 = vld [vmem:[%s2845_s0 + $0xc4] ss:$8 sps:$4 sm:$0xff]  }
  0x16   :  { %547 = vmatpush1.bf16.msra.mxu0 %v1746_v7  ;;  %1728 = vmatpush1.bf16.msra.mxu1 %v1746_v7  ;;  %v1838_v62 = vld [vmem:[%s2845_s0 + $0x1b4] ss:$8 sps:$4 sm:$0xff]   ;;  %v1841_v2 = vld [vmem:[%s2845_s0 + $0x1c4] ss:$8 sps:$4 sm:$0xff]   ;;  %v1810_v3 = vld [vmem:[%s2845_s0 + $0xc0] ss:$8 sps:$4 sm:$0xff]  }
  0x17   :  { %548 = vmatprep.subr.bf16.mxu0 %v1853_v0  ;;  %1713 = vmatprep.subr.bf16.mxu1 %v1853_v0  ;;  %v1843_v4 = vld [vmem:[%s2845_s0 + $0x1c0] ss:$8 sps:$4 sm:$0xff]   ;;  %v1814_v5 = vld [vmem:[%s2845_s0 + $0xd4] ss:$8 sps:$4 sm:$0xff]   ;;  %v1816_v7 = vld [vmem:[%s2845_s0 + $0xd0] ss:$8 sps:$4 sm:$0xff]  }
  0x18   :  { %v1844_v6 = vld [vmem:[%s2845_s0 + $0x1d4] ss:$8 sps:$4 sm:$0xff]   ;;  %v1847_v10 = vld [vmem:[%s2845_s0 + $0x1e4] ss:$8 sps:$4 sm:$0xff]  }
  0x1a   :  { %549 = vmatpush1.bf16.msra.mxu0 %v1747_v8  ;;  %1729 = vmatpush1.bf16.msra.mxu1 %v1747_v8  ;;  %v1846_v8 = vld [vmem:[%s2845_s0 + $0x1d0] ss:$8 sps:$4 sm:$0xff]  }
  0x1b   :  { %550 = vmatprep.subr.bf16.mxu0 %v1853_v0  ;;  %1714 = vmatprep.subr.bf16.mxu1 %v1853_v0 }
  0x1e   :  { %551 = vmatpush1.bf16.msra.mxu0 %v1748_v9  ;;  %1730 = vmatpush1.bf16.msra.mxu1 %v1748_v9  ;;  %v1820_v9 = vld [vmem:[%s2845_s0 + $0xe4] ss:$8 sps:$4 sm:$0xff]  }
  0x1f   :  { %552 = vmatprep.subr.bf16.mxu0 %v1853_v0  ;;  %1715 = vmatprep.subr.bf16.mxu1 %v1853_v0 }
  0x22   :  { %553 = vmatpush1.bf16.msra.mxu0 %v1749_v11  ;;  %1731 = vmatpush1.bf16.msra.mxu1 %v1749_v11  ;;  %v1822_v11 = vld [vmem:[%s2845_s0 + $0xe0] ss:$8 sps:$4 sm:$0xff]  }
  0x23   :  { %554 = vmatprep.subr.bf16.mxu0 %v1853_v0  ;;  %1716 = vmatprep.subr.bf16.mxu1 %v1853_v0 }
  0x26   :  { %555 = vmatpush1.bf16.msra.mxu0 %v1750_v12  ;;  %1732 = vmatpush1.bf16.msra.mxu1 %v1750_v12  ;;  %v1849_v12 = vld [vmem:[%s2845_s0 + $0x1e0] ss:$8 sps:$4 sm:$0xff]  }
  0x27   :  { %556 = vmatprep.subr.bf16.mxu0 %v1853_v0  ;;  %1717 = vmatprep.subr.bf16.mxu1 %v1853_v0 }
  0x2a   :  { %557 = vmatpush1.bf16.msra.mxu0 %v1751_v13  ;;  %1733 = vmatpush1.bf16.msra.mxu1 %v1751_v13  ;;  %v1826_v13 = vld [vmem:[%s2845_s0 + $0xf4] ss:$8 sps:$4 sm:$0xff]  }
  0x2b   :  { %558 = vmatprep.subr.bf16.mxu0 %v1853_v0  ;;  %1718 = vmatprep.subr.bf16.mxu1 %v1853_v0 }
  0x2e   :  { %559 = vmatpush1.bf16.msra.mxu0 %v1752_v14  ;;  %1734 = vmatpush1.bf16.msra.mxu1 %v1752_v14  ;;  %v1850_v14 = vld [vmem:[%s2845_s0 + $0x1f4] ss:$8 sps:$4 sm:$0xff]  }
  0x2f   :  { %560 = vmatprep.subr.bf16.mxu0 %v1853_v0  ;;  %1719 = vmatprep.subr.bf16.mxu1 %v1853_v0 }
  0x32   :  { %561 = vmatpush1.bf16.msra.mxu0 %v1753_v15  ;;  %1735 = vmatpush1.bf16.msra.mxu1 %v1753_v15  ;;  %v1828_v15 = vld [vmem:[%s2845_s0 + $0xf0] ss:$8 sps:$4 sm:$0xff]  }
  0x33   :  { %562 = vmatprep.subr.bf16.mxu0 %v1853_v0  ;;  %1720 = vmatprep.subr.bf16.mxu1 %v1853_v0 }
  0x36   :  { %563 = vmatpush1.bf16.msra.mxu0 %v1754_v16  ;;  %1736 = vmatpush1.bf16.msra.mxu1 %v1754_v16  ;;  %v1852_v16 = vld [vmem:[%s2845_s0 + $0x1f0] ss:$8 sps:$4 sm:$0xff]  }
  0x37   :  { %564 = vmatprep.subr.bf16.mxu0 %v1853_v0  ;;  %1721 = vmatprep.subr.bf16.mxu1 %v1853_v0 }
  0x3a   :  { %565 = vmatpush1.bf16.msra.mxu0 %v1755_v17  ;;  %1737 = vmatpush1.bf16.msra.mxu1 %v1755_v17  ;;  %v2155_v17 = vld [vmem:[%s2846_s2] ss:$0 sm:$0xff] }
  0x3b   :  { %566 = vmatprep.subr.bf16.mxu0 %v1853_v0  ;;  %1722 = vmatprep.subr.bf16.mxu1 %v1853_v0  ;;  %v1840_v0 = vld [vmem:[%s2845_s0 + $0x1b0] ss:$8 sps:$4 sm:$0xff]  }
  0x3e   :  { %567 = vmatpush1.bf16.msra.mxu0 %v1756_v18  ;;  %1738 = vmatpush1.bf16.msra.mxu1 %v1756_v18 }
  0x41   :  { %569 = vmatmul.mubr.bf16.vlgmr.msra.gmra.mrb[0].mxu0 %v1757_v19  ;;  %697 = vmatmul.mubr.bf16.vlgmr.msra.gmra.mrb[0].mxu1 %v1781_v20 }
  0x42   :  { %576 = vmatprep.mubr.bf16.mxu0 %v1760_v21  ;;  %704 = vmatprep.mubr.bf16.mxu1 %v1787_v22 }
  0x49   :  { %577 = vmatmul.mubr.bf16.gmra.mrb[4].mxu0 %v1762_v23  ;;  %705 = vmatmul.mubr.bf16.gmra.mrb[4].mxu1 %v1789_v24 }
  0x4a   :  { %584 = vmatprep.mubr.bf16.mxu0 %v1763_v25  ;;  %712 = vmatprep.mubr.bf16.mxu1 %v1793_v26 }
  0x51   :  { %585 = vmatmul.mubr.bf16.gmra.mrb[8].mxu0 %v1765_v27  ;;  %713 = vmatmul.mubr.bf16.gmra.mrb[8].mxu1 %v1795_v28 }
  0x52   :  { %592 = vmatprep.mubr.bf16.mxu0 %v1766_v29  ;;  %720 = vmatprep.mubr.bf16.mxu1 %v1799_v30 }
  0x59   :  { %593 = vmatmul.mubr.bf16.gmra.mrb[12].mxu0 %v1768_v31  ;;  %721 = vmatmul.mubr.bf16.gmra.mrb[12].mxu1 %v1801_v32 }
  0x5a   :  { %600 = vmatprep.mubr.bf16.mxu0 %v1769_v33  ;;  %728 = vmatprep.mubr.bf16.mxu1 %v1805_v34 }
  0x61   :  { %601 = vmatmul.mubr.bf16.gmra.mrb[16].mxu0 %v1771_v35  ;;  %729 = vmatmul.mubr.bf16.gmra.mrb[16].mxu1 %v1807_v36 }
  0x62   :  { %608 = vmatprep.mubr.bf16.mxu0 %v1772_v37  ;;  %736 = vmatprep.mubr.bf16.mxu1 %v1811_v38 }
  0x69   :  { %609 = vmatmul.mubr.bf16.gmra.mrb[20].mxu0 %v1774_v39  ;;  %737 = vmatmul.mubr.bf16.gmra.mrb[20].mxu1 %v1813_v40 }
  0x6a   :  { %616 = vmatprep.mubr.bf16.mxu0 %v1775_v41  ;;  %744 = vmatprep.mubr.bf16.mxu1 %v1817_v42 }
  0x71   :  { %617 = vmatmul.mubr.bf16.gmra.mrb[24].mxu0 %v1777_v43  ;;  %745 = vmatmul.mubr.bf16.gmra.mrb[24].mxu1 %v1819_v44 }
  0x72   :  { %624 = vmatprep.mubr.bf16.mxu0 %v1778_v45  ;;  %752 = vmatprep.mubr.bf16.mxu1 %v1823_v46 }
  0x79   :  { %625 = vmatmul.mubr.bf16.gmra.mrb[28].mxu0 %v1780_v47  ;;  %753 = vmatmul.mubr.bf16.gmra.mrb[28].mxu1 %v1825_v48 }
  0x7a   :  { %632 = vmatprep.mubr.bf16.mxu0 %v1784_v49  ;;  %760 = vmatprep.mubr.bf16.mxu1 %v1829_v50 }
  0x81   :  { %633 = vmatmul.mubr.bf16.gmra.mrb[32].mxu0 %v1786_v51  ;;  %761 = vmatmul.mubr.bf16.gmra.mrb[32].mxu1 %v1831_v52 }
  0x82   :  { %640 = vmatprep.mubr.bf16.mxu0 %v1790_v53  ;;  %768 = vmatprep.mubr.bf16.mxu1 %v1832_v54 }
  0x89   :  { %641 = vmatmul.mubr.bf16.gmra.mrb[36].mxu0 %v1792_v55  ;;  %769 = vmatmul.mubr.bf16.gmra.mrb[36].mxu1 %v1834_v56 }
  0x8a   :  { %648 = vmatprep.mubr.bf16.mxu0 %v1796_v57  ;;  %776 = vmatprep.mubr.bf16.mxu1 %v1835_v58 }
  0x91   :  { %649 = vmatmul.mubr.bf16.gmra.mrb[40].mxu0 %v1798_v59  ;;  %777 = vmatmul.mubr.bf16.gmra.mrb[40].mxu1 %v1837_v60 }
  0x92   :  { %656 = vmatprep.mubr.bf16.mxu0 %v1802_v61  ;;  %784 = vmatprep.mubr.bf16.mxu1 %v1838_v62 }
  0x99   :  { %657 = vmatmul.mubr.bf16.gmra.mrb[44].mxu0 %v1804_v63  ;;  %785 = vmatmul.mubr.bf16.gmra.mrb[44].mxu1 %v1840_v0 }
  0x9a   :  { %664 = vmatprep.mubr.bf16.mxu0 %v1808_v1  ;;  %792 = vmatprep.mubr.bf16.mxu1 %v1841_v2 }
  0xa1   :  { %665 = vmatmul.mubr.bf16.gmra.mrb[48].mxu0 %v1810_v3  ;;  %793 = vmatmul.mubr.bf16.gmra.mrb[48].mxu1 %v1843_v4 }
  0xa2   :  { %672 = vmatprep.mubr.bf16.mxu0 %v1814_v5  ;;  %800 = vmatprep.mubr.bf16.mxu1 %v1844_v6 }
  0xa9   :  { %673 = vmatmul.mubr.bf16.gmra.mrb[52].mxu0 %v1816_v7  ;;  %801 = vmatmul.mubr.bf16.gmra.mrb[52].mxu1 %v1846_v8 }
  0xaa   :  { %680 = vmatprep.mubr.bf16.mxu0 %v1820_v9  ;;  %808 = vmatprep.mubr.bf16.mxu1 %v1847_v10 }
  0xb1   :  { %681 = vmatmul.mubr.bf16.gmra.mrb[56].mxu0 %v1822_v11  ;;  %809 = vmatmul.mubr.bf16.gmra.mrb[56].mxu1 %v1849_v12 }
  0xb2   :  { %688 = vmatprep.mubr.bf16.mxu0 %v1826_v13  ;;  %816 = vmatprep.mubr.bf16.mxu1 %v1850_v14 }
  0xb9   :  { %689 = vmatmul.mubr.bf16.gmra.mrb[60].mxu0 %v1828_v15  ;;  %817 = vmatmul.mubr.bf16.gmra.mrb[60].mxu1 %v1852_v16 }
 0x114   :  { %v570_v18 = vpop.f32.mrb[0].mxu0  ;;  %v698_v19 = vpop.f32.mrb[0].mxu1 }
 0x115   :  { %v571_v20 = vadd.f32 %v2155_v17, %v570_v18  ;;  %v572_v21 = vpop.f32.mrb[1].mxu0  ;;  %v2159_v22 = vadd.f32 %v2155_v17, %v698_v19  ;;  %v700_v23 = vpop.f32.mrb[1].mxu1 }
 0x116   :  { %v573_v24 = vpop.f32.mrb[2].mxu0  ;;  %v701_v25 = vpop.f32.mrb[2].mxu1 }
 0x117   :  { %v970_v26 = vmul.f32 %v571_v20, %v571_v20  ;;  %v1643_v27 = vpack.c.bf16 %v571_v20, %v571_v20  ;;  %v574_v28 = vadd.f32 %v2155_v17, %v573_v24  ;;  %v575_v29 = vpop.f32.mrb[3].mxu0  ;;  %v703_v30 = vpop.f32.mrb[3].mxu1  ;;  %v1675_v31 = vpack.c.bf16 %v2159_v22, %v2159_v22 }
 0x118   :  { %v2165_v32 = vadd.f32 %v2155_v17, %v701_v25  ;;  %v833_v33 = vsel %vm832_vm0, %v571_v20, 0.0 }
 0x119   :  { %1426 = vst.msk [vmem:[%s2847_s3] sm:$0xf] %vm1425_vm1, %v1643_v27  ;;  %v834_v34 = vsel %vm832_vm0, %v574_v28, 0.0  ;;  %v971_v35 = vmul.f32 %v574_v28, %v574_v28  ;;  %v1644_v36 = vpack.c.bf16 %v574_v28, %v574_v28  ;;  %1458 = vst.msk [vmem:[%s2847_s3 + $0x80] sm:$0xf] %vm1425_vm1, %v1675_v31  ;;  %v1034_v38 = vsel %vm832_vm0, %v970_v26, 0.0 }
 0x11a   :  { %v835_v37 = vadd.f32 %v834_v34, %v833_v33  ;;  %v1676_v40 = vpack.c.bf16 %v2165_v32, %v2165_v32 }
 0x11b   :  { %v1035_v39 = vsel %vm832_vm0, %v971_v35, 0.0  ;;  %1427 = vst.msk [vmem:[%s2847_s3 + $0x4] sm:$0xf] %vm1425_vm1, %v1644_v36 }
 0x11c   :  { %v1036_v41 = vadd.f32 %v1035_v39, %v1034_v38  ;;  %v578_v42 = vpop.f32.mrb[4].mxu0  ;;  %v706_v43 = vpop.f32.mrb[4].mxu1  ;;  %1459 = vst.msk [vmem:[%s2847_s3 + $0x84] sm:$0xf] %vm1425_vm1, %v1676_v40 }
 0x11d   :  { %v579_v44 = vadd.f32 %v2155_v17, %v578_v42  ;;  %v580_v45 = vpop.f32.mrb[5].mxu0  ;;  %v2191_v46 = vadd.f32 %v2155_v17, %v706_v43  ;;  %v708_v47 = vpop.f32.mrb[5].mxu1 }
 0x11e   :  { %v581_v48 = vpop.f32.mrb[6].mxu0  ;;  %v709_v49 = vpop.f32.mrb[6].mxu1 }
 0x11f   :  { %v836_v50 = vsel %vm832_vm0, %v579_v44, 0.0  ;;  %v972_v51 = vmul.f32 %v579_v44, %v579_v44  ;;  %v1645_v52 = vpack.c.bf16 %v579_v44, %v579_v44  ;;  %v582_v53 = vadd.f32 %v2155_v17, %v581_v48  ;;  %v583_v54 = vpop.f32.mrb[7].mxu0  ;;  %v711_v55 = vpop.f32.mrb[7].mxu1 }
 0x120   :  { %v837_v56 = vadd.f32 %v836_v50, %v835_v37  ;;  %v1677_v57 = vpack.c.bf16 %v2191_v46, %v2191_v46  ;;  %v2208_v0 = vadd.f32 %v2155_v17, %v709_v49 }
 0x121   :  { %v1037_v58 = vsel %vm832_vm0, %v972_v51, 0.0  ;;  %1428 = vst.msk [vmem:[%s2847_s3 + $0x8] sm:$0xf] %vm1425_vm1, %v1645_v52  ;;  %v838_v59 = vsel %vm832_vm0, %v582_v53, 0.0  ;;  %v973_v60 = vmul.f32 %v582_v53, %v582_v53  ;;  %v1646_v61 = vpack.c.bf16 %v582_v53, %v582_v53 }
 0x122   :  { %v1038_v62 = vadd.f32 %v1037_v58, %v1036_v41  ;;  %v839_v63 = vadd.f32 %v838_v59, %v837_v56  ;;  %1460 = vst.msk [vmem:[%s2847_s3 + $0x88] sm:$0xf] %vm1425_vm1, %v1677_v57  ;;  %v1678_v4 = vpack.c.bf16 %v2208_v0, %v2208_v0 }
 0x123   :  { %v1039_v1 = vsel %vm832_vm0, %v973_v60, 0.0  ;;  %1429 = vst.msk [vmem:[%s2847_s3 + $0xc] sm:$0xf] %vm1425_vm1, %v1646_v61 }
 0x124   :  { %v1040_v2 = vadd.f32 %v1039_v1, %v1038_v62  ;;  %v586_v3 = vpop.f32.mrb[8].mxu0  ;;  %v714_v5 = vpop.f32.mrb[8].mxu1  ;;  %1461 = vst.msk [vmem:[%s2847_s3 + $0x8c] sm:$0xf] %vm1425_vm1, %v1678_v4 }
 0x125   :  { %v587_v6 = vadd.f32 %v2155_v17, %v586_v3  ;;  %v588_v7 = vpop.f32.mrb[9].mxu0  ;;  %v2219_v8 = vadd.f32 %v2155_v17, %v714_v5  ;;  %v716_v9 = vpop.f32.mrb[9].mxu1 }
 0x126   :  { %v589_v10 = vpop.f32.mrb[10].mxu0  ;;  %v717_v11 = vpop.f32.mrb[10].mxu1 }
 0x127   :  { %v840_v12 = vsel %vm832_vm0, %v587_v6, 0.0  ;;  %v974_v13 = vmul.f32 %v587_v6, %v587_v6  ;;  %v1647_v14 = vpack.c.bf16 %v587_v6, %v587_v6  ;;  %v590_v15 = vadd.f32 %v2155_v17, %v589_v10  ;;  %v591_v16 = vpop.f32.mrb[11].mxu0  ;;  %v719_v18 = vpop.f32.mrb[11].mxu1 }
 0x128   :  { %v841_v19 = vadd.f32 %v840_v12, %v839_v63  ;;  %v1679_v20 = vpack.c.bf16 %v2219_v8, %v2219_v8  ;;  %v2240_v28 = vadd.f32 %v2155_v17, %v717_v11 }
 0x129   :  { %v1041_v21 = vsel %vm832_vm0, %v974_v13, 0.0  ;;  %1430 = vst.msk [vmem:[%s2847_s3 + $0x10] sm:$0xf] %vm1425_vm1, %v1647_v14  ;;  %v842_v23 = vsel %vm832_vm0, %v590_v15, 0.0  ;;  %v975_v24 = vmul.f32 %v590_v15, %v590_v15  ;;  %v1648_v25 = vpack.c.bf16 %v590_v15, %v590_v15 }
 0x12a   :  { %v1042_v26 = vadd.f32 %v1041_v21, %v1040_v2  ;;  %v843_v27 = vadd.f32 %v842_v23, %v841_v19  ;;  %1462 = vst.msk [vmem:[%s2847_s3 + $0x90] sm:$0xf] %vm1425_vm1, %v1679_v20  ;;  %v1680_v33 = vpack.c.bf16 %v2240_v28, %v2240_v28 }
 0x12b   :  { %v1043_v29 = vsel %vm832_vm0, %v975_v24, 0.0  ;;  %1431 = vst.msk [vmem:[%s2847_s3 + $0x14] sm:$0xf] %vm1425_vm1, %v1648_v25 }
 0x12c   :  { %v1044_v30 = vadd.f32 %v1043_v29, %v1042_v26  ;;  %v594_v31 = vpop.f32.mrb[12].mxu0  ;;  %v722_v34 = vpop.f32.mrb[12].mxu1  ;;  %1463 = vst.msk [vmem:[%s2847_s3 + $0x94] sm:$0xf] %vm1425_vm1, %v1680_v33 }
 0x12d   :  { %v595_v35 = vadd.f32 %v2155_v17, %v594_v31  ;;  %v596_v36 = vpop.f32.mrb[13].mxu0  ;;  %v2251_v37 = vadd.f32 %v2155_v17, %v722_v34  ;;  %v724_v38 = vpop.f32.mrb[13].mxu1 }
 0x12e   :  { %v597_v39 = vpop.f32.mrb[14].mxu0  ;;  %v725_v40 = vpop.f32.mrb[14].mxu1 }
 0x12f   :  { %v844_v41 = vsel %vm832_vm0, %v595_v35, 0.0  ;;  %v976_v42 = vmul.f32 %v595_v35, %v595_v35  ;;  %v1649_v43 = vpack.c.bf16 %v595_v35, %v595_v35  ;;  %v598_v44 = vadd.f32 %v2155_v17, %v597_v39  ;;  %v599_v45 = vpop.f32.mrb[15].mxu0  ;;  %v727_v47 = vpop.f32.mrb[15].mxu1 }
 0x130   :  { %v845_v48 = vadd.f32 %v844_v41, %v843_v27  ;;  %v1681_v49 = vpack.c.bf16 %v2251_v37, %v2251_v37  ;;  %v2272_v56 = vadd.f32 %v2155_v17, %v725_v40 }
 0x131   :  { %v1045_v50 = vsel %vm832_vm0, %v976_v42, 0.0  ;;  %1432 = vst.msk [vmem:[%s2847_s3 + $0x18] sm:$0xf] %vm1425_vm1, %v1649_v43  ;;  %v846_v51 = vsel %vm832_vm0, %v598_v44, 0.0  ;;  %v977_v52 = vmul.f32 %v598_v44, %v598_v44  ;;  %v1650_v53 = vpack.c.bf16 %v598_v44, %v598_v44 }
 0x132   :  { %v1046_v54 = vadd.f32 %v1045_v50, %v1044_v30  ;;  %v847_v55 = vadd.f32 %v846_v51, %v845_v48  ;;  %1464 = vst.msk [vmem:[%s2847_s3 + $0x98] sm:$0xf] %vm1425_vm1, %v1681_v49  ;;  %v1682_v60 = vpack.c.bf16 %v2272_v56, %v2272_v56 }
 0x133   :  { %v1047_v57 = vsel %vm832_vm0, %v977_v52, 0.0  ;;  %1433 = vst.msk [vmem:[%s2847_s3 + $0x1c] sm:$0xf] %vm1425_vm1, %v1650_v53 }
 0x134   :  { %v1048_v58 = vadd.f32 %v1047_v57, %v1046_v54  ;;  %v602_v59 = vpop.f32.mrb[16].mxu0  ;;  %v730_v61 = vpop.f32.mrb[16].mxu1  ;;  %1465 = vst.msk [vmem:[%s2847_s3 + $0x9c] sm:$0xf] %vm1425_vm1, %v1682_v60 }
 0x135   :  { %v603_v62 = vadd.f32 %v2155_v17, %v602_v59  ;;  %v604_v63 = vpop.f32.mrb[17].mxu0  ;;  %v2283_v1 = vadd.f32 %v2155_v17, %v730_v61  ;;  %v732_v2 = vpop.f32.mrb[17].mxu1 }
 0x136   :  { %v605_v3 = vpop.f32.mrb[18].mxu0  ;;  %v733_v4 = vpop.f32.mrb[18].mxu1 }
 0x137   :  { %v848_v5 = vsel %vm832_vm0, %v603_v62, 0.0  ;;  %v978_v6 = vmul.f32 %v603_v62, %v603_v62  ;;  %v1651_v7 = vpack.c.bf16 %v603_v62, %v603_v62  ;;  %v606_v9 = vadd.f32 %v2155_v17, %v605_v3  ;;  %v607_v10 = vpop.f32.mrb[19].mxu0  ;;  %v735_v11 = vpop.f32.mrb[19].mxu1 }
 0x138   :  { %v849_v12 = vadd.f32 %v848_v5, %v847_v55  ;;  %v1683_v13 = vpack.c.bf16 %v2283_v1, %v2283_v1  ;;  %v2304_v21 = vadd.f32 %v2155_v17, %v733_v4 }
 0x139   :  { %v1049_v14 = vsel %vm832_vm0, %v978_v6, 0.0  ;;  %1434 = vst.msk [vmem:[%s2847_s3 + $0x20] sm:$0xf] %vm1425_vm1, %v1651_v7  ;;  %v850_v15 = vsel %vm832_vm0, %v606_v9, 0.0  ;;  %v979_v16 = vmul.f32 %v606_v9, %v606_v9  ;;  %v1652_v18 = vpack.c.bf16 %v606_v9, %v606_v9 }
 0x13a   :  { %v1050_v19 = vadd.f32 %v1049_v14, %v1048_v58  ;;  %v851_v20 = vadd.f32 %v850_v15, %v849_v12  ;;  %1466 = vst.msk [vmem:[%s2847_s3 + $0xa0] sm:$0xf] %vm1425_vm1, %v1683_v13  ;;  %v1684_v26 = vpack.c.bf16 %v2304_v21, %v2304_v21 }
 0x13b   :  { %v1051_v23 = vsel %vm832_vm0, %v979_v16, 0.0  ;;  %1435 = vst.msk [vmem:[%s2847_s3 + $0x24] sm:$0xf] %vm1425_vm1, %v1652_v18 }
 0x13c   :  { %v1052_v24 = vadd.f32 %v1051_v23, %v1050_v19  ;;  %v610_v25 = vpop.f32.mrb[20].mxu0  ;;  %v738_v27 = vpop.f32.mrb[20].mxu1  ;;  %1467 = vst.msk [vmem:[%s2847_s3 + $0xa4] sm:$0xf] %vm1425_vm1, %v1684_v26 }
 0x13d   :  { %v611_v29 = vadd.f32 %v2155_v17, %v610_v25  ;;  %v612_v30 = vpop.f32.mrb[21].mxu0  ;;  %v2315_v31 = vadd.f32 %v2155_v17, %v738_v27  ;;  %v740_v33 = vpop.f32.mrb[21].mxu1 }
 0x13e   :  { %v613_v34 = vpop.f32.mrb[22].mxu0  ;;  %v741_v35 = vpop.f32.mrb[22].mxu1 }
 0x13f   :  { %v852_v36 = vsel %vm832_vm0, %v611_v29, 0.0  ;;  %v980_v38 = vmul.f32 %v611_v29, %v611_v29  ;;  %v1653_v39 = vpack.c.bf16 %v611_v29, %v611_v29  ;;  %v614_v40 = vadd.f32 %v2155_v17, %v613_v34  ;;  %v615_v41 = vpop.f32.mrb[23].mxu0  ;;  %v743_v42 = vpop.f32.mrb[23].mxu1 }
 0x140   :  { %v853_v43 = vadd.f32 %v852_v36, %v851_v20  ;;  %v1685_v44 = vpack.c.bf16 %v2315_v31, %v2315_v31  ;;  %v2336_v52 = vadd.f32 %v2155_v17, %v741_v35 }
 0x141   :  { %v1053_v45 = vsel %vm832_vm0, %v980_v38, 0.0  ;;  %1436 = vst.msk [vmem:[%s2847_s3 + $0x28] sm:$0xf] %vm1425_vm1, %v1653_v39  ;;  %v854_v47 = vsel %vm832_vm0, %v614_v40, 0.0  ;;  %v981_v48 = vmul.f32 %v614_v40, %v614_v40  ;;  %v1654_v49 = vpack.c.bf16 %v614_v40, %v614_v40 }
 0x142   :  { %v1054_v50 = vadd.f32 %v1053_v45, %v1052_v24  ;;  %v855_v51 = vadd.f32 %v854_v47, %v853_v43  ;;  %1468 = vst.msk [vmem:[%s2847_s3 + $0xa8] sm:$0xf] %vm1425_vm1, %v1685_v44  ;;  %v1686_v57 = vpack.c.bf16 %v2336_v52, %v2336_v52 }
 0x143   :  { %v1055_v53 = vsel %vm832_vm0, %v981_v48, 0.0  ;;  %1437 = vst.msk [vmem:[%s2847_s3 + $0x2c] sm:$0xf] %vm1425_vm1, %v1654_v49 }
 0x144   :  { %v1056_v54 = vadd.f32 %v1055_v53, %v1054_v50  ;;  %v618_v55 = vpop.f32.mrb[24].mxu0  ;;  %v746_v58 = vpop.f32.mrb[24].mxu1  ;;  %1469 = vst.msk [vmem:[%s2847_s3 + $0xac] sm:$0xf] %vm1425_vm1, %v1686_v57 }
 0x145   :  { %v619_v59 = vadd.f32 %v2155_v17, %v618_v55  ;;  %v620_v60 = vpop.f32.mrb[25].mxu0  ;;  %v2347_v61 = vadd.f32 %v2155_v17, %v746_v58  ;;  %v748_v62 = vpop.f32.mrb[25].mxu1 }
 0x146   :  { %v621_v63 = vpop.f32.mrb[26].mxu0  ;;  %v749_v2 = vpop.f32.mrb[26].mxu1  ;;  %v1854_v60 = vmov 0.0  }
 0x147   :  { %v856_v3 = vsel %vm832_vm0, %v619_v59, 0.0  ;;  %v982_v4 = vmul.f32 %v619_v59, %v619_v59  ;;  %v1655_v5 = vpack.c.bf16 %v619_v59, %v619_v59  ;;  %v622_v6 = vadd.f32 %v2155_v17, %v621_v63  ;;  %v623_v7 = vpop.f32.mrb[27].mxu0  ;;  %v751_v9 = vpop.f32.mrb[27].mxu1  ;;  %830 = vst.msk [vmem:[%s2848_s4] sm:$0x3] %vm829_vm2, %v1854_v60 }
 0x148   :  { %v857_v10 = vadd.f32 %v856_v3, %v855_v51  ;;  %v1687_v11 = vpack.c.bf16 %v2347_v61, %v2347_v61  ;;  %v2368_v19 = vadd.f32 %v2155_v17, %v749_v2 }
 0x149   :  { %v1057_v12 = vsel %vm832_vm0, %v982_v4, 0.0  ;;  %1438 = vst.msk [vmem:[%s2847_s3 + $0x30] sm:$0xf] %vm1425_vm1, %v1655_v5  ;;  %v858_v13 = vsel %vm832_vm0, %v622_v6, 0.0  ;;  %v983_v14 = vmul.f32 %v622_v6, %v622_v6  ;;  %v1656_v15 = vpack.c.bf16 %v622_v6, %v622_v6 }
 0x14a   :  { %v1058_v16 = vadd.f32 %v1057_v12, %v1056_v54  ;;  %v859_v18 = vadd.f32 %v858_v13, %v857_v10  ;;  %1470 = vst.msk [vmem:[%s2847_s3 + $0xb0] sm:$0xf] %vm1425_vm1, %v1687_v11  ;;  %v1688_v25 = vpack.c.bf16 %v2368_v19, %v2368_v19 }
 0x14b   :  { %v1059_v20 = vsel %vm832_vm0, %v983_v14, 0.0  ;;  %1439 = vst.msk [vmem:[%s2847_s3 + $0x34] sm:$0xf] %vm1425_vm1, %v1656_v15 }
 0x14c   :  { %v1060_v23 = vadd.f32 %v1059_v20, %v1058_v16  ;;  %v626_v24 = vpop.f32.mrb[28].mxu0  ;;  %v754_v26 = vpop.f32.mrb[28].mxu1  ;;  %1471 = vst.msk [vmem:[%s2847_s3 + $0xb4] sm:$0xf] %vm1425_vm1, %v1688_v25 }
 0x14d   :  { %v627_v27 = vadd.f32 %v2155_v17, %v626_v24  ;;  %v628_v29 = vpop.f32.mrb[29].mxu0  ;;  %v2379_v30 = vadd.f32 %v2155_v17, %v754_v26  ;;  %v756_v33 = vpop.f32.mrb[29].mxu1 }
 0x14e   :  { %v629_v34 = vpop.f32.mrb[30].mxu0  ;;  %v757_v35 = vpop.f32.mrb[30].mxu1 }
 0x14f   :  { %v860_v36 = vsel %vm832_vm0, %v627_v27, 0.0  ;;  %v984_v38 = vmul.f32 %v627_v27, %v627_v27  ;;  %v1657_v39 = vpack.c.bf16 %v627_v27, %v627_v27  ;;  %v630_v40 = vadd.f32 %v2155_v17, %v629_v34  ;;  %v631_v41 = vpop.f32.mrb[31].mxu0  ;;  %v759_v42 = vpop.f32.mrb[31].mxu1 }
 0x150   :  { %v861_v43 = vadd.f32 %v860_v36, %v859_v18  ;;  %v1689_v44 = vpack.c.bf16 %v2379_v30, %v2379_v30  ;;  %v2400_v53 = vadd.f32 %v2155_v17, %v757_v35 }
 0x151   :  { %v1061_v45 = vsel %vm832_vm0, %v984_v38, 0.0  ;;  %1440 = vst.msk [vmem:[%s2847_s3 + $0x38] sm:$0xf] %vm1425_vm1, %v1657_v39  ;;  %v862_v47 = vsel %vm832_vm0, %v630_v40, 0.0  ;;  %v985_v48 = vmul.f32 %v630_v40, %v630_v40  ;;  %v1658_v49 = vpack.c.bf16 %v630_v40, %v630_v40 }
 0x152   :  { %v1062_v50 = vadd.f32 %v1061_v45, %v1060_v23  ;;  %v863_v51 = vadd.f32 %v862_v47, %v861_v43  ;;  %1472 = vst.msk [vmem:[%s2847_s3 + $0xb8] sm:$0xf] %vm1425_vm1, %v1689_v44  ;;  %v1690_v58 = vpack.c.bf16 %v2400_v53, %v2400_v53 }
 0x153   :  { %v1063_v54 = vsel %vm832_vm0, %v985_v48, 0.0  ;;  %1441 = vst.msk [vmem:[%s2847_s3 + $0x3c] sm:$0xf] %vm1425_vm1, %v1658_v49 }
 0x154   :  { %v1064_v55 = vadd.f32 %v1063_v54, %v1062_v50  ;;  %v634_v57 = vpop.f32.mrb[32].mxu0  ;;  %v762_v59 = vpop.f32.mrb[32].mxu1  ;;  %1473 = vst.msk [vmem:[%s2847_s3 + $0xbc] sm:$0xf] %vm1425_vm1, %v1690_v58 }
 0x155   :  { %v635_v62 = vadd.f32 %v2155_v17, %v634_v57  ;;  %v636_v63 = vpop.f32.mrb[33].mxu0  ;;  %v2414_v2 = vadd.f32 %v2155_v17, %v762_v59  ;;  %v764_v3 = vpop.f32.mrb[33].mxu1 }
 0x156   :  { %v637_v4 = vpop.f32.mrb[34].mxu0  ;;  %v765_v5 = vpop.f32.mrb[34].mxu1 }
 0x157   :  { %v864_v6 = vsel %vm832_vm0, %v635_v62, 0.0  ;;  %v986_v7 = vmul.f32 %v635_v62, %v635_v62  ;;  %v1659_v9 = vpack.c.bf16 %v635_v62, %v635_v62  ;;  %v638_v10 = vadd.f32 %v2155_v17, %v637_v4  ;;  %v639_v11 = vpop.f32.mrb[35].mxu0  ;;  %v767_v12 = vpop.f32.mrb[35].mxu1 }
 0x158   :  { %v865_v13 = vadd.f32 %v864_v6, %v863_v51  ;;  %v1691_v14 = vpack.c.bf16 %v2414_v2, %v2414_v2  ;;  %v2435_v25 = vadd.f32 %v2155_v17, %v765_v5 }
 0x159   :  { %v1065_v15 = vsel %vm832_vm0, %v986_v7, 0.0  ;;  %1442 = vst.msk [vmem:[%s2847_s3 + $0x40] sm:$0xf] %vm1425_vm1, %v1659_v9  ;;  %v866_v16 = vsel %vm832_vm0, %v638_v10, 0.0  ;;  %v987_v18 = vmul.f32 %v638_v10, %v638_v10  ;;  %v1660_v20 = vpack.c.bf16 %v638_v10, %v638_v10 }
 0x15a   :  { %v1066_v23 = vadd.f32 %v1065_v15, %v1064_v55  ;;  %v867_v24 = vadd.f32 %v866_v16, %v865_v13  ;;  %1474 = vst.msk [vmem:[%s2847_s3 + $0xc0] sm:$0xf] %vm1425_vm1, %v1691_v14  ;;  %v1692_v33 = vpack.c.bf16 %v2435_v25, %v2435_v25 }
 0x15b   :  { %v1067_v26 = vsel %vm832_vm0, %v987_v18, 0.0  ;;  %1443 = vst.msk [vmem:[%s2847_s3 + $0x44] sm:$0xf] %vm1425_vm1, %v1660_v20 }
 0x15c   :  { %v1068_v27 = vadd.f32 %v1067_v26, %v1066_v23  ;;  %v642_v29 = vpop.f32.mrb[36].mxu0  ;;  %v770_v34 = vpop.f32.mrb[36].mxu1  ;;  %1475 = vst.msk [vmem:[%s2847_s3 + $0xc4] sm:$0xf] %vm1425_vm1, %v1692_v33 }
 0x15d   :  { %v643_v35 = vadd.f32 %v2155_v17, %v642_v29  ;;  %v644_v36 = vpop.f32.mrb[37].mxu0  ;;  %v2446_v38 = vadd.f32 %v2155_v17, %v770_v34  ;;  %v772_v39 = vpop.f32.mrb[37].mxu1 }
 0x15e   :  { %v645_v40 = vpop.f32.mrb[38].mxu0  ;;  %v773_v41 = vpop.f32.mrb[38].mxu1 }
 0x15f   :  { %v868_v42 = vsel %vm832_vm0, %v643_v35, 0.0  ;;  %v988_v43 = vmul.f32 %v643_v35, %v643_v35  ;;  %v1661_v44 = vpack.c.bf16 %v643_v35, %v643_v35  ;;  %v646_v45 = vadd.f32 %v2155_v17, %v645_v40  ;;  %v647_v47 = vpop.f32.mrb[39].mxu0  ;;  %v775_v48 = vpop.f32.mrb[39].mxu1 }
 0x160   :  { %v869_v49 = vadd.f32 %v868_v42, %v867_v24  ;;  %v1693_v50 = vpack.c.bf16 %v2446_v38, %v2446_v38  ;;  %v2467_v60 = vadd.f32 %v2155_v17, %v773_v41 }
 0x161   :  { %v1069_v51 = vsel %vm832_vm0, %v988_v43, 0.0  ;;  %1444 = vst.msk [vmem:[%s2847_s3 + $0x48] sm:$0xf] %vm1425_vm1, %v1661_v44  ;;  %v870_v54 = vsel %vm832_vm0, %v646_v45, 0.0  ;;  %v989_v55 = vmul.f32 %v646_v45, %v646_v45  ;;  %v1662_v57 = vpack.c.bf16 %v646_v45, %v646_v45 }
 0x162   :  { %v1070_v58 = vadd.f32 %v1069_v51, %v1068_v27  ;;  %v871_v59 = vadd.f32 %v870_v54, %v869_v49  ;;  %1476 = vst.msk [vmem:[%s2847_s3 + $0xc8] sm:$0xf] %vm1425_vm1, %v1693_v50  ;;  %v1694_v4 = vpack.c.bf16 %v2467_v60, %v2467_v60 }
 0x163   :  { %v1071_v62 = vsel %vm832_vm0, %v989_v55, 0.0  ;;  %1445 = vst.msk [vmem:[%s2847_s3 + $0x4c] sm:$0xf] %vm1425_vm1, %v1662_v57 }
 0x164   :  { %v1072_v63 = vadd.f32 %v1071_v62, %v1070_v58  ;;  %v650_v3 = vpop.f32.mrb[40].mxu0  ;;  %v778_v5 = vpop.f32.mrb[40].mxu1  ;;  %1477 = vst.msk [vmem:[%s2847_s3 + $0xcc] sm:$0xf] %vm1425_vm1, %v1694_v4 }
 0x165   :  { %v651_v6 = vadd.f32 %v2155_v17, %v650_v3  ;;  %v652_v7 = vpop.f32.mrb[41].mxu0  ;;  %v2478_v9 = vadd.f32 %v2155_v17, %v778_v5  ;;  %v780_v10 = vpop.f32.mrb[41].mxu1 }
 0x166   :  { %v653_v11 = vpop.f32.mrb[42].mxu0  ;;  %v781_v12 = vpop.f32.mrb[42].mxu1 }
 0x167   :  { %v872_v13 = vsel %vm832_vm0, %v651_v6, 0.0  ;;  %v990_v14 = vmul.f32 %v651_v6, %v651_v6  ;;  %v1663_v15 = vpack.c.bf16 %v651_v6, %v651_v6  ;;  %v654_v16 = vadd.f32 %v2155_v17, %v653_v11  ;;  %v655_v18 = vpop.f32.mrb[43].mxu0  ;;  %v783_v20 = vpop.f32.mrb[43].mxu1 }
 0x168   :  { %v873_v23 = vadd.f32 %v872_v13, %v871_v59  ;;  %v1695_v24 = vpack.c.bf16 %v2478_v9, %v2478_v9  ;;  %v2499_v36 = vadd.f32 %v2155_v17, %v781_v12 }
 0x169   :  { %v1073_v26 = vsel %vm832_vm0, %v990_v14, 0.0  ;;  %1446 = vst.msk [vmem:[%s2847_s3 + $0x50] sm:$0xf] %vm1425_vm1, %v1663_v15  ;;  %v874_v27 = vsel %vm832_vm0, %v654_v16, 0.0  ;;  %v991_v29 = vmul.f32 %v654_v16, %v654_v16  ;;  %v1664_v33 = vpack.c.bf16 %v654_v16, %v654_v16 }
 0x16a   :  { %v1074_v34 = vadd.f32 %v1073_v26, %v1072_v63  ;;  %v875_v35 = vadd.f32 %v874_v27, %v873_v23  ;;  %1478 = vst.msk [vmem:[%s2847_s3 + $0xd0] sm:$0xf] %vm1425_vm1, %v1695_v24  ;;  %v1696_v42 = vpack.c.bf16 %v2499_v36, %v2499_v36 }
 0x16b   :  { %v1075_v39 = vsel %vm832_vm0, %v991_v29, 0.0  ;;  %1447 = vst.msk [vmem:[%s2847_s3 + $0x54] sm:$0xf] %vm1425_vm1, %v1664_v33 }
 0x16c   :  { %v1076_v40 = vadd.f32 %v1075_v39, %v1074_v34  ;;  %v658_v41 = vpop.f32.mrb[44].mxu0  ;;  %v786_v43 = vpop.f32.mrb[44].mxu1  ;;  %1479 = vst.msk [vmem:[%s2847_s3 + $0xd4] sm:$0xf] %vm1425_vm1, %v1696_v42 }
 0x16d   :  { %v659_v44 = vadd.f32 %v2155_v17, %v658_v41  ;;  %v660_v45 = vpop.f32.mrb[45].mxu0  ;;  %v2510_v47 = vadd.f32 %v2155_v17, %v786_v43  ;;  %v788_v48 = vpop.f32.mrb[45].mxu1 }
 0x16e   :  { %v661_v49 = vpop.f32.mrb[46].mxu0  ;;  %v789_v50 = vpop.f32.mrb[46].mxu1 }
 0x16f   :  { %v876_v51 = vsel %vm832_vm0, %v659_v44, 0.0  ;;  %v992_v54 = vmul.f32 %v659_v44, %v659_v44  ;;  %v1665_v55 = vpack.c.bf16 %v659_v44, %v659_v44  ;;  %v662_v57 = vadd.f32 %v2155_v17, %v661_v49  ;;  %v663_v58 = vpop.f32.mrb[47].mxu0  ;;  %v791_v59 = vpop.f32.mrb[47].mxu1 }
 0x170   :  { %v877_v62 = vadd.f32 %v876_v51, %v875_v35  ;;  %v1697_v63 = vpack.c.bf16 %v2510_v47, %v2510_v47  ;;  %v2531_v11 = vadd.f32 %v2155_v17, %v789_v50 }
 0x171   :  { %v1077_v3 = vsel %vm832_vm0, %v992_v54, 0.0  ;;  %1448 = vst.msk [vmem:[%s2847_s3 + $0x58] sm:$0xf] %vm1425_vm1, %v1665_v55  ;;  %v878_v4 = vsel %vm832_vm0, %v662_v57, 0.0  ;;  %v993_v5 = vmul.f32 %v662_v57, %v662_v57  ;;  %v1666_v6 = vpack.c.bf16 %v662_v57, %v662_v57 }
 0x172   :  { %v1078_v7 = vadd.f32 %v1077_v3, %v1076_v40  ;;  %v879_v10 = vadd.f32 %v878_v4, %v877_v62  ;;  %1480 = vst.msk [vmem:[%s2847_s3 + $0xd8] sm:$0xf] %vm1425_vm1, %v1697_v63  ;;  %v1698_v15 = vpack.c.bf16 %v2531_v11, %v2531_v11 }
 0x173   :  { %v1079_v12 = vsel %vm832_vm0, %v993_v5, 0.0  ;;  %1449 = vst.msk [vmem:[%s2847_s3 + $0x5c] sm:$0xf] %vm1425_vm1, %v1666_v6 }
 0x174   :  { %v1080_v13 = vadd.f32 %v1079_v12, %v1078_v7  ;;  %v666_v14 = vpop.f32.mrb[48].mxu0  ;;  %v794_v16 = vpop.f32.mrb[48].mxu1  ;;  %1481 = vst.msk [vmem:[%s2847_s3 + $0xdc] sm:$0xf] %vm1425_vm1, %v1698_v15 }
 0x175   :  { %v667_v18 = vadd.f32 %v2155_v17, %v666_v14  ;;  %v668_v20 = vpop.f32.mrb[49].mxu0  ;;  %v2542_v23 = vadd.f32 %v2155_v17, %v794_v16  ;;  %v796_v24 = vpop.f32.mrb[49].mxu1 }
 0x176   :  { %v669_v26 = vpop.f32.mrb[50].mxu0  ;;  %v797_v27 = vpop.f32.mrb[50].mxu1 }
 0x177   :  { %v880_v29 = vsel %vm832_vm0, %v667_v18, 0.0  ;;  %v994_v33 = vmul.f32 %v667_v18, %v667_v18  ;;  %v1667_v34 = vpack.c.bf16 %v667_v18, %v667_v18  ;;  %v670_v35 = vadd.f32 %v2155_v17, %v669_v26  ;;  %v671_v39 = vpop.f32.mrb[51].mxu0  ;;  %v799_v40 = vpop.f32.mrb[51].mxu1 }
 0x178   :  { %v881_v41 = vadd.f32 %v880_v29, %v879_v10  ;;  %v1699_v42 = vpack.c.bf16 %v2542_v23, %v2542_v23  ;;  %v2563_v51 = vadd.f32 %v2155_v17, %v797_v27 }
 0x179   :  { %v1081_v43 = vsel %vm832_vm0, %v994_v33, 0.0  ;;  %1450 = vst.msk [vmem:[%s2847_s3 + $0x60] sm:$0xf] %vm1425_vm1, %v1667_v34  ;;  %v882_v44 = vsel %vm832_vm0, %v670_v35, 0.0  ;;  %v995_v45 = vmul.f32 %v670_v35, %v670_v35  ;;  %v1668_v48 = vpack.c.bf16 %v670_v35, %v670_v35 }
 0x17a   :  { %v1082_v49 = vadd.f32 %v1081_v43, %v1080_v13  ;;  %v883_v50 = vadd.f32 %v882_v44, %v881_v41  ;;  %1482 = vst.msk [vmem:[%s2847_s3 + $0xe0] sm:$0xf] %vm1425_vm1, %v1699_v42  ;;  %v1700_v58 = vpack.c.bf16 %v2563_v51, %v2563_v51 }
 0x17b   :  { %v1083_v54 = vsel %vm832_vm0, %v995_v45, 0.0  ;;  %1451 = vst.msk [vmem:[%s2847_s3 + $0x64] sm:$0xf] %vm1425_vm1, %v1668_v48 }
 0x17c   :  { %v1084_v55 = vadd.f32 %v1083_v54, %v1082_v49  ;;  %v674_v57 = vpop.f32.mrb[52].mxu0  ;;  %v802_v59 = vpop.f32.mrb[52].mxu1  ;;  %1483 = vst.msk [vmem:[%s2847_s3 + $0xe4] sm:$0xf] %vm1425_vm1, %v1700_v58 }
 0x17d   :  { %v675_v62 = vadd.f32 %v2155_v17, %v674_v57  ;;  %v676_v63 = vpop.f32.mrb[53].mxu0  ;;  %v2574_v3 = vadd.f32 %v2155_v17, %v802_v59  ;;  %v804_v4 = vpop.f32.mrb[53].mxu1 }
 0x17e   :  { %v677_v5 = vpop.f32.mrb[54].mxu0  ;;  %v805_v6 = vpop.f32.mrb[54].mxu1 }
 0x17f   :  { %v884_v7 = vsel %vm832_vm0, %v675_v62, 0.0  ;;  %v996_v10 = vmul.f32 %v675_v62, %v675_v62  ;;  %v1669_v12 = vpack.c.bf16 %v675_v62, %v675_v62  ;;  %v678_v13 = vadd.f32 %v2155_v17, %v677_v5  ;;  %v679_v14 = vpop.f32.mrb[55].mxu0  ;;  %v807_v15 = vpop.f32.mrb[55].mxu1 }
 0x180   :  { %v885_v16 = vadd.f32 %v884_v7, %v883_v50  ;;  %v1701_v18 = vpack.c.bf16 %v2574_v3, %v2574_v3  ;;  %v2595_v34 = vadd.f32 %v2155_v17, %v805_v6 }
 0x181   :  { %v1085_v20 = vsel %vm832_vm0, %v996_v10, 0.0  ;;  %1452 = vst.msk [vmem:[%s2847_s3 + $0x68] sm:$0xf] %vm1425_vm1, %v1669_v12  ;;  %v886_v24 = vsel %vm832_vm0, %v678_v13, 0.0  ;;  %v997_v26 = vmul.f32 %v678_v13, %v678_v13  ;;  %v1670_v27 = vpack.c.bf16 %v678_v13, %v678_v13 }
 0x182   :  { %v1086_v29 = vadd.f32 %v1085_v20, %v1084_v55  ;;  %v887_v33 = vadd.f32 %v886_v24, %v885_v16  ;;  %1484 = vst.msk [vmem:[%s2847_s3 + $0xe8] sm:$0xf] %vm1425_vm1, %v1701_v18  ;;  %v1702_v41 = vpack.c.bf16 %v2595_v34, %v2595_v34 }
 0x183   :  { %v1087_v35 = vsel %vm832_vm0, %v997_v26, 0.0  ;;  %1453 = vst.msk [vmem:[%s2847_s3 + $0x6c] sm:$0xf] %vm1425_vm1, %v1670_v27 }
 0x184   :  { %v1088_v39 = vadd.f32 %v1087_v35, %v1086_v29  ;;  %v682_v40 = vpop.f32.mrb[56].mxu0  ;;  %v810_v42 = vpop.f32.mrb[56].mxu1  ;;  %1485 = vst.msk [vmem:[%s2847_s3 + $0xec] sm:$0xf] %vm1425_vm1, %v1702_v41 }
 0x185   :  { %v683_v43 = vadd.f32 %v2155_v17, %v682_v40  ;;  %v684_v44 = vpop.f32.mrb[57].mxu0  ;;  %v2606_v45 = vadd.f32 %v2155_v17, %v810_v42  ;;  %v812_v48 = vpop.f32.mrb[57].mxu1 }
 0x186   :  { %v685_v49 = vpop.f32.mrb[58].mxu0  ;;  %v813_v50 = vpop.f32.mrb[58].mxu1 }
 0x187   :  { %v888_v54 = vsel %vm832_vm0, %v683_v43, 0.0  ;;  %v998_v55 = vmul.f32 %v683_v43, %v683_v43  ;;  %v1671_v57 = vpack.c.bf16 %v683_v43, %v683_v43  ;;  %v686_v58 = vadd.f32 %v2155_v17, %v685_v49  ;;  %v687_v59 = vpop.f32.mrb[59].mxu0  ;;  %v815_v62 = vpop.f32.mrb[59].mxu1 }
 0x188   :  { %v889_v63 = vadd.f32 %v888_v54, %v887_v33  ;;  %v1703_v4 = vpack.c.bf16 %v2606_v45, %v2606_v45  ;;  %v2627_v14 = vadd.f32 %v2155_v17, %v813_v50  ;;  %v1002_v49 = vmul.f32 %v2159_v22, %v2159_v22 }
 0x189   :  { %v1089_v5 = vsel %vm832_vm0, %v998_v55, 0.0  ;;  %1454 = vst.msk [vmem:[%s2847_s3 + $0x70] sm:$0xf] %vm1425_vm1, %v1671_v57  ;;  %v890_v6 = vsel %vm832_vm0, %v686_v58, 0.0  ;;  %v999_v7 = vmul.f32 %v686_v58, %v686_v58  ;;  %v1672_v10 = vpack.c.bf16 %v686_v58, %v686_v58 }
 0x18a   :  { %v1090_v12 = vadd.f32 %v1089_v5, %v1088_v39  ;;  %v891_v13 = vadd.f32 %v890_v6, %v889_v63  ;;  %1486 = vst.msk [vmem:[%s2847_s3 + $0xf0] sm:$0xf] %vm1425_vm1, %v1703_v4  ;;  %v1704_v20 = vpack.c.bf16 %v2627_v14, %v2627_v14  ;;  %v896_v5 = vsel %vm832_vm0, %v2159_v22, 0.0 }
 0x18b   :  { %v1091_v15 = vsel %vm832_vm0, %v999_v7, 0.0  ;;  %1455 = vst.msk [vmem:[%s2847_s3 + $0x74] sm:$0xf] %vm1425_vm1, %v1672_v10  ;;  %v1003_v6 = vmul.f32 %v2165_v32, %v2165_v32  ;;  %v1004_v22 = vmul.f32 %v2191_v46, %v2191_v46 }
 0x18c   :  { %v1092_v16 = vadd.f32 %v1091_v15, %v1090_v12  ;;  %v690_v18 = vpop.f32.mrb[60].mxu0  ;;  %v818_v24 = vpop.f32.mrb[60].mxu1  ;;  %1487 = vst.msk [vmem:[%s2847_s3 + $0xf4] sm:$0xf] %vm1425_vm1, %v1704_v20 }
 0x18d   :  { %v691_v26 = vadd.f32 %v2155_v17, %v690_v18  ;;  %v692_v27 = vpop.f32.mrb[61].mxu0  ;;  %v2638_v29 = vadd.f32 %v2155_v17, %v818_v24  ;;  %v820_v33 = vpop.f32.mrb[61].mxu1  ;;  %v1099_v20 = vsel %vm832_vm0, %v1003_v6, 0.0  ;;  %v900_v24 = vsel %vm832_vm0, %v2191_v46, 0.0 }
 0x18e   :  { %v693_v35 = vpop.f32.mrb[62].mxu0  ;;  %v821_v39 = vpop.f32.mrb[62].mxu1  ;;  %v1101_v33 = vsel %vm832_vm0, %v1004_v22, 0.0 }
 0x18f   :  { %v892_v40 = vsel %vm832_vm0, %v691_v26, 0.0  ;;  %v1000_v41 = vmul.f32 %v691_v26, %v691_v26  ;;  %v1673_v42 = vpack.c.bf16 %v691_v26, %v691_v26  ;;  %v694_v43 = vadd.f32 %v2155_v17, %v693_v35  ;;  %v695_v44 = vpop.f32.mrb[63].mxu0  ;;  %v823_v48 = vpop.f32.mrb[63].mxu1 }
 0x190   :  { %v893_v50 = vadd.f32 %v892_v40, %v891_v13  ;;  %v1705_v54 = vpack.c.bf16 %v2638_v29, %v2638_v29  ;;  %v2661_v4 = vadd.f32 %v2155_v17, %v821_v39  ;;  %v1097_v13 = vsel %vm832_vm0, %v1002_v49, 0.0 }
 0x191   :  { %v1093_v55 = vsel %vm832_vm0, %v1000_v41, 0.0  ;;  %1456 = vst.msk [vmem:[%s2847_s3 + $0x78] sm:$0xf] %vm1425_vm1, %v1673_v42  ;;  %v894_v57 = vsel %vm832_vm0, %v694_v43, 0.0  ;;  %v1001_v58 = vmul.f32 %v694_v43, %v694_v43  ;;  %v1674_v59 = vpack.c.bf16 %v694_v43, %v694_v43 }
 0x192   :  { %v1094_v62 = vadd.f32 %v1093_v55, %v1092_v16  ;;  %v895_v63 = vadd.f32 %v894_v57, %v893_v50  ;;  %1488 = vst.msk [vmem:[%s2847_s3 + $0xf8] sm:$0xf] %vm1425_vm1, %v1705_v54  ;;  %v898_v17 = vsel %vm832_vm0, %v2165_v32, 0.0  ;;  %v1706_v15 = vpack.c.bf16 %v2661_v4, %v2661_v4 }
 0x193   :  { %v1095_v7 = vsel %vm832_vm0, %v1001_v58, 0.0  ;;  %1457 = vst.msk [vmem:[%s2847_s3 + $0x7c] sm:$0xf] %vm1425_vm1, %v1674_v59  ;;  %v1005_v26 = vmul.f32 %v2208_v0, %v2208_v0  ;;  %v902_v35 = vsel %vm832_vm0, %v2208_v0, 0.0  ;;  %v1006_v39 = vmul.f32 %v2219_v8, %v2219_v8 }
 0x194   :  { %v897_v10 = vadd.f32 %v896_v5, %v895_v63  ;;  %v1096_v12 = vadd.f32 %v1095_v7, %v1094_v62  ;;  %1489 = vst.msk [vmem:[%s2847_s3 + $0xfc] sm:$0xf] %vm1425_vm1, %v1706_v15  ;;  %v904_v42 = vsel %vm832_vm0, %v2219_v8, 0.0  ;;  %v1007_v43 = vmul.f32 %v2240_v28, %v2240_v28 }
 0x195   :  { %v1103_v41 = vsel %vm832_vm0, %v1005_v26, 0.0  ;;  %v1105_v49 = vsel %vm832_vm0, %v1006_v39, 0.0  ;;  %v906_v0 = vsel %vm832_vm0, %v2240_v28, 0.0  ;;  %v1008_v50 = vmul.f32 %v2251_v37, %v2251_v37 }
 0x196   :  { %v899_v16 = vadd.f32 %v898_v17, %v897_v10  ;;  %v1098_v18 = vadd.f32 %v1097_v13, %v1096_v12  ;;  %v1107_v57 = vsel %vm832_vm0, %v1007_v43, 0.0  ;;  %v908_v8 = vsel %vm832_vm0, %v2251_v37, 0.0 }
 0x197   :  { %v1009_v58 = vmul.f32 %v2272_v56, %v2272_v56  ;;  %v1109_v63 = vsel %vm832_vm0, %v1008_v50, 0.0  ;;  %v910_v28 = vsel %vm832_vm0, %v2272_v56, 0.0  ;;  %v1010_v5 = vmul.f32 %v2283_v1, %v2283_v1 }
 0x198   :  { %v901_v32 = vadd.f32 %v900_v24, %v899_v16  ;;  %v1100_v27 = vadd.f32 %v1099_v20, %v1098_v18  ;;  %v912_v37 = vsel %vm832_vm0, %v2283_v1, 0.0  ;;  %v1011_v12 = vmul.f32 %v2304_v21, %v2304_v21 }
 0x199   :  { %v1111_v10 = vsel %vm832_vm0, %v1009_v58, 0.0  ;;  %v1113_v22 = vsel %vm832_vm0, %v1010_v5, 0.0  ;;  %v914_v56 = vsel %vm832_vm0, %v2304_v21, 0.0  ;;  %v1012_v15 = vmul.f32 %v2315_v31, %v2315_v31 }
 0x19a   :  { %v903_v40 = vadd.f32 %v902_v35, %v901_v32  ;;  %v1102_v46 = vadd.f32 %v1101_v33, %v1100_v27  ;;  %v1115_v20 = vsel %vm832_vm0, %v1011_v12, 0.0  ;;  %v916_v1 = vsel %vm832_vm0, %v2315_v31, 0.0 }
 0x19b   :  { %v1013_v24 = vmul.f32 %v2336_v52, %v2336_v52  ;;  %v1117_v27 = vsel %vm832_vm0, %v1012_v15, 0.0  ;;  %v918_v21 = vsel %vm832_vm0, %v2336_v52, 0.0  ;;  %v1014_v33 = vmul.f32 %v2347_v61, %v2347_v61 }
 0x19c   :  { %v905_v44 = vadd.f32 %v904_v42, %v903_v40  ;;  %v1104_v48 = vadd.f32 %v1103_v41, %v1102_v46  ;;  %v920_v31 = vsel %vm832_vm0, %v2347_v61, 0.0  ;;  %v1015_v46 = vmul.f32 %v2368_v19, %v2368_v19 }
 0x19d   :  { %v1119_v40 = vsel %vm832_vm0, %v1013_v24, 0.0  ;;  %v1121_v43 = vsel %vm832_vm0, %v1014_v33, 0.0  ;;  %v922_v52 = vsel %vm832_vm0, %v2368_v19, 0.0  ;;  %v924_v61 = vsel %vm832_vm0, %v2379_v30, 0.0 }
 0x19e   :  { %v907_v54 = vadd.f32 %v906_v0, %v905_v44  ;;  %v1106_v55 = vadd.f32 %v1105_v49, %v1104_v48  ;;  %v1016_v44 = vmul.f32 %v2379_v30, %v2379_v30  ;;  %v1123_v0 = vsel %vm832_vm0, %v1015_v46, 0.0 }
 0x19f   :  { %v1017_v50 = vmul.f32 %v2400_v53, %v2400_v53  ;;  %v926_v19 = vsel %vm832_vm0, %v2400_v53, 0.0  ;;  %v928_v30 = vsel %vm832_vm0, %v2414_v2, 0.0  ;;  %v930_v53 = vsel %vm832_vm0, %v2435_v25, 0.0 }
 0x1a0   :  { %v909_v59 = vadd.f32 %v908_v8, %v907_v54  ;;  %v1108_v62 = vadd.f32 %v1107_v57, %v1106_v55  ;;  %v1125_v57 = vsel %vm832_vm0, %v1016_v44, 0.0  ;;  %v1018_v8 = vmul.f32 %v2414_v2, %v2414_v2 }
 0x1a1   :  { %v932_v2 = vsel %vm832_vm0, %v2446_v38, 0.0  ;;  %v1022_v15 = vmul.f32 %v2478_v9, %v2478_v9  ;;  %v1027_v44 = vmul.f32 %v2563_v51, %v2563_v51 }
 0x1a2   :  { %v911_v6 = vadd.f32 %v910_v28, %v909_v59  ;;  %v1110_v7 = vadd.f32 %v1109_v63, %v1108_v62  ;;  %v1127_v62 = vsel %vm832_vm0, %v1017_v50, 0.0  ;;  %v1019_v63 = vmul.f32 %v2435_v25, %v2435_v25 }
 0x1a3   :  { %v934_v25 = vsel %vm832_vm0, %v2467_v60, 0.0 }
 0x1a4   :  { %v1112_v13 = vadd.f32 %v1111_v10, %v1110_v7  ;;  %v913_v17 = vadd.f32 %v912_v37, %v911_v6  ;;  %v1129_v6 = vsel %vm832_vm0, %v1018_v8, 0.0  ;;  %v1020_v7 = vmul.f32 %v2446_v38, %v2446_v38 }
 0x1a5   :  { %v1131_v12 = vsel %vm832_vm0, %v1019_v63, 0.0  ;;  %v936_v38 = vsel %vm832_vm0, %v2478_v9, 0.0  ;;  %v940_v9 = vsel %vm832_vm0, %v2510_v47, 0.0 }
 0x1a6   :  { %v915_v16 = vadd.f32 %v914_v56, %v913_v17  ;;  %v1114_v18 = vadd.f32 %v1113_v22, %v1112_v13  ;;  %v1021_v13 = vmul.f32 %v2467_v60, %v2467_v60  ;;  %v1133_v56 = vsel %vm832_vm0, %v1020_v7, 0.0 }
 0x1a7   :  { %v938_v60 = vsel %vm832_vm0, %v2499_v36, 0.0  ;;  %v954_v7 = vsel %vm832_vm0, %v2627_v14, 0.0 }
 0x1a8   :  { %v917_v26 = vadd.f32 %v916_v1, %v915_v16  ;;  %v1116_v32 = vadd.f32 %v1115_v20, %v1114_v18  ;;  %v1135_v20 = vsel %vm832_vm0, %v1021_v13, 0.0  ;;  %v1023_v1 = vmul.f32 %v2499_v36, %v2499_v36 }
 0x1a9   :  { %v942_v36 = vsel %vm832_vm0, %v2531_v11, 0.0  ;;  %v1033_v13 = vmul.f32 %v2661_v4, %v2661_v4 }
 0x1aa   :  { %v919_v35 = vadd.f32 %v918_v21, %v917_v26  ;;  %v1118_v39 = vadd.f32 %v1117_v27, %v1116_v32  ;;  %v1137_v32 = vsel %vm832_vm0, %v1022_v15, 0.0  ;;  %v1024_v27 = vmul.f32 %v2510_v47, %v2510_v47 }
 0x1ab   :  { %v944_v47 = vsel %vm832_vm0, %v2542_v23, 0.0 }
 0x1ac   :  { %v921_v41 = vadd.f32 %v920_v31, %v919_v35  ;;  %v1120_v42 = vadd.f32 %v1119_v40, %v1118_v39  ;;  %v1139_v35 = vsel %vm832_vm0, %v1023_v1, 0.0  ;;  %v1025_v39 = vmul.f32 %v2531_v11, %v2531_v11 }
 0x1ad   :  { %v1141_v46 = vsel %vm832_vm0, %v1024_v27, 0.0  ;;  %v946_v11 = vsel %vm832_vm0, %v2563_v51, 0.0  ;;  %v950_v51 = vsel %vm832_vm0, %v2595_v34, 0.0  ;;  %v831_v27 = vld [vmem:[%s2848_s4] sm:$0x1] }
 0x1ae   :  { %v923_v48 = vadd.f32 %v922_v52, %v921_v41  ;;  %v1122_v49 = vadd.f32 %v1121_v43, %v1120_v42  ;;  %v1026_v41 = vmul.f32 %v2542_v23, %v2542_v23  ;;  %v1143_v52 = vsel %vm832_vm0, %v1025_v39, 0.0 }
 0x1af   :  { %v948_v23 = vsel %vm832_vm0, %v2574_v3, 0.0 }
 0x1b0   :  { %v925_v54 = vadd.f32 %v924_v61, %v923_v48  ;;  %v1124_v55 = vadd.f32 %v1123_v0, %v1122_v49  ;;  %v1145_v0 = vsel %vm832_vm0, %v1026_v41, 0.0  ;;  %v1028_v61 = vmul.f32 %v2574_v3, %v2574_v3 }
 0x1b1   :  { %v952_v3 = vsel %vm832_vm0, %v2606_v45, 0.0 }
 0x1b2   :  { %v927_v58 = vadd.f32 %v926_v19, %v925_v54  ;;  %v1126_v59 = vadd.f32 %v1125_v57, %v1124_v55  ;;  %v1147_v55 = vsel %vm832_vm0, %v1027_v44, 0.0  ;;  %v1029_v57 = vmul.f32 %v2595_v34, %v2595_v34 }
 0x1b4   :  { %v929_v28 = vadd.f32 %v928_v30, %v927_v58  ;;  %v1128_v5 = vadd.f32 %v1127_v62, %v1126_v59  ;;  %v1149_v58 = vsel %vm832_vm0, %v1028_v61, 0.0  ;;  %v1030_v59 = vmul.f32 %v2606_v45, %v2606_v45 }
 0x1b5   :  { %v1151_v63 = vsel %vm832_vm0, %v1029_v57, 0.0 }
 0x1b6   :  { %v1130_v10 = vadd.f32 %v1129_v6, %v1128_v5  ;;  %v931_v37 = vadd.f32 %v930_v53, %v929_v28  ;;  %v1031_v28 = vmul.f32 %v2627_v14, %v2627_v14  ;;  %v1032_v5 = vmul.f32 %v2638_v29, %v2638_v29 }
 0x1b7   :  { %v1153_v34 = vsel %vm832_vm0, %v1030_v59, 0.0  ;;  %v1159_v14 = vsel %vm832_vm0, %v1033_v13, 0.0 }
 0x1b8   :  { %v1132_v17 = vadd.f32 %v1131_v12, %v1130_v10  ;;  %v933_v22 = vadd.f32 %v932_v2, %v931_v37  ;;  %v956_v10 = vsel %vm832_vm0, %v2638_v29, 0.0  ;;  %v1155_v45 = vsel %vm832_vm0, %v1031_v28, 0.0 }
 0x1b9   :  { %v1157_v2 = vsel %vm832_vm0, %v1032_v5, 0.0 }
 0x1ba   :  { %v1134_v16 = vadd.f32 %v1133_v56, %v1132_v17  ;;  %v935_v18 = vadd.f32 %v934_v25, %v933_v22  ;;  %v958_v56 = vsel %vm832_vm0, %v2661_v4, 0.0 }
 0x1bc   :  { %v1136_v24 = vadd.f32 %v1135_v20, %v1134_v16  ;;  %v937_v26 = vadd.f32 %v936_v38, %v935_v18 }
 0x1be   :  { %v1138_v21 = vadd.f32 %v1137_v32, %v1136_v24  ;;  %v939_v33 = vadd.f32 %v938_v60, %v937_v26 }
 0x1c0   :  { %v1140_v40 = vadd.f32 %v1139_v35, %v1138_v21  ;;  %v941_v31 = vadd.f32 %v940_v9, %v939_v33  ;;  %v969_v33 = vld [vmem:[%s2848_s4 + $0x1] sm:$0x1] }
 0x1c2   :  { %v1142_v42 = vadd.f32 %v1141_v46, %v1140_v40  ;;  %v943_v43 = vadd.f32 %v942_v36, %v941_v31 }
 0x1c4   :  { %v1144_v48 = vadd.f32 %v1143_v52, %v1142_v42  ;;  %v945_v49 = vadd.f32 %v944_v47, %v943_v43 }
 0x1c6   :  { %v1146_v50 = vadd.f32 %v1145_v0, %v1144_v48  ;;  %v947_v54 = vadd.f32 %v946_v11, %v945_v49 }
 0x1c8   :  { %v1148_v19 = vadd.f32 %v1147_v55, %v1146_v50  ;;  %v949_v8 = vadd.f32 %v948_v23, %v947_v54 }
 0x1ca   :  { %v1150_v62 = vadd.f32 %v1149_v58, %v1148_v19  ;;  %v951_v30 = vadd.f32 %v950_v51, %v949_v8 }
 0x1cc   :  { %v1152_v6 = vadd.f32 %v1151_v63, %v1150_v62  ;;  %v953_v53 = vadd.f32 %v952_v3, %v951_v30 }
 0x1ce   :  { %v1154_v37 = vadd.f32 %v1153_v34, %v1152_v6  ;;  %v955_v12 = vadd.f32 %v954_v7, %v953_v53 }
 0x1d0   :  { %v1156_v17 = vadd.f32 %v1155_v45, %v1154_v37  ;;  %v957_v22 = vadd.f32 %v956_v10, %v955_v12 }
 0x1d2   :  { %v1158_v25 = vadd.f32 %v1157_v2, %v1156_v17  ;;  %v959_v15 = vadd.f32 %v958_v56, %v957_v22 }
 0x1d4   :  { %v960_v16 = vrot.slane %v959_v15, 4  ;;  %v1160_v29 = vadd.f32 %v1159_v14, %v1158_v25 }
 0x1d6   :  { %v961_v18 = vadd.f32 %v960_v16, %v959_v15  ;;  %v1161_v20 = vrot.slane %v1160_v29, 4 }
 0x1d8   :  { %v962_v38 = vrot.slane %v961_v18, 2  ;;  %v1162_v1 = vadd.f32 %v1161_v20, %v1160_v29 }
 0x1da   :  { %v963_v24 = vadd.f32 %v962_v38, %v961_v18  ;;  %v1163_v26 = vrot.slane %v1162_v1, 2 }
 0x1dc   :  { %v964_v32 = vrot.slane %v963_v24, 1  ;;  %v1164_v60 = vadd.f32 %v1163_v26, %v1162_v1 }
 0x1de   :  { %v965_v21 = vadd.f32 %v964_v32, %v963_v24  ;;  %v1165_v4 = vrot.slane %v1164_v60, 1 }
 0x1e0   :  { %v966_v35 = vadd.f32 %v965_v21, %v831_v27  ;;  %v1166_v9 = vadd.f32 %v1165_v4, %v1164_v60 }
 0x1e2   :  { %968 = vst.msk [vmem:[%s2848_s4] sm:$0x1] %vm967_vm3, %v966_v35  ;;  %v1167_v39 = vadd.f32 %v1166_v9, %v969_v33 }
 0x1e4   :  { %1168 = vst.msk [vmem:[%s2848_s4 + $0x1] sm:$0x1] %vm967_vm3, %v1167_v39 }

// kernel: tile.33
= control target key start
LH: loop header
LB: loop body
LE: loop exit
PB: predicated region body
PF: predicated region fallthrough
CT: control target
= control target key end

     0   :  { %s40_s0 = inlined_call_operand.vmem [shape: f32[16], index: 0, kind: input, shape index: {}]   ;;  %s41_s1 = inlined_call_operand.vmem [shape: f32[25,16], index: 1, kind: output, shape index: {}]  }
   0x1   :  { %v4_v0 = vld [vmem:[%s40_s0] ss:$0 sm:$0xff] }
   0x2   :  { %5 = vst [vmem:[%s41_s1] sm:$0xff] %v4_v0  ;;  %12 = vst [vmem:[%s41_s1 + $0x8] sm:$0xff] %v4_v0 }
   0x3   :  { %13 = vst [vmem:[%s41_s1 + $0x10] sm:$0xff] %v4_v0  ;;  %14 = vst [vmem:[%s41_s1 + $0x18] sm:$0xff] %v4_v0 }

// kernel: tile.34
= control target key start
LH: loop header
LB: loop body
LE: loop exit
PB: predicated region body
PF: predicated region fallthrough
CT: control target
= control target key end

     0   :  { %s67_s8 = smov 112   ;;  %s68_s11 = smov 80   ;;  %vm3_vm0 = vcmask 130048   ;;  %vm9_vm1 = vcmask 1048448   ;;  %vm15_vm2 = vcmask 917248   ;;  %vm21_vm3 = vcmask 786048   ;;  %s111_s0 = inlined_call_operand.vmem [shape: f32[25,16], index: 0, kind: input, shape index: {}]   ;;  %s112_s1 = inlined_call_operand.vmem [shape: f32[400], index: 1, kind: output, shape index: {}]  }
   0x1   :  { %v53_v0 = vld [vmem:[%s111_s0 + $0x7] ss:$8 sm:$0x7]   ;;  %v55_v1 = vld [vmem:[%s111_s0 + $0x5] ss:$8 sm:$0x7]  }
   0x2   :  { %7 = vrot.lane.b32.xlu0 %v53_v0, %s67_s8  ;;  %19 = vrot.lane.b32.xlu1 %v55_v1, %s68_s11  ;;  %v54_v2 = vld [vmem:[%s111_s0 + $0x6] ss:$8 sm:$0x7]   ;;  %v56_v3 = vld [vmem:[%s111_s0 + $0x4] ss:$8 sm:$0x7]  }
   0x3   :  { %s69_s16 = smov 96   ;;  %v2_v4 = vld [vmem:[%s111_s0] ss:$8 sm:$0xf]   ;;  %s70_s19 = smov 64   ;;  %vm27_vm4 = vcmask 654848  }
   0x4   :  { %v57_v5 = vld [vmem:[%s111_s0 + $0x3] ss:$8 sm:$0x7]   ;;  %4 = vst.msk [vmem:[#allocation0] sm:$0xf] %vm3_vm0, %v2_v4   ;;  %s71_s24 = smov 48  }
   0x5   :  { %v58_v6 = vld [vmem:[%s111_s0 + $0x2] ss:$8 sm:$0x7]   ;;  %s72_s25 = smov 32   ;;  %vm33_vm5 = vcmask 523648   ;;  %vm39_vm6 = vcmask 392448  }
   0x6   :  { %13 = vrot.lane.b32.xlu0 %v54_v2, %s69_s16  ;;  %25 = vrot.lane.b32.xlu1 %v56_v3, %s70_s19  ;;  %v59_v7 = vld [vmem:[%s111_s0 + $0x1] ss:$8 sm:$0x7]   ;;  %s73_s0 = smov 16   ;;  %vm45_vm7 = vcmask 261248  }
   0xa   :  { %31 = vrot.lane.b32.xlu0 %v57_v5, %s71_s24  ;;  %37 = vrot.lane.b32.xlu1 %v58_v6, %s72_s25 }
   0xe   :  { %43 = vrot.lane.b32.xlu0 %v59_v7, %s73_s0 }
  0x74   :  { %v8_v8 = vpop.permute.xlu0 %7   ;;  %v20_v9 = vpop.permute.xlu1 %19  }
  0x75   :  { %10 = vst.msk [vmem:[#allocation0] sm:$0x7] %vm9_vm1, %v8_v8  }
  0x78   :  { %v14_v10 = vpop.permute.xlu0 %13   ;;  %v26_v11 = vpop.permute.xlu1 %25  }
  0x79   :  { %16 = vst.msk [vmem:[#allocation0] sm:$0x7] %vm15_vm2, %v14_v10  }
  0x7a   :  { %22 = vst.msk [vmem:[#allocation0] sm:$0x7] %vm21_vm3, %v20_v9  }
  0x7b   :  { %28 = vst.msk [vmem:[#allocation0] sm:$0x7] %vm27_vm4, %v26_v11  }
  0x7c   :  { %v32_v12 = vpop.permute.xlu0 %31   ;;  %v38_v13 = vpop.permute.xlu1 %37  }
  0x7d   :  { %34 = vst.msk [vmem:[#allocation0] sm:$0x7] %vm33_vm5, %v32_v12  }
  0x7e   :  { %40 = vst.msk [vmem:[#allocation0] sm:$0x7] %vm39_vm6, %v38_v13  }
  0x80   :  { %v44_v14 = vpop.permute.xlu0 %43  }
  0x81   :  { %46 = vst.msk [vmem:[#allocation0] sm:$0x7] %vm45_vm7, %v44_v14  }
  0x88   :  { %v50_v15 = vld [vmem:[#allocation0] sm:$0xf] }
  0x89   :  { %52 = vst [vmem:[%s112_s1] sm:$0xf] %v50_v15 }

// kernel: _lambda_.7
= control target key start
LH: loop header
LB: loop body
LE: loop exit
PB: predicated region body
PF: predicated region fallthrough
CT: control target
= control target key end

     0   :  { %v121_v23 = vlaneseq  ;;  %s1913_s1 = inlined_call_operand.vmem [shape: bf16[512,32], index: 1, kind: input, shape index: {}]   ;;  %s1914_s0 = inlined_call_operand.vmem [shape: bf16[128,512], index: 0, kind: input, shape index: {}]   ;;  %s1915_s3 = inlined_call_operand.vmem [shape: f32[1,512], index: 3, kind: input, shape index: {}]   ;;  %s1916_s4 = inlined_call_operand.vmem [shape: f32[1,512], index: 4, kind: input, shape index: {}]   ;;  %s1917_s6 = inlined_call_operand.vmem [shape: f32[2,32], index: 6, kind: output, shape index: {1}]   ;;  %s1918_s2 = inlined_call_operand.vmem [shape: f32[1,32], index: 2, kind: input, shape index: {}]   ;;  %s1919_s5 = inlined_call_operand.vmem [shape: bf16[128,32], index: 5, kind: output, shape index: {0}]  }
   0x1   :  { %v1359_v0 = vld [vmem:[%s1913_s1 + $0x40] sm:$0xff]   ;;  %v1363_v4 = vld [vmem:[%s1913_s1 + $0x48] sm:$0xff]   ;;  %v1367_v8 = vld [vmem:[%s1913_s1 + $0x50] sm:$0xff]  }
   0x2   :  { %v1360_v1 = vld [vmem:[%s1913_s1 + $0xc0] sm:$0xff]   ;;  %1230 = vmatprep.subr.bf16.mxu0 %v1359_v0  ;;  %v1364_v5 = vld [vmem:[%s1913_s1 + $0xc8] sm:$0xff]   ;;  %v1368_v9 = vld [vmem:[%s1913_s1 + $0xd0] sm:$0xff]   ;;  %v122_v28 = vshrl.u32 %v121_v23, 7 }
   0x3   :  { %v1361_v2 = vld [vmem:[%s1913_s1] sm:$0xff]   ;;  %1294 = vmatprep.subr.bf16.mxu1 %v1360_v1  ;;  %v1365_v6 = vld [vmem:[%s1913_s1 + $0x8] sm:$0xff]   ;;  %v1369_v10 = vld [vmem:[%s1913_s1 + $0x10] sm:$0xff]  }
   0x4   :  { %v1362_v3 = vld [vmem:[%s1913_s1 + $0x80] sm:$0xff]   ;;  %1231 = vmatpush3.bf16.msra.mxu0 %v1361_v2  ;;  %v1366_v7 = vld [vmem:[%s1913_s1 + $0x88] sm:$0xff]   ;;  %v1370_v11 = vld [vmem:[%s1913_s1 + $0x90] sm:$0xff]   ;;  %v127_v33 = vsub.s32 1, %v122_v28  ;;  %v135_v35 = vsub.s32 3, %v122_v28  ;;  %v123_v39 = vsub.s32 0, %v122_v28 }
   0x5   :  { %1295 = vmatpush3.bf16.msra.mxu1 %v1362_v3  ;;  %1232 = vmatprep.subr.bf16.mxu0 %v1363_v4  ;;  %v1371_v12 = vld [vmem:[%s1913_s1 + $0x58] sm:$0xff]   ;;  %v1375_v16 = vld [vmem:[%s1913_s1 + $0x60] sm:$0xff]   ;;  %v1379_v20 = vld [vmem:[%s1913_s1 + $0x68] sm:$0xff]   ;;  %v131_v40 = vsub.s32 2, %v122_v28 }
   0x6   :  { %1296 = vmatprep.subr.bf16.mxu1 %v1364_v5  ;;  %v1372_v13 = vld [vmem:[%s1913_s1 + $0xd8] sm:$0xff]   ;;  %v1376_v17 = vld [vmem:[%s1913_s1 + $0xe0] sm:$0xff]   ;;  %v1380_v21 = vld [vmem:[%s1913_s1 + $0xe8] sm:$0xff]  }
   0x7   :  { %v1373_v14 = vld [vmem:[%s1913_s1 + $0x18] sm:$0xff]   ;;  %v1377_v18 = vld [vmem:[%s1913_s1 + $0x20] sm:$0xff]   ;;  %v1381_v22 = vld [vmem:[%s1913_s1 + $0x28] sm:$0xff]  }
   0x8   :  { %1233 = vmatpush3.bf16.msra.mxu0 %v1365_v6  ;;  %v1374_v15 = vld [vmem:[%s1913_s1 + $0x98] sm:$0xff]   ;;  %v1378_v19 = vld [vmem:[%s1913_s1 + $0xa0] sm:$0xff]   ;;  %v1382_v24 = vld [vmem:[%s1913_s1 + $0xa8] sm:$0xff]  }
   0x9   :  { %1297 = vmatpush3.bf16.msra.mxu1 %v1366_v7  ;;  %1234 = vmatprep.subr.bf16.mxu0 %v1367_v8  ;;  %v1383_v25 = vld [vmem:[%s1913_s1 + $0x70] sm:$0xff]   ;;  %v1387_v30 = vld [vmem:[%s1913_s1 + $0x78] sm:$0xff]   ;;  %v23_v36 = vld [vmem:[%s1914_s0] sm:$0xff] }
   0xa   :  { %1298 = vmatprep.subr.bf16.mxu1 %v1368_v9  ;;  %v1384_v26 = vld [vmem:[%s1913_s1 + $0xf0] sm:$0xff]   ;;  %v1388_v31 = vld [vmem:[%s1913_s1 + $0xf8] sm:$0xff]   ;;  %v119_v38 = vld [vmem:[%s1915_s3] sm:$0xf]  ;;  %v55_v41 = vunpack.c.l.bf16 %v23_v36  ;;  %v56_v42 = vunpack.c.h.bf16 %v23_v36 }
   0xb   :  { %v1385_v27 = vld [vmem:[%s1913_s1 + $0x30] sm:$0xff]   ;;  %v1389_v32 = vld [vmem:[%s1913_s1 + $0x38] sm:$0xff]   ;;  %v205_v45 = vld [vmem:[%s1916_s4] sm:$0xf]  ;;  %v1541_v48 = vrot.slane %v119_v38, %v127_v33  ;;  %v1545_v54 = vrot.slane %v119_v38, %v135_v35  ;;  %v1551_v58 = vrot.slane %v119_v38, %v123_v39  ;;  %v1557_v62 = vrot.slane %v119_v38, %v131_v40 }
   0xc   :  { %1235 = vmatpush3.bf16.msra.mxu0 %v1369_v10  ;;  %v1386_v29 = vld [vmem:[%s1913_s1 + $0xb0] sm:$0xff]   ;;  %v1390_v34 = vld [vmem:[%s1913_s1 + $0xb8] sm:$0xff]   ;;  %v24_v46 = vld [vmem:[%s1914_s0 + $0x8] sm:$0xff]  ;;  %v1543_v49 = vrot.slane %v205_v45, %v127_v33  ;;  %v1547_v55 = vrot.slane %v205_v45, %v135_v35  ;;  %v1553_v59 = vrot.slane %v205_v45, %v123_v39  ;;  %v1559_v63 = vrot.slane %v205_v45, %v131_v40 }
   0xd   :  { %1299 = vmatpush3.bf16.msra.mxu1 %v1370_v11  ;;  %1236 = vmatprep.subr.bf16.mxu0 %v1371_v12  ;;  %v25_v37 = vld [vmem:[%s1914_s0 + $0x10] sm:$0xff]  ;;  %v26_v47 = vld [vmem:[%s1914_s0 + $0x18] sm:$0xff]  ;;  %v57_v50 = vunpack.c.l.bf16 %v24_v46  ;;  %v58_v51 = vunpack.c.h.bf16 %v24_v46  ;;  %v142_v56 = vmul.f32 %v1541_v48, %v56_v42  ;;  %v141_v2 = vmul.f32 %v1551_v58, %v55_v41 }
   0xe   :  { %1300 = vmatprep.subr.bf16.mxu1 %v1372_v13  ;;  %v59_v43 = vunpack.c.l.bf16 %v25_v37  ;;  %v60_v44 = vunpack.c.h.bf16 %v25_v37  ;;  %v61_v52 = vunpack.c.l.bf16 %v26_v47  ;;  %v62_v53 = vunpack.c.h.bf16 %v26_v47  ;;  %v30_v28 = vld [vmem:[%s1914_s0 + $0x38] sm:$0xff] }
   0xf   :  { %v144_v60 = vmul.f32 %v1545_v54, %v58_v51  ;;  %v228_v0 = vadd.f32 %v1543_v49, %v142_v56  ;;  %v143_v6 = vmul.f32 %v1557_v62, %v57_v50  ;;  %v70_v39 = vunpack.c.h.bf16 %v30_v28 }
  0x10   :  { %1237 = vmatpush3.bf16.msra.mxu0 %v1373_v14  ;;  %v146_v57 = vmul.f32 %v1541_v48, %v60_v44  ;;  %v148_v61 = vmul.f32 %v1545_v54, %v62_v53  ;;  %v145_v3 = vmul.f32 %v1551_v58, %v59_v43  ;;  %v147_v7 = vmul.f32 %v1557_v62, %v61_v52 }
  0x11   :  { %1301 = vmatpush3.bf16.msra.mxu1 %v1374_v15  ;;  %1238 = vmatprep.subr.bf16.mxu0 %v1375_v16  ;;  %v230_v4 = vadd.f32 %v1547_v55, %v144_v60  ;;  %vm292_vm0 = vcmp.ge.f32.partialorder %v228_v0, 0.0  ;;  %v356_v8 = vmul.f32 0.2, %v228_v0  ;;  %v227_v14 = vadd.f32 %v1553_v59, %v141_v2 }
  0x12   :  { %1302 = vmatprep.subr.bf16.mxu1 %v1376_v17  ;;  %v232_v1 = vadd.f32 %v1543_v49, %v146_v57  ;;  %v234_v5 = vadd.f32 %v1547_v55, %v148_v61  ;;  %v231_v15 = vadd.f32 %v1553_v59, %v145_v3  ;;  %v156_v47 = vmul.f32 %v1545_v54, %v70_v39 }
  0x13   :  { %vm294_vm2 = vcmp.ge.f32.partialorder %v230_v4, 0.0  ;;  %v358_v10 = vmul.f32 0.2, %v230_v4  ;;  %v420_v12 = vsel %vm292_vm0, %v228_v0, %v356_v8  ;;  %vm291_vm4 = vcmp.ge.f32.partialorder %v227_v14, 0.0 }
  0x14   :  { %1239 = vmatpush3.bf16.msra.mxu0 %v1377_v18  ;;  %vm296_vm1 = vcmp.ge.f32.partialorder %v232_v1, 0.0  ;;  %v360_v9 = vmul.f32 0.2, %v232_v1  ;;  %vm298_vm3 = vcmp.ge.f32.partialorder %v234_v5, 0.0  ;;  %v362_v11 = vmul.f32 0.2, %v234_v5 }
  0x15   :  { %1303 = vmatpush3.bf16.msra.mxu1 %v1378_v19  ;;  %1240 = vmatprep.subr.bf16.mxu0 %v1379_v20  ;;  %v422_v17 = vsel %vm294_vm2, %v230_v4, %v358_v10  ;;  %v229_v19 = vadd.f32 %v1559_v63, %v143_v6  ;;  %v27_v20 = vld [vmem:[%s1914_s0 + $0x20] sm:$0xff]  ;;  %vm295_vm5 = vcmp.ge.f32.partialorder %v231_v15, 0.0  ;;  %v242_v60 = vadd.f32 %v1547_v55, %v156_v47 }
  0x16   :  { %1304 = vmatprep.subr.bf16.mxu1 %v1380_v21  ;;  %v424_v13 = vsel %vm296_vm1, %v232_v1, %v360_v9  ;;  %v426_v18 = vsel %vm298_vm3, %v234_v5, %v362_v11  ;;  %v29_v21 = vld [vmem:[%s1914_s0 + $0x30] sm:$0xff]  ;;  %v63_v42 = vunpack.c.l.bf16 %v27_v20  ;;  %v69_v4 = vunpack.c.l.bf16 %v30_v28  ;;  %v31_v5 = vld [vmem:[%s1914_s0 + $0x40] sm:$0xff] }
  0x17   :  { %v484_v16 = vpack.c.bf16 %v424_v13, %v420_v12  ;;  %v486_v23 = vpack.c.bf16 %v426_v18, %v422_v17  ;;  %vm293_vm6 = vcmp.ge.f32.partialorder %v229_v19, 0.0  ;;  %v67_v43 = vunpack.c.l.bf16 %v29_v21  ;;  %v33_v9 = vld [vmem:[%s1914_s0 + $0x50] sm:$0xff]  ;;  %v34_v17 = vld [vmem:[%s1914_s0 + $0x58] sm:$0xff] }
  0x18   :  { %1241 = vmatpush3.bf16.msra.mxu0 %v1381_v22  ;;  %v1581_v22 = vld [vmem:[%s1914_s0 + $0x28] sm:$0xff]  ;;  %v149_v51 = vmul.f32 %v1551_v58, %v63_v42  ;;  %vm306_vm11 = vcmp.ge.f32.partialorder %v242_v60, 0.0  ;;  %v78_v28 = vunpack.c.h.bf16 %v34_v17 }
  0x19   :  { %1305 = vmatpush3.bf16.msra.mxu1 %v1382_v24  ;;  %1242 = vmatprep.subr.bf16.mxu0 %v1383_v25  ;;  %v355_v24 = vmul.f32 0.2, %v227_v14  ;;  %v359_v25 = vmul.f32 0.2, %v231_v15  ;;  %v153_v52 = vmul.f32 %v1551_v58, %v67_v43  ;;  %v65_v53 = vunpack.c.l.bf16 %v1581_v22 }
  0x1a   :  { %1306 = vmatprep.subr.bf16.mxu1 %v1384_v26  ;;  %810 = vmatprep.mubr.bf16.mxu0 %v484_v16  ;;  %v233_v26 = vadd.f32 %v1559_v63, %v147_v7  ;;  %v235_v0 = vadd.f32 %v1553_v59, %v149_v51  ;;  %v370_v7 = vmul.f32 0.2, %v242_v60  ;;  %v32_v16 = vld [vmem:[%s1914_s0 + $0x48] sm:$0xff]  ;;  %v77_v51 = vunpack.c.l.bf16 %v34_v17 }
  0x1b   :  { %907 = vmatprep.mubr.bf16.mxu1 %v486_v23  ;;  %v423_v33 = vsel %vm295_vm5, %v231_v15, %v359_v25  ;;  %v239_v3 = vadd.f32 %v1553_v59, %v153_v52  ;;  %v151_v13 = vmul.f32 %v1557_v62, %v65_v53  ;;  %v72_v15 = vunpack.c.h.bf16 %v31_v5 }
  0x1c   :  { %1243 = vmatpush3.bf16.msra.mxu0 %v1385_v27  ;;  %v357_v27 = vmul.f32 0.2, %v229_v19  ;;  %vm297_vm7 = vcmp.ge.f32.partialorder %v233_v26, 0.0  ;;  %vm299_vm12 = vcmp.ge.f32.partialorder %v235_v0, 0.0  ;;  %v363_v10 = vmul.f32 0.2, %v235_v0 }
  0x1d   :  { %1307 = vmatpush3.bf16.msra.mxu1 %v1386_v29  ;;  %1244 = vmatprep.subr.bf16.mxu0 %v1387_v30  ;;  %v419_v29 = vsel %vm291_vm4, %v227_v14, %v355_v24  ;;  %v64_v30 = vunpack.c.h.bf16 %v27_v20  ;;  %vm303_vm13 = vcmp.ge.f32.partialorder %v239_v3, 0.0  ;;  %v367_v11 = vmul.f32 0.2, %v239_v3 }
  0x1e   :  { %1308 = vmatprep.subr.bf16.mxu1 %v1388_v31  ;;  %v68_v31 = vunpack.c.h.bf16 %v29_v21  ;;  %v421_v35 = vsel %vm293_vm6, %v229_v19, %v357_v27  ;;  %v483_v36 = vpack.c.bf16 %v423_v33, %v419_v29  ;;  %v434_v12 = vsel %vm306_vm11, %v242_v60, %v370_v7 }
  0x1f   :  { %v150_v37 = vmul.f32 %v1541_v48, %v64_v30  ;;  %v155_v14 = vmul.f32 %v1557_v62, %v69_v4  ;;  %v427_v19 = vsel %vm299_vm12, %v235_v0, %v363_v10  ;;  %v431_v20 = vsel %vm303_vm13, %v239_v3, %v367_v11  ;;  %v37_v4 = vld [vmem:[%s1914_s0 + $0x70] sm:$0xff] }
  0x20   :  { %1245 = vmatpush3.bf16.msra.mxu0 %v1389_v32  ;;  %v66_v32 = vunpack.c.h.bf16 %v1581_v22  ;;  %v154_v38 = vmul.f32 %v1541_v48, %v68_v31  ;;  %v76_v21 = vunpack.c.h.bf16 %v33_v9  ;;  %v487_v22 = vpack.c.bf16 %v431_v20, %v427_v19 }
  0x21   :  { %1309 = vmatpush3.bf16.msra.mxu1 %v1390_v34  ;;  %v361_v34 = vmul.f32 0.2, %v233_v26  ;;  %v236_v45 = vadd.f32 %v1543_v49, %v150_v37  ;;  %v237_v23 = vadd.f32 %v1559_v63, %v151_v13  ;;  %v241_v24 = vadd.f32 %v1559_v63, %v155_v14  ;;  %v38_v13 = vld [vmem:[%s1914_s0 + $0x78] sm:$0xff] }
  0x22   :  { %v152_v41 = vmul.f32 %v1545_v54, %v66_v32  ;;  %v240_v46 = vadd.f32 %v1543_v49, %v154_v38  ;;  %v158_v25 = vmul.f32 %v1541_v48, %v72_v15  ;;  %v74_v27 = vunpack.c.h.bf16 %v32_v16 }
  0x23   :  { %v425_v40 = vsel %vm297_vm7, %v233_v26, %v361_v34  ;;  %811 = vmatmul.mubr.bf16.vlgmr.msra.gmra.mrb[0].mxu0 %v483_v36  ;;  %vm300_vm8 = vcmp.ge.f32.partialorder %v236_v45, 0.0  ;;  %v364_v56 = vmul.f32 0.2, %v236_v45  ;;  %v162_v26 = vmul.f32 %v1541_v48, %v76_v21 }
  0x24   :  { %v485_v44 = vpack.c.bf16 %v425_v40, %v421_v35  ;;  %v238_v50 = vadd.f32 %v1547_v55, %v152_v41  ;;  %vm304_vm9 = vcmp.ge.f32.partialorder %v240_v46, 0.0  ;;  %v368_v57 = vmul.f32 0.2, %v240_v46 }
  0x25   :  { %v428_v1 = vsel %vm300_vm8, %v236_v45, %v364_v56  ;;  %v71_v29 = vunpack.c.l.bf16 %v31_v5  ;;  %vm301_vm14 = vcmp.ge.f32.partialorder %v237_v23, 0.0  ;;  %vm305_vm15 = vcmp.ge.f32.partialorder %v241_v24, 0.0  ;;  %v35_v56 = vld [vmem:[%s1914_s0 + $0x60] sm:$0xff]  ;;  %v1640_v5 = vld [vmem:[%s1914_s0 + $0x68] sm:$0xff] }
  0x26   :  { %908 = vmatmul.mubr.bf16.vlgmr.msra.gmra.mrb[0].mxu1 %v485_v44  ;;  %vm302_vm10 = vcmp.ge.f32.partialorder %v238_v50, 0.0  ;;  %v366_v61 = vmul.f32 0.2, %v238_v50  ;;  %v432_v2 = vsel %vm304_vm9, %v240_v46, %v368_v57  ;;  %v365_v30 = vmul.f32 0.2, %v237_v23 }
  0x27   :  { %v488_v6 = vpack.c.bf16 %v432_v2, %v428_v1  ;;  %v369_v31 = vmul.f32 0.2, %v241_v24  ;;  %v244_v32 = vadd.f32 %v1543_v49, %v158_v25  ;;  %v248_v33 = vadd.f32 %v1543_v49, %v162_v26 }
  0x28   :  { %v430_v8 = vsel %vm302_vm10, %v238_v50, %v366_v61  ;;  %v160_v34 = vmul.f32 %v1545_v54, %v74_v27  ;;  %v164_v35 = vmul.f32 %v1545_v54, %v78_v28  ;;  %v429_v36 = vsel %vm301_vm14, %v237_v23, %v365_v30 }
  0x29   :  { %818 = vmatprep.mubr.bf16.mxu0 %v488_v6  ;;  %v490_v18 = vpack.c.bf16 %v434_v12, %v430_v8  ;;  %v433_v37 = vsel %vm305_vm15, %v241_v24, %v369_v31  ;;  %v75_v38 = vunpack.c.l.bf16 %v33_v9  ;;  %v157_v39 = vmul.f32 %v1551_v58, %v71_v29 }
  0x2a   :  { %v489_v40 = vpack.c.bf16 %v433_v37, %v429_v36  ;;  %vm308_vm0 = vcmp.ge.f32.partialorder %v244_v32, 0.0  ;;  %vm312_vm1 = vcmp.ge.f32.partialorder %v248_v33, 0.0  ;;  %v372_v41 = vmul.f32 0.2, %v244_v32 }
  0x2b   :  { %915 = vmatprep.mubr.bf16.mxu1 %v490_v18  ;;  %819 = vmatmul.mubr.bf16.gmra.mrb[4].mxu0 %v487_v22  ;;  %v376_v42 = vmul.f32 0.2, %v248_v33  ;;  %v246_v43 = vadd.f32 %v1547_v55, %v160_v34  ;;  %v250_v44 = vadd.f32 %v1547_v55, %v164_v35  ;;  %v161_v45 = vmul.f32 %v1551_v58, %v75_v38 }
  0x2c   :  { %v436_v46 = vsel %vm308_vm0, %v244_v32, %v372_v41  ;;  %v243_v47 = vadd.f32 %v1553_v59, %v157_v39  ;;  %v73_v50 = vunpack.c.l.bf16 %v32_v16  ;;  %v163_v3 = vmul.f32 %v1557_v62, %v77_v51  ;;  %v41_v51 = vld [vmem:[%s1914_s0 + $0x90] sm:$0xff] }
  0x2d   :  { %v440_v52 = vsel %vm312_vm1, %v248_v33, %v376_v42  ;;  %vm310_vm2 = vcmp.ge.f32.partialorder %v246_v43, 0.0  ;;  %vm314_vm3 = vcmp.ge.f32.partialorder %v250_v44, 0.0  ;;  %v374_v53 = vmul.f32 0.2, %v246_v43 }
  0x2e   :  { %916 = vmatmul.mubr.bf16.gmra.mrb[4].mxu1 %v489_v40  ;;  %v492_v57 = vpack.c.bf16 %v440_v52, %v436_v46  ;;  %v378_v60 = vmul.f32 0.2, %v250_v44  ;;  %v247_v61 = vadd.f32 %v1553_v59, %v161_v45  ;;  %vm307_vm4 = vcmp.ge.f32.partialorder %v243_v47, 0.0  ;;  %v39_v45 = vld [vmem:[%s1914_s0 + $0x80] sm:$0xff] }
  0x2f   :  { %v438_v0 = vsel %vm310_vm2, %v246_v43, %v374_v53  ;;  %v371_v1 = vmul.f32 0.2, %v243_v47  ;;  %v159_v2 = vmul.f32 %v1557_v62, %v73_v50  ;;  %v80_v8 = vunpack.c.h.bf16 %v35_v56 }
  0x30   :  { %826 = vmatprep.mubr.bf16.mxu0 %v492_v57  ;;  %v442_v6 = vsel %vm314_vm3, %v250_v44, %v378_v60  ;;  %vm311_vm5 = vcmp.ge.f32.partialorder %v247_v61, 0.0  ;;  %v375_v7 = vmul.f32 0.2, %v247_v61  ;;  %v249_v12 = vadd.f32 %v1559_v63, %v163_v3 }
  0x31   :  { %v494_v9 = vpack.c.bf16 %v442_v6, %v438_v0  ;;  %v435_v10 = vsel %vm307_vm4, %v243_v47, %v371_v1  ;;  %v245_v11 = vadd.f32 %v1559_v63, %v159_v2  ;;  %v84_v15 = vunpack.c.h.bf16 %v37_v4  ;;  %v40_v0 = vld [vmem:[%s1914_s0 + $0x88] sm:$0xff]  ;;  %v42_v1 = vld [vmem:[%s1914_s0 + $0x98] sm:$0xff] }
  0x32   :  { %v439_v14 = vsel %vm311_vm5, %v247_v61, %v375_v7  ;;  %v166_v16 = vmul.f32 %v1541_v48, %v80_v8  ;;  %v82_v17 = vunpack.c.h.bf16 %v1640_v5  ;;  %vm313_vm7 = vcmp.ge.f32.partialorder %v249_v12, 0.0 }
  0x33   :  { %923 = vmatprep.mubr.bf16.mxu1 %v494_v9  ;;  %v491_v18 = vpack.c.bf16 %v439_v14, %v435_v10  ;;  %vm309_vm6 = vcmp.ge.f32.partialorder %v245_v11, 0.0  ;;  %v373_v19 = vmul.f32 0.2, %v245_v11  ;;  %v377_v20 = vmul.f32 0.2, %v249_v12 }
  0x34   :  { %v170_v21 = vmul.f32 %v1541_v48, %v84_v15  ;;  %v252_v22 = vadd.f32 %v1543_v49, %v166_v16  ;;  %v86_v23 = vunpack.c.h.bf16 %v38_v13  ;;  %v168_v25 = vmul.f32 %v1545_v54, %v82_v17 }
  0x35   :  { %827 = vmatmul.mubr.bf16.gmra.mrb[8].mxu0 %v491_v18  ;;  %v437_v24 = vsel %vm309_vm6, %v245_v11, %v373_v19  ;;  %v79_v26 = vunpack.c.l.bf16 %v35_v56  ;;  %v83_v27 = vunpack.c.l.bf16 %v37_v4  ;;  %v441_v28 = vsel %vm313_vm7, %v249_v12, %v377_v20 }
  0x36   :  { %v256_v29 = vadd.f32 %v1543_v49, %v170_v21  ;;  %vm316_vm8 = vcmp.ge.f32.partialorder %v252_v22, 0.0  ;;  %v380_v30 = vmul.f32 0.2, %v252_v22  ;;  %v493_v31 = vpack.c.bf16 %v441_v28, %v437_v24 }
  0x37   :  { %v172_v32 = vmul.f32 %v1545_v54, %v86_v23  ;;  %v254_v33 = vadd.f32 %v1547_v55, %v168_v25  ;;  %v165_v34 = vmul.f32 %v1551_v58, %v79_v26  ;;  %v169_v37 = vmul.f32 %v1551_v58, %v83_v27 }
  0x38   :  { %vm320_vm9 = vcmp.ge.f32.partialorder %v256_v29, 0.0  ;;  %v384_v35 = vmul.f32 0.2, %v256_v29  ;;  %v444_v36 = vsel %vm316_vm8, %v252_v22, %v380_v30  ;;  %924 = vmatmul.mubr.bf16.gmra.mrb[8].mxu1 %v493_v31  ;;  %v81_v43 = vunpack.c.l.bf16 %v1640_v5 }
  0x39   :  { %v258_v38 = vadd.f32 %v1547_v55, %v172_v32  ;;  %vm318_vm10 = vcmp.ge.f32.partialorder %v254_v33, 0.0  ;;  %v382_v39 = vmul.f32 0.2, %v254_v33  ;;  %v251_v40 = vadd.f32 %v1553_v59, %v165_v34 }
  0x3a   :  { %v448_v41 = vsel %vm320_vm9, %v256_v29, %v384_v35  ;;  %v255_v42 = vadd.f32 %v1553_v59, %v169_v37  ;;  %v85_v44 = vunpack.c.l.bf16 %v38_v13  ;;  %v167_v57 = vmul.f32 %v1557_v62, %v81_v43 }
  0x3b   :  { %v496_v46 = vpack.c.bf16 %v448_v41, %v444_v36  ;;  %vm322_vm11 = vcmp.ge.f32.partialorder %v258_v38, 0.0  ;;  %v386_v47 = vmul.f32 0.2, %v258_v38  ;;  %v446_v50 = vsel %vm318_vm10, %v254_v33, %v382_v39  ;;  %v43_v36 = vld [vmem:[%s1914_s0 + $0xa0] sm:$0xff] }
  0x3c   :  { %vm315_vm12 = vcmp.ge.f32.partialorder %v251_v40, 0.0  ;;  %vm319_vm13 = vcmp.ge.f32.partialorder %v255_v42, 0.0  ;;  %v379_v52 = vmul.f32 0.2, %v251_v40  ;;  %v383_v53 = vmul.f32 0.2, %v255_v42 }
  0x3d   :  { %834 = vmatprep.mubr.bf16.mxu0 %v496_v46  ;;  %v450_v56 = vsel %vm322_vm11, %v258_v38, %v386_v47  ;;  %v171_v60 = vmul.f32 %v1557_v62, %v85_v44  ;;  %v88_v61 = vunpack.c.h.bf16 %v39_v45  ;;  %v92_v5 = vunpack.c.h.bf16 %v41_v51  ;;  %v45_v44 = vld [vmem:[%s1914_s0 + $0xb0] sm:$0xff] }
  0x3e   :  { %v498_v2 = vpack.c.bf16 %v450_v56, %v446_v50  ;;  %v443_v3 = vsel %vm315_vm12, %v251_v40, %v379_v52  ;;  %v447_v4 = vsel %vm319_vm13, %v255_v42, %v383_v53  ;;  %v253_v7 = vadd.f32 %v1559_v63, %v167_v57  ;;  %v46_v57 = vld [vmem:[%s1914_s0 + $0xb8] sm:$0xff] }
  0x3f   :  { %v495_v6 = vpack.c.bf16 %v447_v4, %v443_v3  ;;  %v257_v8 = vadd.f32 %v1559_v63, %v171_v60  ;;  %v174_v9 = vmul.f32 %v1541_v48, %v88_v61  ;;  %v178_v10 = vmul.f32 %v1541_v48, %v92_v5 }
  0x40   :  { %931 = vmatprep.mubr.bf16.mxu1 %v498_v2  ;;  %v90_v11 = vunpack.c.h.bf16 %v40_v0  ;;  %v94_v12 = vunpack.c.h.bf16 %v42_v1  ;;  %v87_v13 = vunpack.c.l.bf16 %v39_v45  ;;  %vm317_vm14 = vcmp.ge.f32.partialorder %v253_v7, 0.0  ;;  %v1700_v45 = vld [vmem:[%s1914_s0 + $0xa8] sm:$0xff] }
  0x41   :  { %835 = vmatmul.mubr.bf16.gmra.mrb[12].mxu0 %v495_v6  ;;  %vm321_vm15 = vcmp.ge.f32.partialorder %v257_v8, 0.0  ;;  %v381_v14 = vmul.f32 0.2, %v253_v7  ;;  %v385_v15 = vmul.f32 0.2, %v257_v8  ;;  %v260_v16 = vadd.f32 %v1543_v49, %v174_v9 }
  0x42   :  { %v264_v17 = vadd.f32 %v1543_v49, %v178_v10  ;;  %v176_v18 = vmul.f32 %v1545_v54, %v90_v11  ;;  %v180_v19 = vmul.f32 %v1545_v54, %v94_v12  ;;  %v91_v22 = vunpack.c.l.bf16 %v41_v51 }
  0x43   :  { %v445_v20 = vsel %vm317_vm14, %v253_v7, %v381_v14  ;;  %v449_v21 = vsel %vm321_vm15, %v257_v8, %v385_v15  ;;  %v173_v23 = vmul.f32 %v1551_v58, %v87_v13  ;;  %vm324_vm0 = vcmp.ge.f32.partialorder %v260_v16, 0.0 }
  0x44   :  { %v497_v24 = vpack.c.bf16 %v449_v21, %v445_v20  ;;  %vm328_vm1 = vcmp.ge.f32.partialorder %v264_v17, 0.0  ;;  %v388_v25 = vmul.f32 0.2, %v260_v16  ;;  %v392_v26 = vmul.f32 0.2, %v264_v17 }
  0x45   :  { %v262_v27 = vadd.f32 %v1547_v55, %v176_v18  ;;  %v266_v28 = vadd.f32 %v1547_v55, %v180_v19  ;;  %v177_v29 = vmul.f32 %v1551_v58, %v91_v22  ;;  %v259_v31 = vadd.f32 %v1553_v59, %v173_v23 }
  0x46   :  { %932 = vmatmul.mubr.bf16.gmra.mrb[12].mxu1 %v497_v24  ;;  %v452_v30 = vsel %vm324_vm0, %v260_v16, %v388_v25  ;;  %v89_v32 = vunpack.c.l.bf16 %v40_v0  ;;  %v93_v33 = vunpack.c.l.bf16 %v42_v1  ;;  %v456_v34 = vsel %vm328_vm1, %v264_v17, %v392_v26 }
  0x47   :  { %vm326_vm2 = vcmp.ge.f32.partialorder %v262_v27, 0.0  ;;  %vm330_vm3 = vcmp.ge.f32.partialorder %v266_v28, 0.0  ;;  %v390_v35 = vmul.f32 0.2, %v262_v27  ;;  %v500_v37 = vpack.c.bf16 %v456_v34, %v452_v30 }
  0x48   :  { %v394_v38 = vmul.f32 0.2, %v266_v28  ;;  %v263_v39 = vadd.f32 %v1553_v59, %v177_v29  ;;  %vm323_vm4 = vcmp.ge.f32.partialorder %v259_v31, 0.0  ;;  %v387_v41 = vmul.f32 0.2, %v259_v31  ;;  %v47_v29 = vld [vmem:[%s1914_s0 + $0xc0] sm:$0xff] }
  0x49   :  { %v454_v40 = vsel %vm326_vm2, %v262_v27, %v390_v35  ;;  %v175_v42 = vmul.f32 %v1557_v62, %v89_v32  ;;  %v179_v43 = vmul.f32 %v1557_v62, %v93_v33  ;;  %842 = vmatprep.mubr.bf16.mxu0 %v500_v37  ;;  %v96_v50 = vunpack.c.h.bf16 %v43_v36  ;;  %v49_v33 = vld [vmem:[%s1914_s0 + $0xd0] sm:$0xff] }
  0x4a   :  { %v458_v46 = vsel %vm330_vm3, %v266_v28, %v394_v38  ;;  %vm327_vm5 = vcmp.ge.f32.partialorder %v263_v39, 0.0  ;;  %v391_v47 = vmul.f32 0.2, %v263_v39  ;;  %v451_v52 = vsel %vm323_vm4, %v259_v31, %v387_v41  ;;  %v50_v41 = vld [vmem:[%s1914_s0 + $0xd8] sm:$0xff] }
  0x4b   :  { %v502_v51 = vpack.c.bf16 %v458_v46, %v454_v40  ;;  %v261_v53 = vadd.f32 %v1559_v63, %v175_v42  ;;  %v265_v56 = vadd.f32 %v1559_v63, %v179_v43  ;;  %v100_v61 = vunpack.c.h.bf16 %v45_v44  ;;  %v48_v40 = vld [vmem:[%s1914_s0 + $0xc8] sm:$0xff] }
  0x4c   :  { %v455_v60 = vsel %vm327_vm5, %v263_v39, %v391_v47  ;;  %v182_v0 = vmul.f32 %v1541_v48, %v96_v50  ;;  %v98_v1 = vunpack.c.h.bf16 %v1700_v45  ;;  %v102_v7 = vunpack.c.h.bf16 %v46_v57 }
  0x4d   :  { %939 = vmatprep.mubr.bf16.mxu1 %v502_v51  ;;  %v499_v2 = vpack.c.bf16 %v455_v60, %v451_v52  ;;  %vm325_vm6 = vcmp.ge.f32.partialorder %v261_v53, 0.0  ;;  %vm329_vm7 = vcmp.ge.f32.partialorder %v265_v56, 0.0  ;;  %v389_v3 = vmul.f32 0.2, %v261_v53 }
  0x4e   :  { %v393_v4 = vmul.f32 0.2, %v265_v56  ;;  %v186_v5 = vmul.f32 %v1541_v48, %v100_v61  ;;  %v268_v6 = vadd.f32 %v1543_v49, %v182_v0  ;;  %v184_v9 = vmul.f32 %v1545_v54, %v98_v1 }
  0x4f   :  { %843 = vmatmul.mubr.bf16.gmra.mrb[16].mxu0 %v499_v2  ;;  %v453_v8 = vsel %vm325_vm6, %v261_v53, %v389_v3  ;;  %v95_v10 = vunpack.c.l.bf16 %v43_v36  ;;  %v99_v11 = vunpack.c.l.bf16 %v45_v44  ;;  %v188_v16 = vmul.f32 %v1545_v54, %v102_v7 }
  0x50   :  { %v457_v12 = vsel %vm329_vm7, %v265_v56, %v393_v4  ;;  %v272_v13 = vadd.f32 %v1543_v49, %v186_v5  ;;  %vm332_vm8 = vcmp.ge.f32.partialorder %v268_v6, 0.0  ;;  %v396_v14 = vmul.f32 0.2, %v268_v6 }
  0x51   :  { %v501_v15 = vpack.c.bf16 %v457_v12, %v453_v8  ;;  %v270_v17 = vadd.f32 %v1547_v55, %v184_v9  ;;  %v181_v18 = vmul.f32 %v1551_v58, %v95_v10  ;;  %v185_v21 = vmul.f32 %v1551_v58, %v99_v11 }
  0x52   :  { %vm336_vm9 = vcmp.ge.f32.partialorder %v272_v13, 0.0  ;;  %v400_v19 = vmul.f32 0.2, %v272_v13  ;;  %v460_v20 = vsel %vm332_vm8, %v268_v6, %v396_v14  ;;  %v274_v22 = vadd.f32 %v1547_v55, %v188_v16 }
  0x53   :  { %940 = vmatmul.mubr.bf16.gmra.mrb[16].mxu1 %v501_v15  ;;  %vm334_vm10 = vcmp.ge.f32.partialorder %v270_v17, 0.0  ;;  %v398_v23 = vmul.f32 0.2, %v270_v17  ;;  %v267_v24 = vadd.f32 %v1553_v59, %v181_v18  ;;  %v271_v26 = vadd.f32 %v1553_v59, %v185_v21 }
  0x54   :  { %v464_v25 = vsel %vm336_vm9, %v272_v13, %v400_v19  ;;  %v97_v27 = vunpack.c.l.bf16 %v1700_v45  ;;  %v101_v28 = vunpack.c.l.bf16 %v46_v57  ;;  %vm338_vm11 = vcmp.ge.f32.partialorder %v274_v22, 0.0 }
  0x55   :  { %v504_v30 = vpack.c.bf16 %v464_v25, %v460_v20  ;;  %v402_v31 = vmul.f32 0.2, %v274_v22  ;;  %v462_v32 = vsel %vm334_vm10, %v270_v17, %v398_v23  ;;  %vm331_vm12 = vcmp.ge.f32.partialorder %v267_v24, 0.0  ;;  %v51_v20 = vld [vmem:[%s1914_s0 + $0xe0] sm:$0xff] }
  0x56   :  { %vm335_vm13 = vcmp.ge.f32.partialorder %v271_v26, 0.0  ;;  %v395_v34 = vmul.f32 0.2, %v267_v24  ;;  %v399_v35 = vmul.f32 0.2, %v271_v26  ;;  %v183_v37 = vmul.f32 %v1557_v62, %v97_v27 }
  0x57   :  { %850 = vmatprep.mubr.bf16.mxu0 %v504_v30  ;;  %v466_v36 = vsel %vm338_vm11, %v274_v22, %v402_v31  ;;  %v187_v38 = vmul.f32 %v1557_v62, %v101_v28  ;;  %v104_v39 = vunpack.c.h.bf16 %v47_v29  ;;  %v108_v45 = vunpack.c.h.bf16 %v49_v33  ;;  %v53_v28 = vld [vmem:[%s1914_s0 + $0xf0] sm:$0xff] }
  0x58   :  { %v506_v42 = vpack.c.bf16 %v466_v36, %v462_v32  ;;  %v459_v43 = vsel %vm331_vm12, %v267_v24, %v395_v34  ;;  %v463_v44 = vsel %vm335_vm13, %v271_v26, %v399_v35  ;;  %v269_v47 = vadd.f32 %v1559_v63, %v183_v37  ;;  %v54_v37 = vld [vmem:[%s1914_s0 + $0xf8] sm:$0xff] }
  0x59   :  { %v503_v46 = vpack.c.bf16 %v463_v44, %v459_v43  ;;  %v273_v50 = vadd.f32 %v1559_v63, %v187_v38  ;;  %v190_v51 = vmul.f32 %v1541_v48, %v104_v39  ;;  %v194_v52 = vmul.f32 %v1541_v48, %v108_v45 }
  0x5a   :  { %947 = vmatprep.mubr.bf16.mxu1 %v506_v42  ;;  %v106_v53 = vunpack.c.h.bf16 %v48_v40  ;;  %v110_v56 = vunpack.c.h.bf16 %v50_v41  ;;  %v103_v57 = vunpack.c.l.bf16 %v47_v29  ;;  %vm333_vm14 = vcmp.ge.f32.partialorder %v269_v47, 0.0  ;;  %v52_v29 = vld [vmem:[%s1914_s0 + $0xe8] sm:$0xff] }
  0x5b   :  { %851 = vmatmul.mubr.bf16.gmra.mrb[20].mxu0 %v503_v46  ;;  %vm337_vm15 = vcmp.ge.f32.partialorder %v273_v50, 0.0  ;;  %v397_v60 = vmul.f32 0.2, %v269_v47  ;;  %v401_v61 = vmul.f32 0.2, %v273_v50  ;;  %v276_v0 = vadd.f32 %v1543_v49, %v190_v51 }
  0x5c   :  { %v280_v1 = vadd.f32 %v1543_v49, %v194_v52  ;;  %v192_v2 = vmul.f32 %v1545_v54, %v106_v53  ;;  %v196_v3 = vmul.f32 %v1545_v54, %v110_v56  ;;  %v107_v6 = vunpack.c.l.bf16 %v49_v33 }
  0x5d   :  { %v461_v4 = vsel %vm333_vm14, %v269_v47, %v397_v60  ;;  %v465_v5 = vsel %vm337_vm15, %v273_v50, %v401_v61  ;;  %v189_v7 = vmul.f32 %v1551_v58, %v103_v57  ;;  %vm340_vm0 = vcmp.ge.f32.partialorder %v276_v0, 0.0 }
  0x5e   :  { %v505_v8 = vpack.c.bf16 %v465_v5, %v461_v4  ;;  %vm344_vm1 = vcmp.ge.f32.partialorder %v280_v1, 0.0  ;;  %v404_v9 = vmul.f32 0.2, %v276_v0  ;;  %v408_v10 = vmul.f32 0.2, %v280_v1 }
  0x5f   :  { %v278_v11 = vadd.f32 %v1547_v55, %v192_v2  ;;  %v282_v12 = vadd.f32 %v1547_v55, %v196_v3  ;;  %v193_v13 = vmul.f32 %v1551_v58, %v107_v6  ;;  %v275_v15 = vadd.f32 %v1553_v59, %v189_v7 }
  0x60   :  { %948 = vmatmul.mubr.bf16.gmra.mrb[20].mxu1 %v505_v8  ;;  %v468_v14 = vsel %vm340_vm0, %v276_v0, %v404_v9  ;;  %v105_v16 = vunpack.c.l.bf16 %v48_v40  ;;  %v109_v17 = vunpack.c.l.bf16 %v50_v41  ;;  %v472_v18 = vsel %vm344_vm1, %v280_v1, %v408_v10 }
  0x61   :  { %vm342_vm2 = vcmp.ge.f32.partialorder %v278_v11, 0.0  ;;  %vm346_vm3 = vcmp.ge.f32.partialorder %v282_v12, 0.0  ;;  %v406_v19 = vmul.f32 0.2, %v278_v11  ;;  %v508_v21 = vpack.c.bf16 %v472_v18, %v468_v14 }
  0x62   :  { %v410_v22 = vmul.f32 0.2, %v282_v12  ;;  %v279_v23 = vadd.f32 %v1553_v59, %v193_v13  ;;  %vm339_vm4 = vcmp.ge.f32.partialorder %v275_v15, 0.0  ;;  %v403_v25 = vmul.f32 0.2, %v275_v15 }
  0x63   :  { %v470_v24 = vsel %vm342_vm2, %v278_v11, %v406_v19  ;;  %v191_v26 = vmul.f32 %v1557_v62, %v105_v16  ;;  %v195_v27 = vmul.f32 %v1557_v62, %v109_v17  ;;  %858 = vmatprep.mubr.bf16.mxu0 %v508_v21  ;;  %v112_v32 = vunpack.c.h.bf16 %v51_v20 }
  0x64   :  { %v474_v30 = vsel %vm346_vm3, %v282_v12, %v410_v22  ;;  %vm343_vm5 = vcmp.ge.f32.partialorder %v279_v23, 0.0  ;;  %v407_v31 = vmul.f32 0.2, %v279_v23  ;;  %v467_v34 = vsel %vm339_vm4, %v275_v15, %v403_v25 }
  0x65   :  { %v510_v33 = vpack.c.bf16 %v474_v30, %v470_v24  ;;  %v277_v35 = vadd.f32 %v1559_v63, %v191_v26  ;;  %v281_v36 = vadd.f32 %v1559_v63, %v195_v27  ;;  %v116_v39 = vunpack.c.h.bf16 %v53_v28 }
  0x66   :  { %v471_v38 = vsel %vm343_vm5, %v279_v23, %v407_v31  ;;  %v198_v40 = vmul.f32 %v1541_v48, %v112_v32  ;;  %v114_v41 = vunpack.c.h.bf16 %v52_v29  ;;  %v118_v47 = vunpack.c.h.bf16 %v54_v37 }
  0x67   :  { %955 = vmatprep.mubr.bf16.mxu1 %v510_v33  ;;  %v507_v42 = vpack.c.bf16 %v471_v38, %v467_v34  ;;  %vm341_vm6 = vcmp.ge.f32.partialorder %v277_v35, 0.0  ;;  %vm345_vm7 = vcmp.ge.f32.partialorder %v281_v36, 0.0  ;;  %v405_v43 = vmul.f32 0.2, %v277_v35 }
  0x68   :  { %v409_v44 = vmul.f32 0.2, %v281_v36  ;;  %v202_v45 = vmul.f32 %v1541_v48, %v116_v39  ;;  %v284_v46 = vadd.f32 %v1543_v49, %v198_v40  ;;  %v200_v51 = vmul.f32 %v1545_v54, %v114_v41 }
  0x69   :  { %859 = vmatmul.mubr.bf16.gmra.mrb[24].mxu0 %v507_v42  ;;  %v469_v50 = vsel %vm341_vm6, %v277_v35, %v405_v43  ;;  %v111_v52 = vunpack.c.l.bf16 %v51_v20  ;;  %v115_v53 = vunpack.c.l.bf16 %v53_v28  ;;  %v204_v0 = vmul.f32 %v1545_v54, %v118_v47 }
  0x6a   :  { %v473_v56 = vsel %vm345_vm7, %v281_v36, %v409_v44  ;;  %v288_v57 = vadd.f32 %v1543_v49, %v202_v45  ;;  %vm348_vm8 = vcmp.ge.f32.partialorder %v284_v46, 0.0  ;;  %v412_v60 = vmul.f32 0.2, %v284_v46 }
  0x6b   :  { %v509_v61 = vpack.c.bf16 %v473_v56, %v469_v50  ;;  %v286_v1 = vadd.f32 %v1547_v55, %v200_v51  ;;  %v197_v48 = vmul.f32 %v1551_v58, %v111_v52  ;;  %v201_v4 = vmul.f32 %v1551_v58, %v115_v53 }
  0x6c   :  { %vm352_vm9 = vcmp.ge.f32.partialorder %v288_v57, 0.0  ;;  %v416_v2 = vmul.f32 0.2, %v288_v57  ;;  %v476_v3 = vsel %vm348_vm8, %v284_v46, %v412_v60  ;;  %v290_v5 = vadd.f32 %v1547_v55, %v204_v0 }
  0x6d   :  { %956 = vmatmul.mubr.bf16.gmra.mrb[24].mxu1 %v509_v61  ;;  %vm350_vm10 = vcmp.ge.f32.partialorder %v286_v1, 0.0  ;;  %v414_v6 = vmul.f32 0.2, %v286_v1  ;;  %v283_v49 = vadd.f32 %v1553_v59, %v197_v48  ;;  %v287_v8 = vadd.f32 %v1553_v59, %v201_v4 }
  0x6e   :  { %v480_v7 = vsel %vm352_vm9, %v288_v57, %v416_v2  ;;  %v113_v54 = vunpack.c.l.bf16 %v52_v29  ;;  %v117_v9 = vunpack.c.l.bf16 %v54_v37  ;;  %vm354_vm11 = vcmp.ge.f32.partialorder %v290_v5, 0.0 }
  0x6f   :  { %v512_v10 = vpack.c.bf16 %v480_v7, %v476_v3  ;;  %v418_v11 = vmul.f32 0.2, %v290_v5  ;;  %v478_v12 = vsel %vm350_vm10, %v286_v1, %v414_v6  ;;  %vm347_vm12 = vcmp.ge.f32.partialorder %v283_v49, 0.0 }
  0x70   :  { %vm351_vm13 = vcmp.ge.f32.partialorder %v287_v8, 0.0  ;;  %v411_v13 = vmul.f32 0.2, %v283_v49  ;;  %v415_v58 = vmul.f32 0.2, %v287_v8  ;;  %v199_v55 = vmul.f32 %v1557_v62, %v113_v54 }
  0x71   :  { %866 = vmatprep.mubr.bf16.mxu0 %v512_v10  ;;  %v482_v14 = vsel %vm354_vm11, %v290_v5, %v418_v11  ;;  %v203_v15 = vmul.f32 %v1557_v62, %v117_v9  ;;  %vm976_vm0 = vcmask 254976   ;;  %v1391_v62 = vmov 0.0  }
  0x72   :  { %v514_v16 = vpack.c.bf16 %v482_v14, %v478_v12  ;;  %v475_v17 = vsel %vm347_vm12, %v283_v49, %v411_v13  ;;  %v479_v18 = vsel %vm351_vm13, %v287_v8, %v415_v58  ;;  %v285_v19 = vadd.f32 %v1559_v63, %v199_v55  ;;  %977 = vst.msk [vmem:[%s1917_s6] sm:$0x3] %vm976_vm0, %v1391_v62 }
  0x73   :  { %v511_v59 = vpack.c.bf16 %v479_v18, %v475_v17  ;;  %v289_v20 = vadd.f32 %v1559_v63, %v203_v15  ;;  %v1787_v63 = vld [vmem:[%s1918_s2] ss:$0 sm:$0xff]  ;;  %vm979_vm1 = vcmask 261120   ;;  %vm1140_vm2 = vcmask 257024  }
  0x74   :  { %963 = vmatprep.mubr.bf16.mxu1 %v514_v16  ;;  %vm349_vm14 = vcmp.ge.f32.partialorder %v285_v19, 0.0  ;;  %v413_v21 = vmul.f32 0.2, %v285_v19  ;;  %vm1018_vm3 = vcmask 253952  }
  0x75   :  { %867 = vmatmul.mubr.bf16.gmra.mrb[28].mxu0 %v511_v59  ;;  %vm353_vm15 = vcmp.ge.f32.partialorder %v289_v20, 0.0  ;;  %v417_v22 = vmul.f32 0.2, %v289_v20 }
  0x76   :  { %v477_v23 = vsel %vm349_vm14, %v285_v19, %v413_v21 }
  0x77   :  { %v481_v24 = vsel %vm353_vm15, %v289_v20, %v417_v22 }
  0x78   :  { %v513_v25 = vpack.c.bf16 %v481_v24, %v477_v23 }
  0x7a   :  { %964 = vmatmul.mubr.bf16.gmra.mrb[28].mxu1 %v513_v25 }
  0xf6   :  { %v1246_v26 = vpop.f32.mrb[0].mxu0 }
  0xf7   :  { %v1247_v27 = vpop.f32.mrb[1].mxu0 }
  0xf8   :  { %v1248_v29 = vadd.f32 %v1247_v27, %v1246_v26  ;;  %v1249_v30 = vpop.f32.mrb[2].mxu0 }
  0xf9   :  { %v1310_v28 = vpop.f32.mrb[0].mxu1  ;;  %v1250_v32 = vpop.f32.mrb[3].mxu0 }
  0xfa   :  { %v1311_v31 = vpop.f32.mrb[1].mxu1  ;;  %v813_v33 = vadd.f32 %v1248_v29, %v1787_v63  ;;  %v1251_v36 = vadd.f32 %v1250_v32, %v1249_v30 }
  0xfb   :  { %v1312_v34 = vadd.f32 %v1311_v31, %v1310_v28  ;;  %v1313_v35 = vpop.f32.mrb[2].mxu1 }
  0xfc   :  { %v1314_v37 = vpop.f32.mrb[3].mxu1  ;;  %v816_v39 = vadd.f32 %v1251_v36, %v1787_v63 }
  0xfd   :  { %v910_v38 = vadd.f32 %v1312_v34, %v813_v33  ;;  %v1315_v40 = vadd.f32 %v1314_v37, %v1313_v35 }
  0xfe   :  { %v1252_v51 = vpop.f32.mrb[4].mxu0 }
  0xff   :  { %v1021_v41 = vmul.f32 %v910_v38, %v910_v38  ;;  %v1214_v42 = vpack.c.bf16 %v910_v38, %v910_v38  ;;  %v913_v43 = vadd.f32 %v1315_v40, %v816_v39  ;;  %v980_v44 = vsel %vm979_vm1, %v910_v38, 0.0  ;;  %v1253_v56 = vpop.f32.mrb[5].mxu0 }
 0x100   :  { %v1254_v60 = vadd.f32 %v1253_v56, %v1252_v51  ;;  %v1255_v61 = vpop.f32.mrb[6].mxu0 }
 0x101   :  { %1141 = vst.msk [vmem:[%s1919_s5] sm:$0xf] %vm1140_vm2, %v1214_v42  ;;  %v981_v45 = vsel %vm979_vm1, %v913_v43, 0.0  ;;  %v1022_v46 = vmul.f32 %v913_v43, %v913_v43  ;;  %v1215_v47 = vpack.c.bf16 %v913_v43, %v913_v43  ;;  %v1037_v52 = vsel %vm979_vm1, %v1021_v41, 0.0  ;;  %v1256_v0 = vpop.f32.mrb[7].mxu0  ;;  %v1316_v48 = vpop.f32.mrb[4].mxu1 }
 0x102   :  { %v982_v50 = vadd.f32 %v981_v45, %v980_v44  ;;  %v1257_v1 = vadd.f32 %v1256_v0, %v1255_v61  ;;  %v821_v2 = vadd.f32 %v1254_v60, %v1787_v63  ;;  %v1317_v3 = vpop.f32.mrb[5].mxu1 }
 0x103   :  { %v1038_v53 = vsel %vm979_vm1, %v1022_v46, 0.0  ;;  %1142 = vst.msk [vmem:[%s1919_s5 + $0x4] sm:$0xf] %vm1140_vm2, %v1215_v47  ;;  %v1318_v4 = vadd.f32 %v1317_v3, %v1316_v48  ;;  %v1319_v5 = vpop.f32.mrb[6].mxu1 }
 0x104   :  { %v1039_v57 = vadd.f32 %v1038_v53, %v1037_v52  ;;  %v824_v6 = vadd.f32 %v1257_v1, %v1787_v63  ;;  %v1320_v49 = vpop.f32.mrb[7].mxu1 }
 0x105   :  { %v918_v7 = vadd.f32 %v1318_v4, %v821_v2  ;;  %v1321_v8 = vadd.f32 %v1320_v49, %v1319_v5 }
 0x107   :  { %v983_v54 = vsel %vm979_vm1, %v918_v7, 0.0  ;;  %v1023_v9 = vmul.f32 %v918_v7, %v918_v7  ;;  %v1216_v10 = vpack.c.bf16 %v918_v7, %v918_v7  ;;  %v921_v11 = vadd.f32 %v1321_v8, %v824_v6 }
 0x108   :  { %v984_v12 = vadd.f32 %v983_v54, %v982_v50  ;;  %v1258_v17 = vpop.f32.mrb[8].mxu0 }
 0x109   :  { %v1040_v13 = vsel %vm979_vm1, %v1023_v9, 0.0  ;;  %1143 = vst.msk [vmem:[%s1919_s5 + $0x8] sm:$0xf] %vm1140_vm2, %v1216_v10  ;;  %v985_v58 = vsel %vm979_vm1, %v921_v11, 0.0  ;;  %v1024_v14 = vmul.f32 %v921_v11, %v921_v11  ;;  %v1217_v55 = vpack.c.bf16 %v921_v11, %v921_v11  ;;  %v1259_v59 = vpop.f32.mrb[9].mxu0 }
 0x10a   :  { %v1041_v15 = vadd.f32 %v1040_v13, %v1039_v57  ;;  %v986_v16 = vadd.f32 %v985_v58, %v984_v12  ;;  %v1260_v20 = vadd.f32 %v1259_v59, %v1258_v17  ;;  %v1261_v21 = vpop.f32.mrb[10].mxu0 }
 0x10b   :  { %v1042_v18 = vsel %vm979_vm1, %v1024_v14, 0.0  ;;  %1144 = vst.msk [vmem:[%s1919_s5 + $0xc] sm:$0xf] %vm1140_vm2, %v1217_v55  ;;  %v1262_v22 = vpop.f32.mrb[11].mxu0  ;;  %v1322_v23 = vpop.f32.mrb[8].mxu1 }
 0x10c   :  { %v1043_v19 = vadd.f32 %v1042_v18, %v1041_v15  ;;  %v829_v24 = vadd.f32 %v1260_v20, %v1787_v63  ;;  %v1263_v25 = vadd.f32 %v1262_v22, %v1261_v21  ;;  %v1323_v62 = vpop.f32.mrb[9].mxu1 }
 0x10d   :  { %v1324_v26 = vadd.f32 %v1323_v62, %v1322_v23  ;;  %v1325_v27 = vpop.f32.mrb[10].mxu1 }
 0x10e   :  { %v832_v28 = vadd.f32 %v1263_v25, %v1787_v63  ;;  %v1326_v29 = vpop.f32.mrb[11].mxu1 }
 0x10f   :  { %v926_v30 = vadd.f32 %v1324_v26, %v829_v24  ;;  %v1327_v31 = vadd.f32 %v1326_v29, %v1325_v27 }
 0x111   :  { %v987_v32 = vsel %vm979_vm1, %v926_v30, 0.0  ;;  %v1025_v33 = vmul.f32 %v926_v30, %v926_v30  ;;  %v1218_v34 = vpack.c.bf16 %v926_v30, %v926_v30  ;;  %v929_v35 = vadd.f32 %v1327_v31, %v832_v28 }
 0x112   :  { %v988_v36 = vadd.f32 %v987_v32, %v986_v16 }
 0x113   :  { %v1044_v37 = vsel %vm979_vm1, %v1025_v33, 0.0  ;;  %1145 = vst.msk [vmem:[%s1919_s5 + $0x10] sm:$0xf] %vm1140_vm2, %v1218_v34  ;;  %v989_v38 = vsel %vm979_vm1, %v929_v35, 0.0  ;;  %v1026_v39 = vmul.f32 %v929_v35, %v929_v35  ;;  %v1219_v40 = vpack.c.bf16 %v929_v35, %v929_v35 }
 0x114   :  { %v1264_v41 = vpop.f32.mrb[12].mxu0  ;;  %v1045_v42 = vadd.f32 %v1044_v37, %v1043_v19  ;;  %v990_v43 = vadd.f32 %v989_v38, %v988_v36 }
 0x115   :  { %v1265_v44 = vpop.f32.mrb[13].mxu0  ;;  %v1046_v45 = vsel %vm979_vm1, %v1026_v39, 0.0  ;;  %1146 = vst.msk [vmem:[%s1919_s5 + $0x14] sm:$0xf] %vm1140_vm2, %v1219_v40 }
 0x116   :  { %v1266_v46 = vadd.f32 %v1265_v44, %v1264_v41  ;;  %v1267_v47 = vpop.f32.mrb[14].mxu0  ;;  %v1047_v50 = vadd.f32 %v1046_v45, %v1045_v42 }
 0x117   :  { %v1268_v51 = vpop.f32.mrb[15].mxu0 }
 0x118   :  { %v1269_v52 = vadd.f32 %v1268_v51, %v1267_v47  ;;  %v837_v56 = vadd.f32 %v1266_v46, %v1787_v63 }
 0x119   :  { %v1328_v53 = vpop.f32.mrb[12].mxu1 }
 0x11a   :  { %v1329_v57 = vpop.f32.mrb[13].mxu1  ;;  %v840_v0 = vadd.f32 %v1269_v52, %v1787_v63 }
 0x11b   :  { %v1330_v60 = vadd.f32 %v1329_v57, %v1328_v53  ;;  %v1331_v61 = vpop.f32.mrb[14].mxu1 }
 0x11c   :  { %v1332_v1 = vpop.f32.mrb[15].mxu1 }
 0x11d   :  { %v934_v48 = vadd.f32 %v1330_v60, %v837_v56  ;;  %v1333_v2 = vadd.f32 %v1332_v1, %v1331_v61 }
 0x11f   :  { %v991_v3 = vsel %vm979_vm1, %v934_v48, 0.0  ;;  %v1027_v4 = vmul.f32 %v934_v48, %v934_v48  ;;  %v1220_v5 = vpack.c.bf16 %v934_v48, %v934_v48  ;;  %v937_v6 = vadd.f32 %v1333_v2, %v840_v0 }
 0x120   :  { %v992_v49 = vadd.f32 %v991_v3, %v990_v43 }
 0x121   :  { %v1048_v7 = vsel %vm979_vm1, %v1027_v4, 0.0  ;;  %1147 = vst.msk [vmem:[%s1919_s5 + $0x18] sm:$0xf] %vm1140_vm2, %v1220_v5  ;;  %v993_v8 = vsel %vm979_vm1, %v937_v6, 0.0  ;;  %v1028_v54 = vmul.f32 %v937_v6, %v937_v6  ;;  %v1221_v9 = vpack.c.bf16 %v937_v6, %v937_v6 }
 0x122   :  { %v1049_v10 = vadd.f32 %v1048_v7, %v1047_v50  ;;  %v994_v11 = vadd.f32 %v993_v8, %v992_v49  ;;  %v1270_v12 = vpop.f32.mrb[16].mxu0 }
 0x123   :  { %v1050_v13 = vsel %vm979_vm1, %v1028_v54, 0.0  ;;  %1148 = vst.msk [vmem:[%s1919_s5 + $0x1c] sm:$0xf] %vm1140_vm2, %v1221_v9  ;;  %v1271_v58 = vpop.f32.mrb[17].mxu0 }
 0x124   :  { %v1051_v14 = vadd.f32 %v1050_v13, %v1049_v10  ;;  %v1272_v55 = vadd.f32 %v1271_v58, %v1270_v12  ;;  %v1273_v15 = vpop.f32.mrb[18].mxu0 }
 0x125   :  { %v1274_v16 = vpop.f32.mrb[19].mxu0 }
 0x126   :  { %v1334_v17 = vpop.f32.mrb[16].mxu1  ;;  %v845_v18 = vadd.f32 %v1272_v55, %v1787_v63  ;;  %v1275_v59 = vadd.f32 %v1274_v16, %v1273_v15 }
 0x127   :  { %v1335_v19 = vpop.f32.mrb[17].mxu1 }
 0x128   :  { %v1336_v20 = vadd.f32 %v1335_v19, %v1334_v17  ;;  %v1337_v21 = vpop.f32.mrb[18].mxu1  ;;  %v848_v22 = vadd.f32 %v1275_v59, %v1787_v63 }
 0x129   :  { %v1338_v23 = vpop.f32.mrb[19].mxu1 }
 0x12a   :  { %v942_v24 = vadd.f32 %v1336_v20, %v845_v18  ;;  %v1339_v25 = vadd.f32 %v1338_v23, %v1337_v21 }
 0x12c   :  { %v995_v62 = vsel %vm979_vm1, %v942_v24, 0.0  ;;  %v1029_v26 = vmul.f32 %v942_v24, %v942_v24  ;;  %v1222_v27 = vpack.c.bf16 %v942_v24, %v942_v24  ;;  %v945_v28 = vadd.f32 %v1339_v25, %v848_v22 }
 0x12d   :  { %v996_v29 = vadd.f32 %v995_v62, %v994_v11 }
 0x12e   :  { %v1052_v30 = vsel %vm979_vm1, %v1029_v26, 0.0  ;;  %1149 = vst.msk [vmem:[%s1919_s5 + $0x20] sm:$0xf] %vm1140_vm2, %v1222_v27  ;;  %v997_v31 = vsel %vm979_vm1, %v945_v28, 0.0  ;;  %v1030_v32 = vmul.f32 %v945_v28, %v945_v28  ;;  %v1223_v33 = vpack.c.bf16 %v945_v28, %v945_v28  ;;  %v1276_v34 = vpop.f32.mrb[20].mxu0 }
 0x12f   :  { %v1053_v35 = vadd.f32 %v1052_v30, %v1051_v14  ;;  %v998_v36 = vadd.f32 %v997_v31, %v996_v29  ;;  %v1277_v37 = vpop.f32.mrb[21].mxu0 }
 0x130   :  { %v1054_v38 = vsel %vm979_vm1, %v1030_v32, 0.0  ;;  %1150 = vst.msk [vmem:[%s1919_s5 + $0x24] sm:$0xf] %vm1140_vm2, %v1223_v33  ;;  %v1278_v39 = vadd.f32 %v1277_v37, %v1276_v34  ;;  %v1279_v40 = vpop.f32.mrb[22].mxu0 }
 0x131   :  { %v1055_v41 = vadd.f32 %v1054_v38, %v1053_v35  ;;  %v1280_v42 = vpop.f32.mrb[23].mxu0 }
 0x132   :  { %v1281_v43 = vadd.f32 %v1280_v42, %v1279_v40  ;;  %v853_v45 = vadd.f32 %v1278_v39, %v1787_v63 }
 0x133   :  { %v1340_v44 = vpop.f32.mrb[20].mxu1 }
 0x134   :  { %v1341_v46 = vpop.f32.mrb[21].mxu1  ;;  %v856_v51 = vadd.f32 %v1281_v43, %v1787_v63 }
 0x135   :  { %v1342_v47 = vadd.f32 %v1341_v46, %v1340_v44  ;;  %v1343_v50 = vpop.f32.mrb[22].mxu1 }
 0x136   :  { %v1344_v52 = vpop.f32.mrb[23].mxu1 }
 0x137   :  { %v950_v53 = vadd.f32 %v1342_v47, %v853_v45  ;;  %v1345_v56 = vadd.f32 %v1344_v52, %v1343_v50 }
 0x139   :  { %v999_v57 = vsel %vm979_vm1, %v950_v53, 0.0  ;;  %v1031_v60 = vmul.f32 %v950_v53, %v950_v53  ;;  %v1224_v61 = vpack.c.bf16 %v950_v53, %v950_v53  ;;  %v953_v0 = vadd.f32 %v1345_v56, %v856_v51 }
 0x13a   :  { %v1000_v1 = vadd.f32 %v999_v57, %v998_v36 }
 0x13b   :  { %v1056_v48 = vsel %vm979_vm1, %v1031_v60, 0.0  ;;  %1151 = vst.msk [vmem:[%s1919_s5 + $0x28] sm:$0xf] %vm1140_vm2, %v1224_v61  ;;  %v1001_v2 = vsel %vm979_vm1, %v953_v0, 0.0  ;;  %v1032_v3 = vmul.f32 %v953_v0, %v953_v0  ;;  %v1225_v4 = vpack.c.bf16 %v953_v0, %v953_v0 }
 0x13c   :  { %v1057_v5 = vadd.f32 %v1056_v48, %v1055_v41  ;;  %v1002_v6 = vadd.f32 %v1001_v2, %v1000_v1  ;;  %v1282_v49 = vpop.f32.mrb[24].mxu0 }
 0x13d   :  { %v1058_v7 = vsel %vm979_vm1, %v1032_v3, 0.0  ;;  %1152 = vst.msk [vmem:[%s1919_s5 + $0x2c] sm:$0xf] %vm1140_vm2, %v1225_v4  ;;  %v1283_v8 = vpop.f32.mrb[25].mxu0 }
 0x13e   :  { %v1059_v54 = vadd.f32 %v1058_v7, %v1057_v5  ;;  %v1284_v9 = vadd.f32 %v1283_v8, %v1282_v49  ;;  %v1285_v10 = vpop.f32.mrb[26].mxu0 }
 0x13f   :  { %v1286_v11 = vpop.f32.mrb[27].mxu0 }
 0x140   :  { %v1346_v12 = vpop.f32.mrb[24].mxu1  ;;  %v861_v13 = vadd.f32 %v1284_v9, %v1787_v63  ;;  %v1287_v58 = vadd.f32 %v1286_v11, %v1285_v10  ;;  %v1020_v11 = vld [vmem:[%s1917_s6 + $0x1] sm:$0x1] }
 0x141   :  { %v1347_v14 = vpop.f32.mrb[25].mxu1 }
 0x142   :  { %v1348_v55 = vadd.f32 %v1347_v14, %v1346_v12  ;;  %v1349_v15 = vpop.f32.mrb[26].mxu1  ;;  %v864_v16 = vadd.f32 %v1287_v58, %v1787_v63 }
 0x143   :  { %v1350_v17 = vpop.f32.mrb[27].mxu1 }
 0x144   :  { %v958_v18 = vadd.f32 %v1348_v55, %v861_v13  ;;  %v1351_v59 = vadd.f32 %v1350_v17, %v1349_v15 }
 0x146   :  { %v1003_v19 = vsel %vm979_vm1, %v958_v18, 0.0  ;;  %v1033_v20 = vmul.f32 %v958_v18, %v958_v18  ;;  %v1226_v21 = vpack.c.bf16 %v958_v18, %v958_v18  ;;  %v961_v22 = vadd.f32 %v1351_v59, %v864_v16 }
 0x147   :  { %v1004_v23 = vadd.f32 %v1003_v19, %v1002_v6 }
 0x148   :  { %v1060_v24 = vsel %vm979_vm1, %v1033_v20, 0.0  ;;  %1153 = vst.msk [vmem:[%s1919_s5 + $0x30] sm:$0xf] %vm1140_vm2, %v1226_v21  ;;  %v1005_v25 = vsel %vm979_vm1, %v961_v22, 0.0  ;;  %v1034_v62 = vmul.f32 %v961_v22, %v961_v22  ;;  %v1227_v26 = vpack.c.bf16 %v961_v22, %v961_v22  ;;  %v1288_v27 = vpop.f32.mrb[28].mxu0 }
 0x149   :  { %v1061_v28 = vadd.f32 %v1060_v24, %v1059_v54  ;;  %v1006_v29 = vadd.f32 %v1005_v25, %v1004_v23  ;;  %v1289_v30 = vpop.f32.mrb[29].mxu0  ;;  %v978_v54 = vld [vmem:[%s1917_s6] sm:$0x1] }
 0x14a   :  { %v1062_v31 = vsel %vm979_vm1, %v1034_v62, 0.0  ;;  %1154 = vst.msk [vmem:[%s1919_s5 + $0x34] sm:$0xf] %vm1140_vm2, %v1227_v26  ;;  %v1290_v32 = vadd.f32 %v1289_v30, %v1288_v27  ;;  %v1291_v33 = vpop.f32.mrb[30].mxu0 }
 0x14b   :  { %v1063_v34 = vadd.f32 %v1062_v31, %v1061_v28  ;;  %v1292_v35 = vpop.f32.mrb[31].mxu0 }
 0x14c   :  { %v1293_v36 = vadd.f32 %v1292_v35, %v1291_v33  ;;  %v869_v38 = vadd.f32 %v1290_v32, %v1787_v63 }
 0x14d   :  { %v1352_v37 = vpop.f32.mrb[28].mxu1 }
 0x14e   :  { %v1353_v39 = vpop.f32.mrb[29].mxu1  ;;  %v872_v42 = vadd.f32 %v1293_v36, %v1787_v63 }
 0x14f   :  { %v1354_v40 = vadd.f32 %v1353_v39, %v1352_v37  ;;  %v1355_v41 = vpop.f32.mrb[30].mxu1 }
 0x150   :  { %v1356_v43 = vpop.f32.mrb[31].mxu1 }
 0x151   :  { %v966_v44 = vadd.f32 %v1354_v40, %v869_v38  ;;  %v1357_v45 = vadd.f32 %v1356_v43, %v1355_v41 }
 0x153   :  { %v1007_v46 = vsel %vm979_vm1, %v966_v44, 0.0  ;;  %v1035_v47 = vmul.f32 %v966_v44, %v966_v44  ;;  %v1228_v50 = vpack.c.bf16 %v966_v44, %v966_v44  ;;  %v969_v51 = vadd.f32 %v1357_v45, %v872_v42 }
 0x154   :  { %v1008_v52 = vadd.f32 %v1007_v46, %v1006_v29 }
 0x155   :  { %v1064_v53 = vsel %vm979_vm1, %v1035_v47, 0.0  ;;  %1155 = vst.msk [vmem:[%s1919_s5 + $0x38] sm:$0xf] %vm1140_vm2, %v1228_v50  ;;  %v1009_v56 = vsel %vm979_vm1, %v969_v51, 0.0  ;;  %v1036_v57 = vmul.f32 %v969_v51, %v969_v51  ;;  %v1229_v63 = vpack.c.bf16 %v969_v51, %v969_v51 }
 0x156   :  { %v1065_v60 = vadd.f32 %v1064_v53, %v1063_v34  ;;  %v1010_v61 = vadd.f32 %v1009_v56, %v1008_v52 }
 0x157   :  { %v1066_v0 = vsel %vm979_vm1, %v1036_v57, 0.0  ;;  %1156 = vst.msk [vmem:[%s1919_s5 + $0x3c] sm:$0xf] %vm1140_vm2, %v1229_v63 }
 0x158   :  { %v1011_v1 = vrot.slane %v1010_v61, 4  ;;  %v1067_v48 = vadd.f32 %v1066_v0, %v1065_v60 }
 0x15a   :  { %v1012_v2 = vadd.f32 %v1011_v1, %v1010_v61  ;;  %v1068_v3 = vrot.slane %v1067_v48, 4 }
 0x15c   :  { %v1013_v4 = vrot.slane %v1012_v2, 2  ;;  %v1069_v5 = vadd.f32 %v1068_v3, %v1067_v48 }
 0x15e   :  { %v1014_v6 = vadd.f32 %v1013_v4, %v1012_v2  ;;  %v1070_v49 = vrot.slane %v1069_v5, 2 }
 0x160   :  { %v1015_v7 = vrot.slane %v1014_v6, 1  ;;  %v1071_v8 = vadd.f32 %v1070_v49, %v1069_v5 }
 0x162   :  { %v1016_v9 = vadd.f32 %v1015_v7, %v1014_v6  ;;  %v1072_v10 = vrot.slane %v1071_v8, 1 }
 0x164   :  { %v1017_v12 = vadd.f32 %v1016_v9, %v978_v54  ;;  %v1073_v13 = vadd.f32 %v1072_v10, %v1071_v8 }
 0x166   :  { %1019 = vst.msk [vmem:[%s1917_s6] sm:$0x1] %vm1018_vm3, %v1017_v12  ;;  %v1074_v58 = vadd.f32 %v1073_v13, %v1020_v11 }
 0x168   :  { %1075 = vst.msk [vmem:[%s1917_s6 + $0x1] sm:$0x1] %vm1018_vm3, %v1074_v58 }

// kernel: tile.44
= control target key start
LH: loop header
LB: loop body
LE: loop exit
PB: predicated region body
PF: predicated region fallthrough
CT: control target
= control target key end

     0   :  { %vm3_vm0 = vcmask 261120   ;;  %s29_s8 = smov 96   ;;  %s30_s13 = smov 32   ;;  %vm9_vm1 = vcmask 1048320   ;;  %vm15_vm2 = vcmask 785920   ;;  %vm21_vm3 = vcmask 523520   ;;  %s66_s0 = inlined_call_operand.vmem [shape: f32[25,32], index: 0, kind: input, shape index: {}]   ;;  %s67_s1 = inlined_call_operand.vmem [shape: f32[800], index: 1, kind: output, shape index: {}]  }
   0x1   :  { %v23_v0 = vld [vmem:[%s66_s0 + $0x3] ss:$4 sm:$0x3f]   ;;  %v25_v1 = vld [vmem:[%s66_s0 + $0x1] ss:$4 sm:$0x3f]  }
   0x2   :  { %7 = vrot.lane.b32.xlu0 %v23_v0, %s29_s8  ;;  %v24_v2 = vld [vmem:[%s66_s0 + $0x2] ss:$4 sm:$0x3f]   ;;  %19 = vrot.lane.b32.xlu1 %v25_v1, %s30_s13  ;;  %v2_v3 = vld [vmem:[%s66_s0] ss:$4 sm:$0x7f]  }
   0x3   :  { %4 = vst.msk [vmem:[%s67_s1] sm:$0x7f] %vm3_vm0, %v2_v3   ;;  %s31_s17 = smov 64  }
   0x6   :  { %13 = vrot.lane.b32.xlu0 %v24_v2, %s31_s17 }
  0x74   :  { %v8_v4 = vpop.permute.xlu0 %7   ;;  %v20_v5 = vpop.permute.xlu1 %19  }
  0x75   :  { %10 = vst.msk [vmem:[%s67_s1] sm:$0x3f] %vm9_vm1, %v8_v4  }
  0x78   :  { %v14_v6 = vpop.permute.xlu0 %13  }
  0x79   :  { %16 = vst.msk [vmem:[%s67_s1] sm:$0x3f] %vm15_vm2, %v14_v6  }
  0x7a   :  { %22 = vst.msk [vmem:[%s67_s1] sm:$0x3f] %vm21_vm3, %v20_v5  }

// kernel: tile.43
= control target key start
LH: loop header
LB: loop body
LE: loop exit
PB: predicated region body
PF: predicated region fallthrough
CT: control target
= control target key end

     0   :  { %s40_s0 = inlined_call_operand.vmem [shape: f32[32], index: 0, kind: input, shape index: {}]   ;;  %s41_s1 = inlined_call_operand.vmem [shape: f32[25,32], index: 1, kind: output, shape index: {}]  }
   0x1   :  { %v4_v0 = vld [vmem:[%s40_s0] ss:$0 sm:$0xff] }
   0x2   :  { %5 = vst [vmem:[%s41_s1] sm:$0xff] %v4_v0  ;;  %12 = vst [vmem:[%s41_s1 + $0x8] sm:$0xff] %v4_v0 }
   0x3   :  { %13 = vst [vmem:[%s41_s1 + $0x10] sm:$0xff] %v4_v0  ;;  %14 = vst [vmem:[%s41_s1 + $0x18] sm:$0xff] %v4_v0 }

// kernel: tile.53
= control target key start
LH: loop header
LB: loop body
LE: loop exit
PB: predicated region body
PF: predicated region fallthrough
CT: control target
= control target key end

     0   :  { %s28_s0 = inlined_call_operand.vmem [shape: f32[64], index: 0, kind: input, shape index: {}]   ;;  %s29_s1 = inlined_call_operand.vmem [shape: f32[16,64], index: 1, kind: output, shape index: {}]  }
   0x1   :  { %v4_v0 = vld [vmem:[%s28_s0] ss:$0 sm:$0xff] }
   0x2   :  { %5 = vst [vmem:[%s29_s1] sm:$0xff] %v4_v0  ;;  %8 = vst [vmem:[%s29_s1 + $0x8] sm:$0xff] %v4_v0 }

// kernel: tile.58
= control target key start
LH: loop header
LB: loop body
LE: loop exit
PB: predicated region body
PF: predicated region fallthrough
CT: control target
= control target key end

     0   :  { %vm3_vm0 = vcmask 523264   ;;  %vm10_vm1 = vcmask 1048064   ;;  %s116_s0 = inlined_call_operand.vmem [shape: f32[16,64], index: 0, kind: input, shape index: {}]   ;;  %s117_s1 = inlined_call_operand.vmem [shape: f32[1,1024], index: 1, kind: output, shape index: {}]  }
   0x1   :  { %v66_v0 = vld [vmem:[%s116_s0 + $0x1] ss:$2 sm:$0xff]   ;;  %v2_v1 = vld [vmem:[%s116_s0] ss:$2 sm:$0xff]   ;;  %s75_s0 = smov 64  }
   0x2   :  { %8 = vrot.lane.b32.xlu0 %v66_v0, %s75_s0  ;;  %4 = vst.msk [vmem:[#allocation0] ss:$8 sm:$0xf] %vm3_vm0, %v2_v1   ;;  %5 = vst.msk [vmem:[#allocation0] ss:$8 sm:$0xf0] %vm3_vm0, %v2_v1  }
  0x74   :  { %v9_v2 = vpop.permute.xlu0 %8  }
  0x75   :  { %11 = vst.msk [vmem:[#allocation0] ss:$8 sm:$0xf] %vm10_vm1, %v9_v2   ;;  %12 = vst.msk [vmem:[#allocation0] ss:$8 sm:$0xf0] %vm10_vm1, %v9_v2  }
  0x7c   :  { %v16_v3 = vld [vmem:[#allocation0] sm:$0x1]  ;;  %v20_v4 = vld [vmem:[#allocation0 + $0x8] sm:$0x1]  ;;  %v25_v5 = vld [vmem:[#allocation0 + $0x10] sm:$0x1] }
  0x7d   :  { %18 = vst [vmem:[%s117_s1] sm:$0x1] %v16_v3  ;;  %67 = vst [vmem:[%s117_s1 + $0x1] sm:$0x1] %v20_v4  ;;  %v31_v6 = vld [vmem:[#allocation0 + $0x18] sm:$0x1] }
  0x7e   :  { %68 = vst [vmem:[%s117_s1 + $0x2] sm:$0x1] %v25_v5  ;;  %v37_v7 = vld [vmem:[#allocation0 + $0x20] sm:$0x1]  ;;  %v43_v8 = vld [vmem:[#allocation0 + $0x28] sm:$0x1] }
  0x7f   :  { %69 = vst [vmem:[%s117_s1 + $0x3] sm:$0x1] %v31_v6  ;;  %70 = vst [vmem:[%s117_s1 + $0x4] sm:$0x1] %v37_v7  ;;  %v49_v9 = vld [vmem:[#allocation0 + $0x30] sm:$0x1] }
  0x80   :  { %71 = vst [vmem:[%s117_s1 + $0x5] sm:$0x1] %v43_v8  ;;  %v55_v10 = vld [vmem:[#allocation0 + $0x38] sm:$0x1]  ;;  %72 = vst [vmem:[%s117_s1 + $0x6] sm:$0x1] %v49_v9 }
  0x81   :  { %73 = vst [vmem:[%s117_s1 + $0x7] sm:$0x1] %v55_v10 }

// kernel: _lambda_.8
= control target key start
LH: loop header
LB: loop body
LE: loop exit
PB: predicated region body
PF: predicated region fallthrough
CT: control target
= control target key end

     0   :  { %v69_v20 = vlaneseq  ;;  %s1666_s1 = inlined_call_operand.vmem [shape: bf16[896,64], index: 1, kind: input, shape index: {}]   ;;  %s1667_s0 = inlined_call_operand.vmem [shape: bf16[32,896], index: 0, kind: input, shape index: {}]   ;;  %s1668_s3 = inlined_call_operand.vmem [shape: f32[1,896], index: 3, kind: input, shape index: {}]   ;;  %s1669_s4 = inlined_call_operand.vmem [shape: f32[1,896], index: 4, kind: input, shape index: {}]   ;;  %s1670_s6 = inlined_call_operand.vmem [shape: f32[2,64], index: 6, kind: output, shape index: {1}]   ;;  %s1671_s2 = inlined_call_operand.vmem [shape: f32[1,64], index: 2, kind: input, shape index: {}]   ;;  %s1672_s5 = inlined_call_operand.vmem [shape: bf16[32,64], index: 5, kind: output, shape index: {0}]  }
   0x1   :  { %v1199_v0 = vld [vmem:[%s1666_s1 + $0x40] sm:$0xff]   ;;  %v1203_v4 = vld [vmem:[%s1666_s1 + $0x48] sm:$0xff]   ;;  %v1207_v8 = vld [vmem:[%s1666_s1 + $0x50] sm:$0xff]  }
   0x2   :  { %v1200_v1 = vld [vmem:[%s1666_s1] sm:$0xff]   ;;  %1084 = vmatprep.subr.bf16.mxu0 %v1199_v0  ;;  %v1204_v5 = vld [vmem:[%s1666_s1 + $0x8] sm:$0xff]   ;;  %v1208_v9 = vld [vmem:[%s1666_s1 + $0x10] sm:$0xff]   ;;  %v1363_v25 = vshrl.u32 %v69_v20, 7 }
   0x3   :  { %v1201_v2 = vld [vmem:[%s1666_s1 + $0xc0] sm:$0xff]   ;;  %1085 = vmatpush3.bf16.msra.mxu0 %v1200_v1  ;;  %v1205_v6 = vld [vmem:[%s1666_s1 + $0xc8] sm:$0xff]   ;;  %v1209_v10 = vld [vmem:[%s1666_s1 + $0xd0] sm:$0xff]  }
   0x4   :  { %v1202_v3 = vld [vmem:[%s1666_s1 + $0x80] sm:$0xff]   ;;  %1112 = vmatprep.subr.bf16.mxu1 %v1201_v2  ;;  %1086 = vmatprep.subr.bf16.mxu0 %v1203_v4  ;;  %v1206_v7 = vld [vmem:[%s1666_s1 + $0x88] sm:$0xff]   ;;  %v1210_v11 = vld [vmem:[%s1666_s1 + $0x90] sm:$0xff]   ;;  %v75_v30 = vsub.s32 1, %v1363_v25  ;;  %v71_v32 = vsub.s32 0, %v1363_v25  ;;  %v83_v34 = vsub.s32 3, %v1363_v25 }
   0x5   :  { %1113 = vmatpush3.bf16.msra.mxu1 %v1202_v3  ;;  %v1211_v12 = vld [vmem:[%s1666_s1 + $0x58] sm:$0xff]   ;;  %v1215_v16 = vld [vmem:[%s1666_s1 + $0x60] sm:$0xff]   ;;  %v1219_v21 = vld [vmem:[%s1666_s1 + $0x68] sm:$0xff]   ;;  %v79_v36 = vsub.s32 2, %v1363_v25 }
   0x6   :  { %1114 = vmatprep.subr.bf16.mxu1 %v1205_v6  ;;  %v1212_v13 = vld [vmem:[%s1666_s1 + $0x18] sm:$0xff]   ;;  %v1216_v17 = vld [vmem:[%s1666_s1 + $0x20] sm:$0xff]   ;;  %v1220_v22 = vld [vmem:[%s1666_s1 + $0x28] sm:$0xff]  }
   0x7   :  { %1087 = vmatpush3.bf16.msra.mxu0 %v1204_v5  ;;  %v1213_v14 = vld [vmem:[%s1666_s1 + $0xd8] sm:$0xff]   ;;  %v1217_v18 = vld [vmem:[%s1666_s1 + $0xe0] sm:$0xff]   ;;  %v1221_v23 = vld [vmem:[%s1666_s1 + $0xe8] sm:$0xff]  }
   0x8   :  { %1088 = vmatprep.subr.bf16.mxu0 %v1207_v8  ;;  %v1214_v15 = vld [vmem:[%s1666_s1 + $0x98] sm:$0xff]   ;;  %v1218_v19 = vld [vmem:[%s1666_s1 + $0xa0] sm:$0xff]   ;;  %v1222_v24 = vld [vmem:[%s1666_s1 + $0xa8] sm:$0xff]  }
   0x9   :  { %1115 = vmatpush3.bf16.msra.mxu1 %v1206_v7  ;;  %v1223_v26 = vld [vmem:[%s1666_s1 + $0x70] sm:$0xff]   ;;  %v1227_v31 = vld [vmem:[%s1666_s1 + $0x78] sm:$0xff]   ;;  %v23_v37 = vld [vmem:[%s1667_s0] sm:$0xff] }
   0xa   :  { %1116 = vmatprep.subr.bf16.mxu1 %v1209_v10  ;;  %v1224_v27 = vld [vmem:[%s1666_s1 + $0x30] sm:$0xff]   ;;  %v1228_v33 = vld [vmem:[%s1666_s1 + $0x38] sm:$0xff]   ;;  %v1399_v39 = vld [vmem:[%s1668_s3] sm:$0xff]  ;;  %v39_v40 = vunpack.c.l.bf16 %v23_v37  ;;  %v40_v41 = vunpack.c.h.bf16 %v23_v37 }
   0xb   :  { %1089 = vmatpush3.bf16.msra.mxu0 %v1208_v9  ;;  %v1225_v28 = vld [vmem:[%s1666_s1 + $0xf0] sm:$0xff]   ;;  %v1229_v35 = vld [vmem:[%s1666_s1 + $0xf8] sm:$0xff]   ;;  %v1404_v44 = vld [vmem:[%s1669_s4] sm:$0xff]  ;;  %v1407_v45 = vrot.slane %v1399_v39, %v75_v30  ;;  %v1416_v48 = vrot.slane %v1399_v39, %v71_v32  ;;  %v1431_v53 = vrot.slane %v1399_v39, %v83_v34  ;;  %v1437_v55 = vrot.slane %v1399_v39, %v79_v36 }
   0xc   :  { %1090 = vmatprep.subr.bf16.mxu0 %v1211_v12  ;;  %v1226_v29 = vld [vmem:[%s1666_s1 + $0xb0] sm:$0xff]   ;;  %v27_v38 = vld [vmem:[%s1667_s0 + $0x1c] sm:$0xff]  ;;  %v1410_v46 = vrot.slane %v1404_v44, %v75_v30  ;;  %v1419_v49 = vrot.slane %v1404_v44, %v71_v32  ;;  %v24_v51 = vld [vmem:[%s1667_s0 + $0x8] sm:$0xff]  ;;  %v1434_v54 = vrot.slane %v1404_v44, %v83_v34  ;;  %v1440_v56 = vrot.slane %v1404_v44, %v79_v36 }
   0xd   :  { %1117 = vmatpush3.bf16.msra.mxu1 %v1210_v11  ;;  %v46_v42 = vunpack.c.l.bf16 %v27_v38  ;;  %v47_v43 = vunpack.c.h.bf16 %v27_v38  ;;  %v1230_v47 = vld [vmem:[%s1666_s1 + $0xb8] sm:$0xff]   ;;  %v1231_v50 = vld [vmem:[%s1666_s1 + $0x140] sm:$0xff]   ;;  %v105_v57 = vmul.f32 %v1407_v45, %v40_v41  ;;  %v104_v59 = vmul.f32 %v1416_v48, %v39_v40  ;;  %v1235_v34 = vld [vmem:[%s1666_s1 + $0x108] sm:$0xff]  }
   0xe   :  { %1118 = vmatprep.subr.bf16.mxu1 %v1213_v14  ;;  %v28_v52 = vld [vmem:[%s1667_s0 + $0x24] sm:$0xff]  ;;  %v41_v61 = vunpack.c.l.bf16 %v24_v51  ;;  %v42_v62 = vunpack.c.h.bf16 %v24_v51  ;;  %v1236_v36 = vld [vmem:[%s1666_s1 + $0x150] sm:$0xff]   ;;  %v91_v51 = vsub.s32 5, %v1363_v25 }
   0xf   :  { %1091 = vmatpush3.bf16.msra.mxu0 %v1212_v13  ;;  %v112_v58 = vmul.f32 %v1407_v45, %v47_v43  ;;  %v111_v60 = vmul.f32 %v1416_v48, %v46_v42  ;;  %v48_v63 = vunpack.c.l.bf16 %v28_v52  ;;  %v49_v0 = vunpack.c.h.bf16 %v28_v52  ;;  %v1234_v5 = vld [vmem:[%s1666_s1 + $0x180] sm:$0xff]   ;;  %v1237_v38 = vld [vmem:[%s1666_s1 + $0x188] sm:$0xff]   ;;  %v1238_v41 = vld [vmem:[%s1666_s1 + $0x110] sm:$0xff]  }
  0x10   :  { %1092 = vmatprep.subr.bf16.mxu0 %v1215_v16  ;;  %v170_v1 = vadd.f32 %v1410_v46, %v105_v57  ;;  %v169_v3 = vadd.f32 %v1419_v49, %v104_v59  ;;  %v107_v6 = vmul.f32 %v1431_v53, %v42_v62  ;;  %v106_v8 = vmul.f32 %v1437_v55, %v41_v61  ;;  %v1239_v42 = vld [vmem:[%s1666_s1 + $0x158] sm:$0xff]   ;;  %v1240_v43 = vld [vmem:[%s1666_s1 + $0x190] sm:$0xff]   ;;  %v1242_v62 = vld [vmem:[%s1666_s1 + $0x160] sm:$0xff]  }
  0x11   :  { %1119 = vmatpush3.bf16.msra.mxu1 %v1214_v15  ;;  %v177_v2 = vadd.f32 %v1410_v46, %v112_v58  ;;  %v176_v4 = vadd.f32 %v1419_v49, %v111_v60  ;;  %v114_v7 = vmul.f32 %v1431_v53, %v49_v0  ;;  %v113_v9 = vmul.f32 %v1437_v55, %v48_v63  ;;  %v35_v52 = vld [vmem:[%s1667_s0 + $0x54] sm:$0xff] }
  0x12   :  { %1120 = vmatprep.subr.bf16.mxu1 %v1217_v18  ;;  %vm198_vm0 = vcmp.ge.f32.partialorder %v170_v1, 0.0  ;;  %v226_v10 = vmul.f32 0.2, %v170_v1  ;;  %vm197_vm2 = vcmp.ge.f32.partialorder %v169_v3, 0.0  ;;  %v225_v12 = vmul.f32 0.2, %v169_v3 }
  0x13   :  { %1093 = vmatpush3.bf16.msra.mxu0 %v1216_v17  ;;  %vm205_vm1 = vcmp.ge.f32.partialorder %v177_v2, 0.0  ;;  %v233_v11 = vmul.f32 0.2, %v177_v2  ;;  %vm204_vm3 = vcmp.ge.f32.partialorder %v176_v4, 0.0  ;;  %v232_v13 = vmul.f32 0.2, %v176_v4 }
  0x14   :  { %1094 = vmatprep.subr.bf16.mxu0 %v1219_v21  ;;  %v254_v14 = vsel %vm198_vm0, %v170_v1, %v226_v10  ;;  %v172_v16 = vadd.f32 %v1434_v54, %v107_v6  ;;  %v179_v17 = vadd.f32 %v1434_v54, %v114_v7  ;;  %v1232_v18 = vld [vmem:[%s1666_s1 + $0x100] sm:$0xff]   ;;  %v253_v20 = vsel %vm197_vm2, %v169_v3, %v225_v12  ;;  %v1241_v59 = vld [vmem:[%s1666_s1 + $0x118] sm:$0xff]  }
  0x15   :  { %1121 = vmatpush3.bf16.msra.mxu1 %v1218_v19  ;;  %v261_v15 = vsel %vm205_vm1, %v177_v2, %v233_v11  ;;  %v260_v21 = vsel %vm204_vm3, %v176_v4, %v232_v13  ;;  %v61_v60 = vunpack.c.h.bf16 %v35_v52  ;;  %v60_v61 = vunpack.c.l.bf16 %v35_v52  ;;  %v1243_v2 = vld [vmem:[%s1666_s1 + $0x198] sm:$0xff]   ;;  %v1245_v13 = vld [vmem:[%s1666_s1 + $0x168] sm:$0xff]  }
  0x16   :  { %1122 = vmatprep.subr.bf16.mxu1 %v1221_v23  ;;  %v282_v19 = vpack.c.bf16 %v261_v15, %v254_v14  ;;  %v1233_v23 = vld [vmem:[%s1666_s1 + $0x148] sm:$0xff]   ;;  %vm200_vm4 = vcmp.ge.f32.partialorder %v172_v16, 0.0  ;;  %vm207_vm5 = vcmp.ge.f32.partialorder %v179_v17, 0.0  ;;  %v95_v1 = vsub.s32 6, %v1363_v25  ;;  %v36_v6 = vld [vmem:[%s1667_s0 + $0x5c] sm:$0xff] }
  0x17   :  { %1095 = vmatpush3.bf16.msra.mxu0 %v1220_v22  ;;  %v171_v22 = vadd.f32 %v1440_v56, %v106_v8  ;;  %v126_v3 = vmul.f32 %v1407_v45, %v61_v60  ;;  %v125_v4 = vmul.f32 %v1416_v48, %v60_v61  ;;  %v1521_v8 = vrot.slane %v1399_v39, %v91_v51  ;;  %v1251_v60 = vld [vmem:[%s1666_s1 + $0x178] sm:$0xff]  }
  0x18   :  { %1096 = vmatprep.subr.bf16.mxu0 %v1223_v26  ;;  %v228_v26 = vmul.f32 0.2, %v172_v16  ;;  %782 = vmatprep.mubr.bf16.mxu0 %v282_v19  ;;  %v63_v11 = vunpack.c.h.bf16 %v36_v6  ;;  %v1578_v52 = vrot.slane %v1404_v44, %v95_v1 }
  0x19   :  { %1123 = vmatpush3.bf16.msra.mxu1 %v1222_v24  ;;  %v281_v24 = vpack.c.bf16 %v260_v21, %v253_v20  ;;  %vm199_vm6 = vcmp.ge.f32.partialorder %v171_v22, 0.0  ;;  %v191_v12 = vadd.f32 %v1410_v46, %v126_v3  ;;  %v190_v14 = vadd.f32 %v1419_v49, %v125_v4  ;;  %v1246_v21 = vld [vmem:[%s1666_s1 + $0x1a0] sm:$0xff]  }
  0x1a   :  { %1124 = vmatprep.subr.bf16.mxu1 %v1225_v28  ;;  %v178_v28 = vadd.f32 %v1440_v56, %v113_v9  ;;  %v256_v30 = vsel %vm200_vm4, %v172_v16, %v228_v26  ;;  %v62_v16 = vunpack.c.l.bf16 %v36_v6  ;;  %v1253_v6 = vld [vmem:[%s1666_s1 + $0x138] sm:$0xff]  }
  0x1b   :  { %1097 = vmatpush3.bf16.msra.mxu0 %v1224_v27  ;;  %v235_v27 = vmul.f32 0.2, %v179_v17  ;;  %vm219_vm10 = vcmp.ge.f32.partialorder %v191_v12, 0.0  ;;  %v247_v19 = vmul.f32 0.2, %v191_v12  ;;  %vm218_vm11 = vcmp.ge.f32.partialorder %v190_v14, 0.0 }
  0x1c   :  { %1098 = vmatprep.subr.bf16.mxu0 %v1227_v31  ;;  %vm206_vm7 = vcmp.ge.f32.partialorder %v178_v28, 0.0  ;;  %v234_v32 = vmul.f32 0.2, %v178_v28  ;;  %v246_v20 = vmul.f32 0.2, %v190_v14 }
  0x1d   :  { %1125 = vmatpush3.bf16.msra.mxu1 %v1226_v29  ;;  %v227_v29 = vmul.f32 0.2, %v171_v22  ;;  %v263_v31 = vsel %vm207_vm5, %v179_v17, %v235_v27  ;;  %v1247_v27 = vld [vmem:[%s1666_s1 + $0x128] sm:$0xff]  }
  0x1e   :  { %1126 = vmatprep.subr.bf16.mxu1 %v1229_v35  ;;  %v284_v35 = vpack.c.bf16 %v263_v31, %v256_v30  ;;  %v262_v37 = vsel %vm206_vm7, %v178_v28, %v234_v32  ;;  %v274_v26 = vsel %vm218_vm11, %v190_v14, %v246_v20  ;;  %v1254_v20 = vld [vmem:[%s1666_s1 + $0x1b8] sm:$0xff]  }
  0x1f   :  { %1099 = vmatpush3.bf16.msra.mxu0 %v1228_v33  ;;  %v255_v33 = vsel %vm199_vm6, %v171_v22, %v227_v29  ;;  %v127_v29 = vmul.f32 %v1437_v55, %v62_v16 }
  0x20   :  { %1140 = vmatprep.subr.bf16.mxu0 %v1231_v50  ;;  %831 = vmatprep.mubr.bf16.mxu1 %v284_v35  ;;  %v283_v40 = vpack.c.bf16 %v262_v37, %v255_v33  ;;  %v87_v50 = vsub.s32 4, %v1363_v25 }
  0x21   :  { %1127 = vmatpush3.bf16.msra.mxu1 %v1230_v47  ;;  %v31_v47 = vld [vmem:[%s1667_s0 + $0x38] sm:$0xff]  ;;  %v192_v35 = vadd.f32 %v1440_v56, %v127_v29 }
  0x22   :  { %1178 = vmatprep.subr.bf16.mxu1 %v1234_v5  ;;  %783 = vmatmul.mubr.bf16.vlgmr.msra.gmra.mrb[0].mxu0 %v281_v24  ;;  %v54_v57 = vunpack.c.h.bf16 %v31_v47  ;;  %v53_v58 = vunpack.c.l.bf16 %v31_v47  ;;  %v1516_v7 = vrot.slane %v1399_v39, %v87_v50  ;;  %v275_v24 = vsel %vm219_vm10, %v191_v12, %v247_v19  ;;  %v25_v47 = vld [vmem:[%s1667_s0 + $0x10] sm:$0xff] }
  0x23   :  { %1141 = vmatpush3.bf16.msra.mxu0 %v1232_v18  ;;  %vm220_vm15 = vcmp.ge.f32.partialorder %v192_v35, 0.0  ;;  %v43_v61 = vunpack.c.l.bf16 %v25_v47 }
  0x24   :  { %1142 = vmatprep.subr.bf16.mxu0 %v1233_v23  ;;  %832 = vmatmul.mubr.bf16.vlgmr.msra.gmra.mrb[0].mxu1 %v283_v40  ;;  %v119_v63 = vmul.f32 %v1407_v45, %v54_v57  ;;  %v118_v0 = vmul.f32 %v1416_v48, %v53_v58  ;;  %v1244_v45 = vld [vmem:[%s1666_s1 + $0x120] sm:$0xff]   ;;  %v128_v23 = vmul.f32 %v1431_v53, %v63_v11 }
  0x25   :  { %1179 = vmatpush3.bf16.msra.mxu1 %v1234_v5  ;;  %v32_v5 = vld [vmem:[%s1667_s0 + $0x40] sm:$0xff] }
  0x26   :  { %1180 = vmatprep.subr.bf16.mxu1 %v1237_v38  ;;  %v184_v48 = vadd.f32 %v1410_v46, %v119_v63  ;;  %v183_v9 = vadd.f32 %v1419_v49, %v118_v0  ;;  %v56_v10 = vunpack.c.h.bf16 %v32_v5  ;;  %v55_v15 = vunpack.c.l.bf16 %v32_v5 }
  0x27   :  { %1143 = vmatpush3.bf16.msra.mxu0 %v1235_v34  ;;  %v193_v33 = vadd.f32 %v1434_v54, %v128_v23  ;;  %v44_v63 = vunpack.c.h.bf16 %v25_v47 }
  0x28   :  { %1144 = vmatprep.subr.bf16.mxu0 %v1236_v36  ;;  %vm212_vm8 = vcmp.ge.f32.partialorder %v184_v48, 0.0  ;;  %v240_v17 = vmul.f32 0.2, %v184_v48  ;;  %vm211_vm9 = vcmp.ge.f32.partialorder %v183_v9, 0.0  ;;  %v239_v18 = vmul.f32 0.2, %v183_v9 }
  0x29   :  { %1181 = vmatpush3.bf16.msra.mxu1 %v1237_v38  ;;  %v121_v49 = vmul.f32 %v1431_v53, %v56_v10  ;;  %v120_v28 = vmul.f32 %v1437_v55, %v55_v15  ;;  %v1248_v53 = vld [vmem:[%s1666_s1 + $0x170] sm:$0xff]   ;;  %v1249_v55 = vld [vmem:[%s1666_s1 + $0x1a8] sm:$0xff]   ;;  %v1556_v36 = vrot.slane %v1404_v44, %v91_v51  ;;  %vm221_vm13 = vcmp.ge.f32.partialorder %v193_v33, 0.0 }
  0x2a   :  { %1182 = vmatprep.subr.bf16.mxu1 %v1240_v43  ;;  %v268_v46 = vsel %vm212_vm8, %v184_v48, %v240_v17  ;;  %v267_v22 = vsel %vm211_vm9, %v183_v9, %v239_v18  ;;  %v1250_v38 = vld [vmem:[%s1666_s1 + $0x130] sm:$0xff]   ;;  %v96_v51 = vrot.slane %v1399_v39, %v95_v1 }
  0x2b   :  { %1145 = vmatpush3.bf16.msra.mxu0 %v1238_v41  ;;  %v289_v30 = vpack.c.bf16 %v275_v24, %v268_v46  ;;  %v288_v31 = vpack.c.bf16 %v274_v26, %v267_v22  ;;  %v186_v32 = vadd.f32 %v1434_v54, %v121_v49  ;;  %v185_v34 = vadd.f32 %v1440_v56, %v120_v28  ;;  %v1252_v1 = vld [vmem:[%s1666_s1 + $0x1b0] sm:$0xff]   ;;  %v33_v26 = vld [vmem:[%s1667_s0 + $0x48] sm:$0xff] }
  0x2c   :  { %1146 = vmatprep.subr.bf16.mxu0 %v1239_v42  ;;  %v1561_v54 = vrot.slane %v1404_v44, %v87_v50  ;;  %v249_v56 = vmul.f32 0.2, %v193_v33  ;;  %v248_v41 = vmul.f32 0.2, %v192_v35  ;;  %v29_v50 = vld [vmem:[%s1667_s0 + $0x2c] sm:$0xff] }
  0x2d   :  { %1183 = vmatpush3.bf16.msra.mxu1 %v1240_v43  ;;  %790 = vmatprep.mubr.bf16.mxu0 %v289_v30  ;;  %vm214_vm12 = vcmp.ge.f32.partialorder %v186_v32, 0.0  ;;  %v242_v37 = vmul.f32 0.2, %v186_v32  ;;  %vm213_vm14 = vcmp.ge.f32.partialorder %v185_v34, 0.0  ;;  %v241_v40 = vmul.f32 0.2, %v185_v34 }
  0x2e   :  { %1184 = vmatprep.subr.bf16.mxu1 %v1243_v2  ;;  %791 = vmatmul.mubr.bf16.gmra.mrb[4].mxu0 %v288_v31  ;;  %v277_v43 = vsel %vm221_vm13, %v193_v33, %v249_v56  ;;  %v50_v25 = vunpack.c.l.bf16 %v29_v50  ;;  %v51_v0 = vunpack.c.h.bf16 %v29_v50  ;;  %v34_v44 = vld [vmem:[%s1667_s0 + $0x50] ss:$28 sps:$4 sm:$0xff]   ;;  %v37_v30 = vld [vmem:[%s1667_s0 + $0x64] sm:$0xff]  ;;  %vm953_vm13 = vcmask 523264  }
  0x2f   :  { %1147 = vmatpush3.bf16.msra.mxu0 %v1241_v59  ;;  %v270_v42 = vsel %vm214_vm12, %v186_v32, %v242_v37  ;;  %v269_v58 = vsel %vm213_vm14, %v185_v34, %v241_v40  ;;  %v276_v59 = vsel %vm220_vm15, %v192_v35, %v248_v41  ;;  %v59_v5 = vunpack.c.l.bf16 %v34_v44 }
  0x30   :  { %1148 = vmatprep.subr.bf16.mxu0 %v1242_v62  ;;  %v291_v57 = vpack.c.bf16 %v277_v43, %v270_v42  ;;  %v26_v62 = vld [vmem:[%s1667_s0 + $0x18] ss:$28 sps:$4 sm:$0xff]   ;;  %v290_v39 = vpack.c.bf16 %v276_v59, %v269_v58  ;;  %v115_v48 = vmul.f32 %v1516_v7, %v50_v25  ;;  %v116_v9 = vmul.f32 %v1521_v8, %v51_v0 }
  0x31   :  { %1185 = vmatpush3.bf16.msra.mxu1 %v1243_v2  ;;  %v108_v2 = vmul.f32 %v1516_v7, %v43_v61  ;;  %v45_v3 = vunpack.c.l.bf16 %v26_v62  ;;  %v52_v4 = vunpack.c.h.bf16 %v26_v62  ;;  %v66_v10 = vunpack.c.h.bf16 %v34_v44 }
  0x32   :  { %1186 = vmatprep.subr.bf16.mxu1 %v1246_v21  ;;  %839 = vmatprep.mubr.bf16.mxu1 %v291_v57  ;;  %v124_v14 = vmul.f32 %v96_v51, %v59_v5  ;;  %v181_v16 = vadd.f32 %v1556_v36, %v116_v9  ;;  %v180_v17 = vadd.f32 %v1561_v54, %v115_v48  ;;  %v58_v37 = vunpack.c.h.bf16 %v33_v26  ;;  %v1019_v9 = vld [vmem:[%s1671_s2] ss:$0 sm:$0xff] }
  0x33   :  { %1149 = vmatpush3.bf16.msra.mxu0 %v1244_v45  ;;  %840 = vmatmul.mubr.bf16.gmra.mrb[4].mxu1 %v290_v39  ;;  %v109_v45 = vmul.f32 %v1521_v8, %v44_v63  ;;  %v173_v11 = vadd.f32 %v1561_v54, %v108_v2  ;;  %v110_v12 = vmul.f32 %v96_v51, %v45_v3  ;;  %v65_v40 = vunpack.c.h.bf16 %v37_v30 }
  0x34   :  { %1150 = vmatprep.subr.bf16.mxu0 %v1245_v13  ;;  %v117_v13 = vmul.f32 %v96_v51, %v52_v4  ;;  %v131_v18 = vmul.f32 %v96_v51, %v66_v10  ;;  %vm209_vm2 = vcmp.ge.f32.partialorder %v181_v16, 0.0  ;;  %v237_v49 = vmul.f32 0.2, %v181_v16 }
  0x35   :  { %1187 = vmatpush3.bf16.msra.mxu1 %v1246_v21  ;;  %v174_v15 = vadd.f32 %v1556_v36, %v109_v45  ;;  %vm201_vm0 = vcmp.ge.f32.partialorder %v173_v11, 0.0  ;;  %v229_v19 = vmul.f32 0.2, %v173_v11  ;;  %v175_v46 = vadd.f32 %v1578_v52, %v110_v12 }
  0x36   :  { %1188 = vmatprep.subr.bf16.mxu1 %v1249_v55  ;;  %v182_v21 = vadd.f32 %v1578_v52, %v117_v13  ;;  %vm208_vm3 = vcmp.ge.f32.partialorder %v180_v17, 0.0  ;;  %v236_v23 = vmul.f32 0.2, %v180_v17  ;;  %v265_v28 = vsel %vm209_vm2, %v181_v16, %v237_v49 }
  0x37   :  { %1151 = vmatpush3.bf16.msra.mxu0 %v1247_v27  ;;  %vm202_vm1 = vcmp.ge.f32.partialorder %v174_v15, 0.0  ;;  %v230_v22 = vmul.f32 0.2, %v174_v15  ;;  %v257_v24 = vsel %vm201_vm0, %v173_v11, %v229_v19  ;;  %vm203_vm4 = vcmp.ge.f32.partialorder %v175_v46, 0.0 }
  0x38   :  { %1152 = vmatprep.subr.bf16.mxu0 %v1248_v53  ;;  %vm210_vm5 = vcmp.ge.f32.partialorder %v182_v21, 0.0  ;;  %v231_v29 = vmul.f32 0.2, %v175_v46  ;;  %v264_v32 = vsel %vm208_vm3, %v180_v17, %v236_v23  ;;  %v238_v33 = vmul.f32 0.2, %v182_v21 }
  0x39   :  { %1189 = vmatpush3.bf16.msra.mxu1 %v1249_v55  ;;  %v258_v27 = vsel %vm202_vm1, %v174_v15, %v230_v22  ;;  %v189_v53 = vadd.f32 %v1578_v52, %v124_v14  ;;  %v285_v34 = vpack.c.bf16 %v264_v32, %v257_v24  ;;  %v196_v55 = vadd.f32 %v1578_v52, %v131_v18 }
  0x3a   :  { %1190 = vmatprep.subr.bf16.mxu1 %v1252_v1  ;;  %v286_v31 = vpack.c.bf16 %v265_v28, %v258_v27  ;;  %v259_v35 = vsel %vm203_vm4, %v175_v46, %v231_v29  ;;  %v266_v56 = vsel %vm210_vm5, %v182_v21, %v238_v33  ;;  %v123_v43 = vmul.f32 %v1521_v8, %v58_v37 }
  0x3b   :  { %1153 = vmatpush3.bf16.msra.mxu0 %v1250_v38  ;;  %vm217_vm6 = vcmp.ge.f32.partialorder %v189_v53, 0.0  ;;  %v245_v38 = vmul.f32 0.2, %v189_v53  ;;  %v287_v41 = vpack.c.bf16 %v266_v56, %v259_v35  ;;  %vm224_vm7 = vcmp.ge.f32.partialorder %v196_v55, 0.0 }
  0x3c   :  { %1154 = vmatprep.subr.bf16.mxu0 %v1251_v60  ;;  %880 = vmatprep.mubr.bf16.mxu0 %v286_v31  ;;  %v252_v42 = vmul.f32 0.2, %v196_v55  ;;  %v130_v50 = vmul.f32 %v1521_v8, %v65_v40  ;;  %v57_v51 = vunpack.c.l.bf16 %v33_v26  ;;  %v64_v57 = vunpack.c.l.bf16 %v37_v30 }
  0x3d   :  { %1191 = vmatpush3.bf16.msra.mxu1 %v1252_v1  ;;  %v273_v47 = vsel %vm217_vm6, %v189_v53, %v245_v38  ;;  %1194 = vmatprep.mubr.bf16.mxu1 %v287_v41  ;;  %v188_v58 = vadd.f32 %v1556_v36, %v123_v43  ;;  %vm950_vm12 = vcmask 517120   ;;  %v1255_v5 = vmov 0.0  }
  0x3e   :  { %1192 = vmatprep.subr.bf16.mxu1 %v1254_v20  ;;  %v280_v52 = vsel %vm224_vm7, %v196_v55, %v252_v42  ;;  %v195_v60 = vadd.f32 %v1556_v36, %v130_v50  ;;  %v122_v61 = vmul.f32 %v1516_v7, %v57_v51  ;;  %v129_v62 = vmul.f32 %v1516_v7, %v64_v57 }
  0x3f   :  { %1155 = vmatpush3.bf16.msra.mxu0 %v1253_v6  ;;  %v294_v59 = vpack.c.bf16 %v280_v52, %v273_v47  ;;  %vm216_vm8 = vcmp.ge.f32.partialorder %v188_v58, 0.0  ;;  %v244_v39 = vmul.f32 0.2, %v188_v58  ;;  %951 = vst.msk [vmem:[%s1670_s6] sm:$0x3] %vm950_vm12, %v1255_v5  ;;  %vm1006_vm14 = vcmask 519168  }
  0x40   :  { %vm223_vm9 = vcmp.ge.f32.partialorder %v195_v60, 0.0  ;;  %v251_v63 = vmul.f32 0.2, %v195_v60  ;;  %v187_v8 = vadd.f32 %v1561_v54, %v122_v61  ;;  %v194_v25 = vadd.f32 %v1561_v54, %v129_v62 }
  0x41   :  { %1193 = vmatpush3.bf16.msra.mxu1 %v1254_v20  ;;  %v272_v0 = vsel %vm216_vm8, %v188_v58, %v244_v39  ;;  %vm968_vm15 = vcmask 516096  }
  0x42   :  { %881 = vmatmul.mubr.bf16.vlgmr.msra.gmra.mrb[8].mxu0 %v285_v34  ;;  %v279_v44 = vsel %vm223_vm9, %v195_v60, %v251_v63  ;;  %vm215_vm10 = vcmp.ge.f32.partialorder %v187_v8, 0.0  ;;  %vm222_vm11 = vcmp.ge.f32.partialorder %v194_v25, 0.0  ;;  %v243_v1 = vmul.f32 0.2, %v187_v8 }
  0x43   :  { %v293_v2 = vpack.c.bf16 %v279_v44, %v272_v0  ;;  %v250_v36 = vmul.f32 0.2, %v194_v25 }
  0x44   :  { %1195 = vmatmul.mubr.bf16.vlgmr.msra.gmra.mrb[8].mxu1 %v294_v59  ;;  %v271_v3 = vsel %vm215_vm10, %v187_v8, %v243_v1 }
  0x45   :  { %888 = vmatprep.mubr.bf16.mxu0 %v293_v2  ;;  %v278_v4 = vsel %vm222_vm11, %v194_v25, %v250_v36 }
  0x46   :  { %v292_v7 = vpack.c.bf16 %v278_v4, %v271_v3 }
  0x4a   :  { %889 = vmatmul.mubr.bf16.gmra.mrb[12].mxu0 %v292_v7 }
  0xf5   :  { %v1100_v6 = vpop.f32.mrb[0].mxu0 }
  0xf6   :  { %v1101_v54 = vpop.f32.mrb[1].mxu0 }
  0xf7   :  { %v1102_v45 = vadd.f32 %v1101_v54, %v1100_v6  ;;  %v1103_v48 = vpop.f32.mrb[2].mxu0  ;;  %v1128_v13 = vpop.f32.mrb[0].mxu1 }
  0xf8   :  { %v1104_v10 = vpop.f32.mrb[3].mxu0  ;;  %v1129_v14 = vpop.f32.mrb[1].mxu1 }
  0xf9   :  { %v1105_v11 = vadd.f32 %v1104_v10, %v1103_v48  ;;  %v785_v12 = vadd.f32 %v1102_v45, %v1019_v9  ;;  %v1130_v16 = vadd.f32 %v1129_v14, %v1128_v13  ;;  %v1131_v17 = vpop.f32.mrb[2].mxu1 }
  0xfa   :  { %v1132_v18 = vpop.f32.mrb[3].mxu1 }
  0xfb   :  { %v788_v15 = vadd.f32 %v1105_v11, %v1019_v9  ;;  %v834_v19 = vadd.f32 %v1130_v16, %v785_v12  ;;  %v1133_v20 = vadd.f32 %v1132_v18, %v1131_v17 }
  0xfd   :  { %v837_v46 = vadd.f32 %v1133_v20, %v788_v15 }
 0x101   :  { %v1106_v21 = vpop.f32.mrb[4].mxu0 }
 0x102   :  { %v1107_v22 = vpop.f32.mrb[5].mxu0 }
 0x103   :  { %v1108_v49 = vadd.f32 %v1107_v22, %v1106_v21  ;;  %v1109_v23 = vpop.f32.mrb[6].mxu0 }
 0x104   :  { %v1110_v24 = vpop.f32.mrb[7].mxu0 }
 0x105   :  { %v1111_v26 = vadd.f32 %v1110_v24, %v1109_v23  ;;  %v793_v27 = vadd.f32 %v1108_v49, %v1019_v9 }
 0x106   :  { %v1134_v28 = vpop.f32.mrb[4].mxu1 }
 0x107   :  { %v1135_v29 = vpop.f32.mrb[5].mxu1  ;;  %v796_v30 = vadd.f32 %v1111_v26, %v1019_v9 }
 0x108   :  { %v1136_v31 = vadd.f32 %v1135_v29, %v1134_v28  ;;  %v1137_v32 = vpop.f32.mrb[6].mxu1  ;;  %v952_v28 = vld [vmem:[%s1670_s6] sm:$0x1] }
 0x109   :  { %v1138_v33 = vpop.f32.mrb[7].mxu1 }
 0x10a   :  { %v842_v53 = vadd.f32 %v1136_v31, %v793_v27  ;;  %v1139_v34 = vadd.f32 %v1138_v33, %v1137_v32  ;;  %v970_v31 = vld [vmem:[%s1670_s6 + $0x1] sm:$0x1] }
 0x10c   :  { %v845_v35 = vadd.f32 %v1139_v34, %v796_v30 }
 0x115   :  { %v1156_v55 = vpop.f32.mrb[8].mxu0 }
 0x116   :  { %v1157_v37 = vpop.f32.mrb[9].mxu0 }
 0x117   :  { %v1158_v56 = vadd.f32 %v1157_v37, %v1156_v55  ;;  %v1159_v38 = vpop.f32.mrb[10].mxu0  ;;  %v1196_v43 = vpop.f32.mrb[8].mxu1 }
 0x118   :  { %v1160_v40 = vpop.f32.mrb[11].mxu0  ;;  %v931_v47 = vpop.f32.mrb[9].mxu1 }
 0x119   :  { %v1161_v41 = vadd.f32 %v1160_v40, %v1159_v38  ;;  %v883_v42 = vadd.f32 %v1158_v56, %v834_v19  ;;  %v1197_v57 = vpop.f32.mrb[10].mxu1 }
 0x11a   :  { %v934_v52 = vpop.f32.mrb[11].mxu1 }
 0x11b   :  { %v886_v50 = vadd.f32 %v1161_v41, %v837_v46  ;;  %v932_v51 = vadd.f32 %v931_v47, %v883_v42 }
 0x11d   :  { %v971_v58 = vmul.f32 %v932_v51, %v932_v51  ;;  %v1080_v59 = vpack.c.bf16 %v932_v51, %v932_v51  ;;  %v935_v60 = vadd.f32 %v934_v52, %v886_v50  ;;  %v954_v61 = vsel %vm953_vm13, %v932_v51, 0.0  ;;  %v1162_v44 = vpop.f32.mrb[12].mxu0 }
 0x11e   :  { %v1163_v2 = vpop.f32.mrb[13].mxu0 }
 0x11f   :  { %1007 = vst.msk [vmem:[%s1672_s5] sm:$0xf] %vm1006_vm14, %v1080_v59  ;;  %v955_v62 = vsel %vm953_vm13, %v935_v60, 0.0  ;;  %v972_v39 = vmul.f32 %v935_v60, %v935_v60  ;;  %v1081_v63 = vpack.c.bf16 %v935_v60, %v935_v60  ;;  %v975_v25 = vsel %vm953_vm13, %v971_v58, 0.0  ;;  %v1165_v3 = vpop.f32.mrb[14].mxu0 }
 0x120   :  { %v956_v8 = vadd.f32 %v955_v62, %v954_v61  ;;  %v1164_v36 = vadd.f32 %v1163_v2, %v1162_v44  ;;  %v1166_v4 = vpop.f32.mrb[15].mxu0 }
 0x121   :  { %v976_v0 = vsel %vm953_vm13, %v972_v39, 0.0  ;;  %1008 = vst.msk [vmem:[%s1672_s5 + $0x4] sm:$0xf] %vm1006_vm14, %v1081_v63  ;;  %v1167_v5 = vadd.f32 %v1166_v4, %v1165_v3 }
 0x122   :  { %v977_v1 = vadd.f32 %v976_v0, %v975_v25  ;;  %v891_v7 = vadd.f32 %v1164_v36, %v842_v53 }
 0x123   :  { %v894_v54 = vadd.f32 %v1167_v5, %v845_v35 }
 0x124   :  { %v940_v6 = vadd.f32 %v1196_v43, %v891_v7 }
 0x125   :  { %v943_v10 = vadd.f32 %v1197_v57, %v894_v54 }
 0x126   :  { %v957_v45 = vsel %vm953_vm13, %v940_v6, 0.0  ;;  %v973_v48 = vmul.f32 %v940_v6, %v940_v6  ;;  %v1082_v9 = vpack.c.bf16 %v940_v6, %v940_v6 }
 0x127   :  { %v958_v11 = vadd.f32 %v957_v45, %v956_v8  ;;  %v959_v13 = vsel %vm953_vm13, %v943_v10, 0.0  ;;  %v974_v14 = vmul.f32 %v943_v10, %v943_v10  ;;  %v1083_v15 = vpack.c.bf16 %v943_v10, %v943_v10 }
 0x128   :  { %v978_v12 = vsel %vm953_vm13, %v973_v48, 0.0  ;;  %1009 = vst.msk [vmem:[%s1672_s5 + $0x8] sm:$0xf] %vm1006_vm14, %v1082_v9 }
 0x129   :  { %v979_v16 = vadd.f32 %v978_v12, %v977_v1  ;;  %v960_v17 = vadd.f32 %v959_v13, %v958_v11  ;;  %v980_v18 = vsel %vm953_vm13, %v974_v14, 0.0  ;;  %1010 = vst.msk [vmem:[%s1672_s5 + $0xc] sm:$0xf] %vm1006_vm14, %v1083_v15 }
 0x12b   :  { %v961_v19 = vrot.slane %v960_v17, 4  ;;  %v981_v20 = vadd.f32 %v980_v18, %v979_v16 }
 0x12d   :  { %v962_v46 = vadd.f32 %v961_v19, %v960_v17  ;;  %v982_v21 = vrot.slane %v981_v20, 4 }
 0x12f   :  { %v963_v22 = vrot.slane %v962_v46, 2  ;;  %v983_v49 = vadd.f32 %v982_v21, %v981_v20 }
 0x131   :  { %v964_v23 = vadd.f32 %v963_v22, %v962_v46  ;;  %v984_v24 = vrot.slane %v983_v49, 2 }
 0x133   :  { %v965_v26 = vrot.slane %v964_v23, 1  ;;  %v985_v27 = vadd.f32 %v984_v24, %v983_v49 }
 0x135   :  { %v966_v29 = vadd.f32 %v965_v26, %v964_v23  ;;  %v986_v30 = vrot.slane %v985_v27, 1 }
 0x137   :  { %v967_v32 = vadd.f32 %v966_v29, %v952_v28  ;;  %v987_v33 = vadd.f32 %v986_v30, %v985_v27 }
 0x139   :  { %969 = vst.msk [vmem:[%s1670_s6] sm:$0x1] %vm968_vm15, %v967_v32  ;;  %v988_v53 = vadd.f32 %v987_v33, %v970_v31 }
 0x13b   :  { %989 = vst.msk [vmem:[%s1670_s6 + $0x1] sm:$0x1] %vm968_vm15, %v988_v53 }

// kernel: _lambda_.9
= control target key start
LH: loop header
LB: loop body
LE: loop exit
PB: predicated region body
PF: predicated region fallthrough
CT: control target
= control target key end

     0   :  { %v27_v0 = vlaneseq  ;;  %v325_v2 = vmov 1983009808   ;;  %vm291_vm2 = vcmask 1041408   ;;  %vm317_vm3 = vcmask 1024   ;;  %s400_s0 = inlined_call_operand.vmem [shape: bf16[2,1024], index: 0, kind: input, shape index: {}]   ;;  %s401_s2 = inlined_call_operand.vmem [shape: f32[1,1024], index: 2, kind: input, shape index: {}]   ;;  %s402_s4 = inlined_call_operand.<no memory space> [shape: f32[1,1], index: 4, kind: input, shape index: {}]   ;;  %s403_s3 = inlined_call_operand.vmem [shape: f32[1,1024], index: 3, kind: input, shape index: {}]   ;;  %s404_s1 = inlined_call_operand.vmem [shape: f32[1,1024], index: 1, kind: input, shape index: {}]   ;;  %s405_s5 = inlined_call_operand.vmem [shape: f32[2,1], index: 5, kind: output, shape index: {}]  }
   0x1   :  { %v22_v1 = vld [vmem:[%s400_s0] sm:$0xff]  ;;  %v62_v3 = vunpack.c.l.s4 %v325_v2  ;;  %v10_v4 = vstv %s402_s4 }
   0x2   :  { %v28_v5 = vshrl.u32 %v27_v0, 7  ;;  %11 = vst [vmem:[#allocation2] sm:$0x1] %v10_v4  ;;  %v23_v6 = vunpack.c.l.bf16 %v22_v1  ;;  %v24_v7 = vunpack.c.h.bf16 %v22_v1  ;;  %v25_v8 = vld [vmem:[%s401_s2] sm:$0xff] }
   0x3   :  { %v63_v9 = vunpack.c.0.s8 %v62_v3  ;;  %v97_v18 = vld [vmem:[%s403_s3] sm:$0xff] }
   0x4   :  { %v29_v10 = vsub.s32 0, %v28_v5  ;;  %v33_v11 = vsub.s32 1, %v28_v5  ;;  %v37_v12 = vsub.s32 2, %v28_v5  ;;  %v41_v13 = vsub.s32 3, %v28_v5  ;;  %v175_v39 = vld [vmem:[%s404_s1] sm:$0xff] }
   0x5   :  { %v45_v14 = vsub.s32 4, %v28_v5  ;;  %v49_v15 = vsub.s32 5, %v28_v5  ;;  %v53_v16 = vsub.s32 6, %v28_v5  ;;  %v57_v17 = vsub.s32 7, %v28_v5 }
   0x6   :  { %v30_v19 = vrot.slane %v25_v8, %v29_v10  ;;  %v34_v20 = vrot.slane %v25_v8, %v33_v11  ;;  %v38_v21 = vrot.slane %v25_v8, %v37_v12  ;;  %v42_v22 = vrot.slane %v25_v8, %v41_v13 }
   0x7   :  { %v46_v23 = vrot.slane %v25_v8, %v45_v14  ;;  %v50_v24 = vrot.slane %v25_v8, %v49_v15  ;;  %v54_v25 = vrot.slane %v25_v8, %v53_v16  ;;  %v58_v26 = vrot.slane %v25_v8, %v57_v17 }
   0x8   :  { %v59_v27 = vcombine.low %v30_v19, %v34_v20  ;;  %v60_v28 = vcombine.low %v38_v21, %v42_v22  ;;  %v368_v29 = vsub.s32 %v63_v9, %v28_v5  ;;  %v102_v30 = vrot.slane %v97_v18, %v29_v10 }
   0x9   :  { %v76_v31 = vcombine.low %v46_v23, %v50_v24  ;;  %v77_v32 = vcombine.low %v54_v25, %v58_v26  ;;  %v106_v33 = vrot.slane %v97_v18, %v33_v11  ;;  %v110_v34 = vrot.slane %v97_v18, %v37_v12 }
   0xa   :  { %v67_v35 = vrot.slane %v59_v27, %v368_v29  ;;  %v74_v36 = vrot.slane %v60_v28, %v368_v29  ;;  %v114_v37 = vrot.slane %v97_v18, %v41_v13  ;;  %v118_v38 = vrot.slane %v97_v18, %v45_v14 }
   0xb   :  { %v84_v40 = vrot.slane %v76_v31, %v368_v29  ;;  %v91_v41 = vrot.slane %v77_v32, %v368_v29  ;;  %v122_v42 = vrot.slane %v97_v18, %v49_v15  ;;  %v126_v43 = vrot.slane %v97_v18, %v53_v16 }
   0xc   :  { %v75_v44 = vcombine.low %v67_v35, %v74_v36  ;;  %v130_v45 = vrot.slane %v97_v18, %v57_v17  ;;  %v131_v46 = vcombine.low %v102_v30, %v106_v33  ;;  %v132_v47 = vcombine.low %v110_v34, %v114_v37 }
   0xd   :  { %v92_v48 = vcombine.low %v84_v40, %v91_v41  ;;  %v148_v49 = vcombine.low %v118_v38, %v122_v42  ;;  %v180_v50 = vrot.slane %v175_v39, %v29_v10  ;;  %v184_v51 = vrot.slane %v175_v39, %v33_v11 }
   0xe   :  { %v95_v52 = vmul.f32 %v75_v44, %v23_v6  ;;  %v139_v53 = vrot.slane %v131_v46, %v368_v29  ;;  %v146_v54 = vrot.slane %v132_v47, %v368_v29  ;;  %v149_v55 = vcombine.low %v126_v43, %v130_v45 }
   0xf   :  { %v96_v56 = vmul.f32 %v92_v48, %v24_v7  ;;  %v156_v57 = vrot.slane %v148_v49, %v368_v29  ;;  %v188_v58 = vrot.slane %v175_v39, %v37_v12  ;;  %v192_v59 = vrot.slane %v175_v39, %v41_v13 }
  0x10   :  { %v147_v60 = vcombine.low %v139_v53, %v146_v54  ;;  %v163_v61 = vrot.slane %v149_v55, %v368_v29  ;;  %v196_v62 = vrot.slane %v175_v39, %v45_v14  ;;  %v200_v63 = vrot.slane %v175_v39, %v49_v15 }
  0x11   :  { %v204_v0 = vrot.slane %v175_v39, %v53_v16  ;;  %v208_v1 = vrot.slane %v175_v39, %v57_v17  ;;  %v209_v2 = vcombine.low %v180_v50, %v184_v51  ;;  %v210_v3 = vcombine.low %v188_v58, %v192_v59 }
  0x12   :  { %v164_v4 = vcombine.low %v156_v57, %v163_v61  ;;  %v167_v5 = vadd.f32 %v147_v60, %v95_v52  ;;  %v226_v6 = vcombine.low %v196_v62, %v200_v63 }
  0x13   :  { %v217_v8 = vrot.slane %v209_v2, %v368_v29  ;;  %v224_v7 = vrot.slane %v210_v3, %v368_v29  ;;  %v227_v9 = vcombine.low %v204_v0, %v208_v1 }
  0x14   :  { %v168_v10 = vadd.f32 %v164_v4, %v96_v56  ;;  %vm169_vm0 = vcmp.ge.f32.partialorder %v167_v5, 0.0  ;;  %v171_v11 = vmul.f32 0.2, %v167_v5  ;;  %v234_v12 = vrot.slane %v226_v6, %v368_v29 }
  0x15   :  { %v225_v13 = vcombine.low %v217_v8, %v224_v7  ;;  %v241_v14 = vrot.slane %v227_v9, %v368_v29 }
  0x16   :  { %vm170_vm1 = vcmp.ge.f32.partialorder %v168_v10, 0.0  ;;  %v172_v15 = vmul.f32 0.2, %v168_v10  ;;  %v173_v16 = vsel %vm169_vm0, %v167_v5, %v171_v11 }
  0x17   :  { %v242_v17 = vcombine.low %v234_v12, %v241_v14  ;;  %v245_v18 = vmul.f32 %v225_v13, %v173_v16 }
  0x18   :  { %v174_v19 = vsel %vm170_vm1, %v168_v10, %v172_v15 }
  0x19   :  { %v246_v20 = vmul.f32 %v242_v17, %v174_v19  ;;  %v249_v21 = vcombine.high %v245_v18, %v245_v18  ;;  %v256_v22 = vrot.slane %v245_v18, %v368_v29 }
  0x1b   :  { %v263_v23 = vrot.slane %v249_v21, %v368_v29  ;;  %v264_v24 = vcombine.high %v256_v22, %v256_v22  ;;  %v266_v25 = vcombine.high %v246_v20, %v246_v20  ;;  %v273_v26 = vrot.slane %v246_v20, %v368_v29 }
  0x1c   :  { %v292_v27 = vsel %vm291_vm2, %v256_v22, 0.0 }
  0x1d   :  { %v265_v28 = vcombine.high %v263_v23, %v263_v23  ;;  %v293_v30 = vsel %vm291_vm2, %v264_v24, 0.0  ;;  %v295_v32 = vsel %vm291_vm2, %v263_v23, 0.0  ;;  %v280_v33 = vrot.slane %v266_v25, %v368_v29  ;;  %v323_v29 = vld [vmem:[#allocation2] ss:$0 sm:$0xff] }
  0x1e   :  { %v294_v31 = vadd.f32 %v293_v30, %v292_v27  ;;  %v281_v34 = vcombine.high %v273_v26, %v273_v26  ;;  %v299_v37 = vsel %vm291_vm2, %v273_v26, 0.0 }
  0x1f   :  { %v297_v35 = vsel %vm291_vm2, %v265_v28, 0.0  ;;  %v282_v39 = vcombine.high %v280_v33, %v280_v33  ;;  %v303_v42 = vsel %vm291_vm2, %v280_v33, 0.0 }
  0x20   :  { %v296_v36 = vadd.f32 %v295_v32, %v294_v31  ;;  %v301_v40 = vsel %vm291_vm2, %v281_v34, 0.0 }
  0x21   :  { %v305_v44 = vsel %vm291_vm2, %v282_v39, 0.0 }
  0x22   :  { %v298_v38 = vadd.f32 %v297_v35, %v296_v36 }
  0x24   :  { %v300_v41 = vadd.f32 %v299_v37, %v298_v38 }
  0x26   :  { %v302_v43 = vadd.f32 %v301_v40, %v300_v41 }
  0x28   :  { %v304_v45 = vadd.f32 %v303_v42, %v302_v43 }
  0x2a   :  { %v306_v46 = vadd.f32 %v305_v44, %v304_v45 }
  0x2c   :  { %307 = vadd.xlane.f32.xlu0 %v306_v46 }
  0xb9   :  { %v308_v47 = vpop.xlane.xlu0 %307 }
  0xba   :  { %v316_v48 = vadd.f32 %v323_v29, %v308_v47 }
  0xbc   :  { %318 = vst.msk [vmem:[%s405_s5] sm:$0x3] %vm317_vm3, %v316_v48 }

</bundles_post_ra>
